<compile_context>
chip_gen: v7x
topology: tpu7x:2x2x1
jax: 0.10.0
libtpu: 0.0.40
codegen_flags: <defaults>
</compile_context>

<pallas_src>
import functools
import math

import jax
import jax.numpy as jnp
from jax.experimental import pallas as pl
from jax.experimental.pallas import tpu as pltpu


# ----------------------------- in-kernel helpers -----------------------------

def _layernorm(x, g, b, eps=1e-5):
    # f32 statistics (PyTorch LayerNorm, eps=1e-5)
    mu = jnp.mean(x, axis=-1, keepdims=True)
    xc = x - mu
    var = jnp.mean(xc * xc, axis=-1, keepdims=True)
    return xc * jax.lax.rsqrt(var + eps) * g + b


def _linear(x, w, b):
    # x: (M, Din); w: (Din, Dout) bf16; b: (1, Dout) f32.
    # bf16 x bf16 matmul with f32 accumulation on the MXU.
    return jnp.dot(x.astype(jnp.bfloat16), w,
                   preferred_element_type=jnp.float32) + b


def _split_heads(x, nhead, dh, nb, seq):
    # x: (nb*seq, nhead*dh) -> (nhead*nb, seq, dh) bf16, flat index n = h*nb + b.
    # One lane-slice per head + one stack total (amortized over the whole batch
    # chunk); the trailing reshape only touches leading dims (seq % 8 == 0 keeps
    # sublane tiling intact).
    cols = [x[:, h * dh:(h + 1) * dh] for h in range(nhead)]
    xh = jnp.stack(cols, axis=0)                       # (H, nb*seq, dh)
    return xh.reshape(nhead * nb, seq, dh).astype(jnp.bfloat16)


def _mha_core(q, k, v, bias, out_w, out_b, *, nhead, nb, tq, tk):
    # q: (nb*tq, D) f32 (already scaled); k/v: (nb*tk, D) f32; bias broadcastable
    # to (nhead*nb, tq, tk) f32; out_w: (D, D) bf16.
    D = q.shape[-1]
    dh = D // nhead

    qh = _split_heads(q, nhead, dh, nb, tq)            # (H*nb, tq, dh)
    kh = _split_heads(k, nhead, dh, nb, tk)            # (H*nb, tk, dh)
    vh = _split_heads(v, nhead, dh, nb, tk)

    # Batched (over b,h) attention: scores / softmax in f32.
    s = jnp.einsum("nqd,nkd->nqk", qh, kh,
                   preferred_element_type=jnp.float32)
    s = s + bias
    m = jnp.max(s, axis=-1, keepdims=True)
    e = jnp.exp(s - m)
    denom = jnp.sum(e, axis=-1, keepdims=True)
    p = e * pl.reciprocal(denom, approx=True)          # EUP reciprocal

    ctx = jnp.einsum("nqk,nkd->nqd", p.astype(jnp.bfloat16), vh,
                     preferred_element_type=jnp.float32)   # (H*nb, tq, dh)

    # Merge heads back to (nb*tq, D): one leading-dim reshape + one H-way concat.
    ctx = ctx.reshape(nhead, nb * tq, dh)
    ctx = jnp.concatenate([ctx[h] for h in range(nhead)], axis=-1)  # (nb*tq, D)

    # Single output projection with full K=D contraction depth.
    return jnp.dot(ctx.astype(jnp.bfloat16), out_w,
                   preferred_element_type=jnp.float32) + out_b


# --------------------------------- kernel ------------------------------------

def _decoder_kernel(x_ref, mem_ref, memp_ref, qpos_ref, mbias_ref, smask_ref,
                    sa_qkw_ref, sa_qkb_ref, sa_vw_ref, sa_vb_ref,
                    sa_ow_ref, sa_ob_ref,
                    ca_qw_ref, ca_qb_ref, ca_kw_ref, ca_kb_ref,
                    ca_vw_ref, ca_vb_ref, ca_ow_ref, ca_ob_ref,
                    n1g_ref, n1b_ref, n2g_ref, n2b_ref, n3g_ref, n3b_ref,
                    l1w_ref, l1b_ref, l2w_ref, l2b_ref,
                    nfg_ref, nfb_ref,
                    out_ref, kv_ref, *, nhead, bt, tq, skv):
    layer = pl.program_id(1)
    num_layers = pl.num_programs(1)
    D = x_ref.shape[-1]
    M = bt * tq

    # The resident output block IS the running residual stream.
    @pl.when(layer == 0)
    def _():
        out_ref[...] = x_ref[...]

    x = out_ref[...].reshape(M, D)                     # (M, D) f32, batch-flattened
    qpos = qpos_ref[...].reshape(M, D)

    # --- self attention (pre-norm), dropout = identity ------------------------
    t = _layernorm(x, n1g_ref[...], n1b_ref[...])
    qk_in = t + qpos                                   # with_pos_embed(tgt2, query_pos)
    qk = _linear(qk_in, sa_qkw_ref[...], sa_qkb_ref[...])   # fused Q,K (q pre-scaled)
    q_sa, k_sa = qk[:, :D], qk[:, D:]
    v_sa = _linear(t, sa_vw_ref[...], sa_vb_ref[...])

    # cur_kv = (k, v) for this layer / batch chunk (f32, matches PyTorch precision).
    kv_ref[0] = k_sa.reshape(bt, tq, D)
    kv_ref[1] = v_sa.reshape(bt, tq, D)

    sa = _mha_core(q_sa, k_sa, v_sa, smask_ref[...][None, :, :],
                   sa_ow_ref[...], sa_ob_ref[...],
                   nhead=nhead, nb=bt, tq=tq, tk=tq)
    x = x + sa

    # --- cross attention over encoder memory (mem + pos hoisted to wrapper) ---
    t = _layernorm(x, n2g_ref[...], n2b_ref[...])
    q_ca = _linear(t + qpos, ca_qw_ref[...], ca_qb_ref[...])     # q pre-scaled
    mem = mem_ref[...].reshape(bt * skv, D)                       # bf16
    memp = memp_ref[...].reshape(bt * skv, D)                     # bf16 (mem + pos)
    k_ca = _linear(memp, ca_kw_ref[...], ca_kb_ref[...])
    v_ca = _linear(mem, ca_vw_ref[...], ca_vb_ref[...])
    cbias = jnp.concatenate([mbias_ref[...]] * nhead, axis=0)     # (H*bt, 1, S)
    ca = _mha_core(q_ca, k_ca, v_ca, cbias,
                   ca_ow_ref[...], ca_ob_ref[...],
                   nhead=nhead, nb=bt, tq=tq, tk=skv)
    x = x + ca

    # --- feed-forward (ReLU) ---------------------------------------------------
    t = _layernorm(x, n3g_ref[...], n3b_ref[...])
    h = jnp.maximum(_linear(t, l1w_ref[...], l1b_ref[...]), 0.0)
    x = x + _linear(h, l2w_ref[...], l2b_ref[...])

    # Single store per layer; final layer writes decoder.norm(output).
    @pl.when(layer < num_layers - 1)
    def _():
        out_ref[...] = x.reshape(bt, tq, D)

    @pl.when(layer == num_layers - 1)
    def _():
        out_ref[...] = _layernorm(x, nfg_ref[...], nfb_ref[...]).reshape(bt, tq, D)


# --------------------------------- wrapper -----------------------------------

def transformer_decoder(tgt, memory, memory_key_padding_mask, pos,
                        pre_kv_list=None, self_attn_mask=None, query_pos=None,
                        *, prepared_params, nhead, batch_blocks=1):
    """prepared_params must come from prepare_params() (transposed / bf16 / scaled).

    batch_blocks: number of batch chunks on the parallel grid axis.
      1  -> maximum weight reuse (best on single-TensorCore v5e/v6e),
      2  -> feed both TensorCores on v7x.
    """
    T, B, D = tgt.shape
    S = memory.shape[0]
    pp = prepared_params
    L = pp["sa_qk_w"].shape[0]
    dff = pp["lin1_w"].shape[2]

    assert B % batch_blocks == 0, "batch must divide evenly into batch_blocks"
    bt = B // batch_blocks

    if pre_kv_list is not None:
        for pkv in pre_kv_list:
            # TODO(synk): incremental decoding (pre_kv concat into self-attn kv) not implemented.
            assert pkv is None, "only the prefill case (pre_kv=None) is implemented"

    # Batch-major activations (callers able to provide batch-major inputs can
    # skip these transposes entirely).
    x = jnp.transpose(tgt, (1, 0, 2)).astype(jnp.float32)            # (B, T, D)
    qpos = (jnp.transpose(query_pos, (1, 0, 2)).astype(jnp.float32)
            if query_pos is not None else jnp.zeros_like(x))
    mem_b = jnp.transpose(memory, (1, 0, 2)).astype(jnp.float32)     # (B, S, D)
    pos_b = jnp.transpose(pos, (1, 0, 2)).astype(jnp.float32)        # (B, S, D)
    mem_bf = mem_b.astype(jnp.bfloat16)
    memp_bf = (mem_b + pos_b).astype(jnp.bfloat16)                   # hoisted mem+pos
    mbias = jnp.where(memory_key_padding_mask, -1e9, 0.0).astype(jnp.float32)
    mbias = mbias[:, None, :]                                        # (B, 1, S)
    smask = (self_attn_mask.astype(jnp.float32) if self_attn_mask is not None
             else jnp.zeros((T, T), jnp.float32))                    # (T, T)

    inputs = [
        x, mem_bf, memp_bf, qpos, mbias, smask,
        pp["sa_qk_w"], pp["sa_qk_b"], pp["sa_v_w"], pp["sa_v_b"],
        pp["sa_out_w"], pp["sa_out_b"],
        pp["ca_q_w"], pp["ca_q_b"], pp["ca_k_w"], pp["ca_k_b"],
        pp["ca_v_w"], pp["ca_v_b"], pp["ca_out_w"], pp["ca_out_b"],
        pp["n1_g"], pp["n1_b"], pp["n2_g"], pp["n2_b"], pp["n3_g"], pp["n3_b"],
        pp["lin1_w"], pp["lin1_b"], pp["lin2_w"], pp["lin2_b"],
        pp["norm_g"], pp["norm_b"],
    ]

    def batch_spec(shape):      # shape excludes the (blocked) batch dim
        n = len(shape)
        return pl.BlockSpec((bt,) + shape, lambda nb, l, _n=n: (nb,) + (0,) * _n)

    def layer_spec(shape):      # shape excludes the (squeezed) layer dim
        n = len(shape)
        return pl.BlockSpec((None,) + shape, lambda nb, l, _n=n: (l,) + (0,) * _n)

    def shared_spec(shape):     # same block for every grid point
        n = len(shape)
        return pl.BlockSpec(shape, lambda nb, l, _n=n: (0,) * _n)

    in_specs = [
        batch_spec((T, D)),               # x
        batch_spec((S, D)),               # memory (bf16)
        batch_spec((S, D)),               # memory + pos (bf16)
        batch_spec((T, D)),               # query_pos
        batch_spec((1, S)),               # memory pad bias
        shared_spec((T, T)),              # self-attn mask
        layer_spec((D, 2 * D)), layer_spec((1, 2 * D)),   # sa fused q,k
        layer_spec((D, D)), layer_spec((1, D)),           # sa v
        layer_spec((D, D)), layer_spec((1, D)),           # sa out
        layer_spec((D, D)), layer_spec((1, D)),           # ca q
        layer_spec((D, D)), layer_spec((1, D)),           # ca k
        layer_spec((D, D)), layer_spec((1, D)),           # ca v
        layer_spec((D, D)), layer_spec((1, D)),           # ca out
        layer_spec((1, D)), layer_spec((1, D)),           # norm1
        layer_spec((1, D)), layer_spec((1, D)),           # norm2
        layer_spec((1, D)), layer_spec((1, D)),           # norm3
        layer_spec((D, dff)), layer_spec((1, dff)),       # linear1
        layer_spec((dff, D)), layer_spec((1, D)),         # linear2
        shared_spec((1, D)), shared_spec((1, D)),         # final norm
    ]

    out_specs = [
        # resident residual stream: constant block index over the layer axis
        pl.BlockSpec((bt, T, D), lambda nb, l: (nb, 0, 0)),
        # per-layer kv (f32), written every layer
        pl.BlockSpec((None, 2, bt, T, D), lambda nb, l: (l, 0, nb, 0, 0)),
    ]
    out_shape = (
        jax.ShapeDtypeStruct((B, T, D), jnp.float32),
        jax.ShapeDtypeStruct((L, 2, B, T, D), jnp.float32),
    )

    kernel = functools.partial(_decoder_kernel, nhead=nhead, bt=bt, tq=T, skv=S)

    out, kv = pl.pallas_call(
        kernel,
        out_shape=out_shape,
        grid_spec=pltpu.PrefetchScalarGridSpec(
            num_scalar_prefetch=0,
            grid=(batch_blocks, L),
            in_specs=in_specs,
            out_specs=out_specs,
        ),
        compiler_params=pltpu.CompilerParams(
            dimension_semantics=("parallel", "arbitrary"),
            vmem_limit_bytes=64 * 1024 * 1024),   # safe on v5e/v6e/v7x
    )(*inputs)

    # PyTorch: return (output.unsqueeze(0), cur_kv_list)
    out_tbd = jnp.transpose(out, (1, 0, 2))[None]       # (1, T, B, D)
    cur_kv_list = [kv[i] for i in range(L)]             # each (2, B, T, D) f32
    return out_tbd, cur_kv_list


# ------------------------------ params ---------------------------------------

def init_params(key, num_layers, d_model, dim_ff):
    """PyTorch-layout (out, in) f32 parameters, stacked over layers."""
    L, D = num_layers, d_model
    ks = jax.random.split(key, 10)
    W = lambda k, shape: 0.02 * jax.random.normal(k, shape, jnp.float32)
    return dict(
        sa_in_w=W(ks[0], (L, 3 * D, D)),  sa_in_b=W(ks[1], (L, 3 * D)),
        sa_out_w=W(ks[2], (L, D, D)),     sa_out_b=jnp.zeros((L, D), jnp.float32),
        ca_in_w=W(ks[3], (L, 3 * D, D)),  ca_in_b=W(ks[4], (L, 3 * D)),
        ca_out_w=W(ks[5], (L, D, D)),     ca_out_b=jnp.zeros((L, D), jnp.float32),
        n1_g=jnp.ones((L, D), jnp.float32), n1_b=jnp.zeros((L, D), jnp.float32),
        n2_g=jnp.ones((L, D), jnp.float32), n2_b=jnp.zeros((L, D), jnp.float32),
        n3_g=jnp.ones((L, D), jnp.float32), n3_b=jnp.zeros((L, D), jnp.float32),
        lin1_w=W(ks[6], (L, dim_ff, D)),  lin1_b=W(ks[7], (L, dim_ff)),
        lin2_w=W(ks[8], (L, D, dim_ff)),  lin2_b=W(ks[9], (L, D)),
        norm_g=jnp.ones((D,), jnp.float32), norm_b=jnp.zeros((D,), jnp.float32),
    )


def prepare_params(params, nhead):
    """One-time conversion: transpose weights to (Din, Dout), fold the 1/sqrt(dh)
    attention scale into the Q projections, split the in_proj into fused-QK / V
    (self) and Q / K / V (cross) slabs, cast matmul weights to bf16; biases and
    LayerNorm params stay f32 (added / used in f32 math)."""
    D = params["sa_in_w"].shape[-1]
    scale = 1.0 / math.sqrt(D // nhead)

    tw = lambda w: jnp.swapaxes(w, -1, -2)     # (L, Dout, Din) -> (L, Din, Dout)
    b2 = lambda b: b[:, None, :]               # (L, Dout) -> (L, 1, Dout)
    bf = lambda a: a.astype(jnp.bfloat16)
    f32 = lambda a: a.astype(jnp.float32)

    def scaled_in_proj(w, b):
        wt = tw(w)                              # (L, D, 3D) f32
        bb = b2(b)                              # (L, 1, 3D) f32
        wt = wt.at[..., :D].multiply(scale)     # fold scale into Q weights
        bb = bb.at[..., :D].multiply(scale)     # ... and Q bias
        return wt, bb

    sa_w, sa_b = scaled_in_proj(params["sa_in_w"], params["sa_in_b"])
    ca_w, ca_b = scaled_in_proj(params["ca_in_w"], params["ca_in_b"])

    return dict(
        sa_qk_w=bf(sa_w[..., :2 * D]), sa_qk_b=f32(sa_b[..., :2 * D]),
        sa_v_w=bf(sa_w[..., 2 * D:]),  sa_v_b=f32(sa_b[..., 2 * D:]),
        sa_out_w=bf(tw(params["sa_out_w"])), sa_out_b=f32(b2(params["sa_out_b"])),
        ca_q_w=bf(ca_w[..., :D]),        ca_q_b=f32(ca_b[..., :D]),
        ca_k_w=bf(ca_w[..., D:2 * D]),   ca_k_b=f32(ca_b[..., D:2 * D]),
        ca_v_w=bf(ca_w[..., 2 * D:]),    ca_v_b=f32(ca_b[..., 2 * D:]),
        ca_out_w=bf(tw(params["ca_out_w"])), ca_out_b=f32(b2(params["ca_out_b"])),
        n1_g=f32(b2(params["n1_g"])), n1_b=f32(b2(params["n1_b"])),
        n2_g=f32(b2(params["n2_g"])), n2_b=f32(b2(params["n2_b"])),
        n3_g=f32(b2(params["n3_g"])), n3_b=f32(b2(params["n3_b"])),
        lin1_w=bf(tw(params["lin1_w"])), lin1_b=f32(b2(params["lin1_b"])),
        lin2_w=bf(tw(params["lin2_w"])), lin2_b=f32(b2(params["lin2_b"])),
        norm_g=f32(params["norm_g"][None, :]), norm_b=f32(params["norm_b"][None, :]),
    )


# --------------------------------- main --------------------------------------

if __name__ == "__main__":
    B, T, S, D, H, L, DFF = 2, 8, 16, 32, 4, 2, 64

    key = jax.random.PRNGKey(0)
    k1, k2, k3, k4, kp = jax.random.split(key, 5)
    tgt = jax.random.normal(k1, (T, B, D), jnp.float32)
    memory = jax.random.normal(k2, (S, B, D), jnp.float32)
    pos = jax.random.normal(k3, (S, B, D), jnp.float32)
    query_pos = jax.random.normal(k4, (T, B, D), jnp.float32)

    # last 3 memory positions of batch element 1 are padding
    memory_key_padding_mask = jnp.zeros((B, S), dtype=bool).at[1, S - 3:].set(True)
    # causal self-attention mask (additive)
    self_attn_mask = jnp.where(jnp.tril(jnp.ones((T, T), dtype=bool)),
                               0.0, -1e9).astype(jnp.float32)

    params = init_params(kp, L, D, DFF)
    prepared = prepare_params(params, nhead=H)   # done once, outside the fwd call
    pre_kv_list = [None] * L                     # prefill: no cached kv

    out, cur_kv_list = transformer_decoder(
        tgt, memory, memory_key_padding_mask, pos,
        pre_kv_list=pre_kv_list, self_attn_mask=self_attn_mask,
        query_pos=query_pos, prepared_params=prepared, nhead=H,
        batch_blocks=1)   # 1: max weight reuse (v5e/v6e); use 2 on v7x

    jax.block_until_ready(out)
    for kv in cur_kv_list:
        jax.block_until_ready(kv)

    assert out.shape == (1, T, B, D)
    assert len(cur_kv_list) == L and cur_kv_list[0].shape == (2, B, T, D)
    assert bool(jnp.all(jnp.isfinite(out)))
    print("KERNEL_OK")
</pallas_src>

<mosaic_0001>
module attributes {stable_mosaic.version = 11 : i64} {
  func.func @_decoder_kernel(%arg0: i32, %arg1: i32, %arg2: memref<2x8x32xf32, #tpu.memory_space<vmem>>, %arg3: memref<2x16x32xbf16, #tpu.memory_space<vmem>>, %arg4: memref<2x16x32xbf16, #tpu.memory_space<vmem>>, %arg5: memref<2x8x32xf32, #tpu.memory_space<vmem>>, %arg6: memref<2x1x16xf32, #tpu.memory_space<vmem>>, %arg7: memref<8x8xf32, #tpu.memory_space<vmem>>, %arg8: memref<1x32x64xbf16, #tpu.memory_space<vmem>>, %arg9: memref<1x1x64xf32, #tpu.memory_space<vmem>>, %arg10: memref<1x32x32xbf16, #tpu.memory_space<vmem>>, %arg11: memref<1x1x32xf32, #tpu.memory_space<vmem>>, %arg12: memref<1x32x32xbf16, #tpu.memory_space<vmem>>, %arg13: memref<1x1x32xf32, #tpu.memory_space<vmem>>, %arg14: memref<1x32x32xbf16, #tpu.memory_space<vmem>>, %arg15: memref<1x1x32xf32, #tpu.memory_space<vmem>>, %arg16: memref<1x32x32xbf16, #tpu.memory_space<vmem>>, %arg17: memref<1x1x32xf32, #tpu.memory_space<vmem>>, %arg18: memref<1x32x32xbf16, #tpu.memory_space<vmem>>, %arg19: memref<1x1x32xf32, #tpu.memory_space<vmem>>, %arg20: memref<1x32x32xbf16, #tpu.memory_space<vmem>>, %arg21: memref<1x1x32xf32, #tpu.memory_space<vmem>>, %arg22: memref<1x1x32xf32, #tpu.memory_space<vmem>>, %arg23: memref<1x1x32xf32, #tpu.memory_space<vmem>>, %arg24: memref<1x1x32xf32, #tpu.memory_space<vmem>>, %arg25: memref<1x1x32xf32, #tpu.memory_space<vmem>>, %arg26: memref<1x1x32xf32, #tpu.memory_space<vmem>>, %arg27: memref<1x1x32xf32, #tpu.memory_space<vmem>>, %arg28: memref<1x32x64xbf16, #tpu.memory_space<vmem>>, %arg29: memref<1x1x64xf32, #tpu.memory_space<vmem>>, %arg30: memref<1x64x32xbf16, #tpu.memory_space<vmem>>, %arg31: memref<1x1x32xf32, #tpu.memory_space<vmem>>, %arg32: memref<1x32xf32, #tpu.memory_space<vmem>>, %arg33: memref<1x32xf32, #tpu.memory_space<vmem>>, %arg34: memref<2x8x32xf32, #tpu.memory_space<vmem>>, %arg35: memref<1x2x2x8x32xf32, #tpu.memory_space<vmem>>) attributes {dimension_semantics = [#tpu.dimension_semantics<parallel>, #tpu.dimension_semantics<arbitrary>], iteration_bounds = array<i64: 1, 2>, scalar_prefetch = 0 : i64, scratch_operands = 0 : i64, tpu.core_type = #tpu.core_type<tc>, window_params = [{transform_indices = @transform_0, window_bounds = array<i64: 2, 8, 32>}, {transform_indices = @transform_1, window_bounds = array<i64: 2, 16, 32>}, {transform_indices = @transform_2, window_bounds = array<i64: 2, 16, 32>}, {transform_indices = @transform_3, window_bounds = array<i64: 2, 8, 32>}, {transform_indices = @transform_4, window_bounds = array<i64: 2, 1, 16>}, {pipeline_mode = #tpu.pipeline_mode<synchronous>, transform_indices = @transform_5, window_bounds = array<i64: 8, 8>}, {transform_indices = @transform_6, window_bounds = array<i64: 1, 32, 64>}, {transform_indices = @transform_7, window_bounds = array<i64: 1, 1, 64>}, {transform_indices = @transform_8, window_bounds = array<i64: 1, 32, 32>}, {transform_indices = @transform_9, window_bounds = array<i64: 1, 1, 32>}, {transform_indices = @transform_10, window_bounds = array<i64: 1, 32, 32>}, {transform_indices = @transform_11, window_bounds = array<i64: 1, 1, 32>}, {transform_indices = @transform_12, window_bounds = array<i64: 1, 32, 32>}, {transform_indices = @transform_13, window_bounds = array<i64: 1, 1, 32>}, {transform_indices = @transform_14, window_bounds = array<i64: 1, 32, 32>}, {transform_indices = @transform_15, window_bounds = array<i64: 1, 1, 32>}, {transform_indices = @transform_16, window_bounds = array<i64: 1, 32, 32>}, {transform_indices = @transform_17, window_bounds = array<i64: 1, 1, 32>}, {transform_indices = @transform_18, window_bounds = array<i64: 1, 32, 32>}, {transform_indices = @transform_19, window_bounds = array<i64: 1, 1, 32>}, {transform_indices = @transform_20, window_bounds = array<i64: 1, 1, 32>}, {transform_indices = @transform_21, window_bounds = array<i64: 1, 1, 32>}, {transform_indices = @transform_22, window_bounds = array<i64: 1, 1, 32>}, {transform_indices = @transform_23, window_bounds = array<i64: 1, 1, 32>}, {transform_indices = @transform_24, window_bounds = array<i64: 1, 1, 32>}, {transform_indices = @transform_25, window_bounds = array<i64: 1, 1, 32>}, {transform_indices = @transform_26, window_bounds = array<i64: 1, 32, 64>}, {transform_indices = @transform_27, window_bounds = array<i64: 1, 1, 64>}, {transform_indices = @transform_28, window_bounds = array<i64: 1, 64, 32>}, {transform_indices = @transform_29, window_bounds = array<i64: 1, 1, 32>}, {pipeline_mode = #tpu.pipeline_mode<synchronous>, transform_indices = @transform_30, window_bounds = array<i64: 1, 32>}, {pipeline_mode = #tpu.pipeline_mode<synchronous>, transform_indices = @transform_31, window_bounds = array<i64: 1, 32>}, {transform_indices = @transform_32, window_bounds = array<i64: 2, 8, 32>}, {transform_indices = @transform_33, window_bounds = array<i64: 1, 2, 2, 8, 32>}]} {
    %c0_i32 = arith.constant 0 : i32
    %0 = arith.cmpi eq, %arg1, %c0_i32 : i32
    %1 = arith.extui %0 : i1 to i32
    %c0_i32_0 = arith.constant 0 : i32
    %2 = arith.cmpi ne, %1, %c0_i32_0 : i32
    scf.if %2 {
      %c0_133 = arith.constant 0 : index
      %c0_134 = arith.constant 0 : index
      %c0_135 = arith.constant 0 : index
      %296 = vector.load %arg2[%c0_133, %c0_134, %c0_135] : memref<2x8x32xf32, #tpu.memory_space<vmem>>, vector<2x8x32xf32>
      %c0_136 = arith.constant 0 : index
      %c0_137 = arith.constant 0 : index
      %c0_138 = arith.constant 0 : index
      %297 = vector.load %arg34[%c0_136, %c0_137, %c0_138] : memref<2x8x32xf32, #tpu.memory_space<vmem>>, vector<2x8x32xf32>
      tpu.vector_store %arg34[%c0_136, %c0_137, %c0_138], %296 {strides = array<i32>} : memref<2x8x32xf32, #tpu.memory_space<vmem>>, vector<2x8x32xf32>,
    } else {
    }
    %c0 = arith.constant 0 : index
    %c0_1 = arith.constant 0 : index
    %c0_2 = arith.constant 0 : index
    %3 = vector.load %arg34[%c0, %c0_1, %c0_2] : memref<2x8x32xf32, #tpu.memory_space<vmem>>, vector<2x8x32xf32>
    %4 = vector.shape_cast %3 : vector<2x8x32xf32> to vector<16x32xf32>
    %c0_3 = arith.constant 0 : index
    %c0_4 = arith.constant 0 : index
    %c0_5 = arith.constant 0 : index
    %5 = vector.load %arg5[%c0_3, %c0_4, %c0_5] : memref<2x8x32xf32, #tpu.memory_space<vmem>>, vector<2x8x32xf32>
    %6 = vector.shape_cast %5 : vector<2x8x32xf32> to vector<16x32xf32>
    %c0_6 = arith.constant 0 : index
    %c0_7 = arith.constant 0 : index
    %c0_8 = arith.constant 0 : index
    %7 = vector.load %arg22[%c0_6, %c0_7, %c0_8] : memref<1x1x32xf32, #tpu.memory_space<vmem>>, vector<1x1x32xf32>
    %8 = vector.shape_cast %7 : vector<1x1x32xf32> to vector<1x32xf32>
    %c0_9 = arith.constant 0 : index
    %c0_10 = arith.constant 0 : index
    %c0_11 = arith.constant 0 : index
    %9 = vector.load %arg23[%c0_9, %c0_10, %c0_11] : memref<1x1x32xf32, #tpu.memory_space<vmem>>, vector<1x1x32xf32>
    %10 = vector.shape_cast %9 : vector<1x1x32xf32> to vector<1x32xf32>
    %cst = arith.constant dense<0.000000e+00> : vector<16xf32>
    %11 = vector.multi_reduction <add>, %4, %cst [1] : vector<16x32xf32> to vector<16xf32>
    %12 = vector.shape_cast %11 : vector<16xf32> to vector<16x1xf32>
    %cst_12 = arith.constant 3.200000e+01 : f32
    %13 = vector.broadcast %cst_12 : f32 to vector<16x1xf32>
    %14 = arith.divf %12, %13 : vector<16x1xf32>
    %15 = vector.broadcast %14 : vector<16x1xf32> to vector<16x32xf32>
    %16 = arith.subf %4, %15 : vector<16x32xf32>
    %17 = arith.mulf %16, %16 : vector<16x32xf32>
    %cst_13 = arith.constant dense<0.000000e+00> : vector<16xf32>
    %18 = vector.multi_reduction <add>, %17, %cst_13 [1] : vector<16x32xf32> to vector<16xf32>
    %19 = vector.shape_cast %18 : vector<16xf32> to vector<16x1xf32>
    %cst_14 = arith.constant 3.200000e+01 : f32
    %20 = vector.broadcast %cst_14 : f32 to vector<16x1xf32>
    %21 = arith.divf %19, %20 : vector<16x1xf32>
    %cst_15 = arith.constant 9.99999974E-6 : f32
    %22 = vector.broadcast %cst_15 : f32 to vector<16x1xf32>
    %23 = arith.addf %21, %22 : vector<16x1xf32>
    %24 = math.rsqrt %23 : vector<16x1xf32>
    %25 = vector.broadcast %24 : vector<16x1xf32> to vector<16x32xf32>
    %26 = arith.mulf %16, %25 : vector<16x32xf32>
    %27 = vector.broadcast %8 : vector<1x32xf32> to vector<16x32xf32>
    %28 = arith.mulf %26, %27 : vector<16x32xf32>
    %29 = vector.broadcast %10 : vector<1x32xf32> to vector<16x32xf32>
    %30 = arith.addf %28, %29 : vector<16x32xf32>
    %31 = arith.addf %30, %6 : vector<16x32xf32>
    %c0_16 = arith.constant 0 : index
    %c0_17 = arith.constant 0 : index
    %c0_18 = arith.constant 0 : index
    %32 = vector.load %arg8[%c0_16, %c0_17, %c0_18] : memref<1x32x64xbf16, #tpu.memory_space<vmem>>, vector<1x32x64xbf16>
    %33 = vector.shape_cast %32 : vector<1x32x64xbf16> to vector<32x64xbf16>
    %c0_19 = arith.constant 0 : index
    %c0_20 = arith.constant 0 : index
    %c0_21 = arith.constant 0 : index
    %34 = vector.load %arg9[%c0_19, %c0_20, %c0_21] : memref<1x1x64xf32, #tpu.memory_space<vmem>>, vector<1x1x64xf32>
    %35 = vector.shape_cast %34 : vector<1x1x64xf32> to vector<1x64xf32>
    %36 = arith.truncf %31 : vector<16x32xf32> to vector<16x32xbf16>
    %cst_22 = arith.constant dense<0.000000e+00> : vector<16x64xf32>
    %37 = tpu.matmul %36, %33, %cst_22 {dimension_numbers = #tpu.dot_dimension_numbers<[1], [0], [0], [1], [0, 0, 1, 1], [], []>} : vector<16x32xbf16>, vector<32x64xbf16>, vector<16x64xf32> -> vector<16x64xf32>
    %38 = vector.broadcast %35 : vector<1x64xf32> to vector<16x64xf32>
    %39 = arith.addf %37, %38 : vector<16x64xf32>
    %40 = vector.extract_strided_slice %39 {offsets = [0, 0], sizes = [16, 32], strides = [1, 1]} : vector<16x64xf32> to vector<16x32xf32>
    %41 = vector.extract_strided_slice %39 {offsets = [0, 32], sizes = [16, 32], strides = [1, 1]} : vector<16x64xf32> to vector<16x32xf32>
    %c0_23 = arith.constant 0 : index
    %c0_24 = arith.constant 0 : index
    %c0_25 = arith.constant 0 : index
    %42 = vector.load %arg10[%c0_23, %c0_24, %c0_25] : memref<1x32x32xbf16, #tpu.memory_space<vmem>>, vector<1x32x32xbf16>
    %43 = vector.shape_cast %42 : vector<1x32x32xbf16> to vector<32x32xbf16>
    %c0_26 = arith.constant 0 : index
    %c0_27 = arith.constant 0 : index
    %c0_28 = arith.constant 0 : index
    %44 = vector.load %arg11[%c0_26, %c0_27, %c0_28] : memref<1x1x32xf32, #tpu.memory_space<vmem>>, vector<1x1x32xf32>
    %45 = vector.shape_cast %44 : vector<1x1x32xf32> to vector<1x32xf32>
    %46 = arith.truncf %30 : vector<16x32xf32> to vector<16x32xbf16>
    %cst_29 = arith.constant dense<0.000000e+00> : vector<16x32xf32>
    %47 = tpu.matmul %46, %43, %cst_29 {dimension_numbers = #tpu.dot_dimension_numbers<[1], [0], [0], [1], [0, 0, 1, 1], [], []>} : vector<16x32xbf16>, vector<32x32xbf16>, vector<16x32xf32> -> vector<16x32xf32>
    %48 = vector.broadcast %45 : vector<1x32xf32> to vector<16x32xf32>
    %49 = arith.addf %47, %48 : vector<16x32xf32>
    %50 = vector.shape_cast %41 : vector<16x32xf32> to vector<2x8x32xf32>
    %c0_30 = arith.constant 0 : index
    %c0_31 = arith.constant 0 : index
    %c0_32 = arith.constant 0 : index
    %c0_33 = arith.constant 0 : index
    %c0_34 = arith.constant 0 : index
    %51 = vector.load %arg35[%c0_30, %c0_31, %c0_32, %c0_33, %c0_34] : memref<1x2x2x8x32xf32, #tpu.memory_space<vmem>>, vector<1x1x2x8x32xf32>
    %52 = vector.shape_cast %51 : vector<1x1x2x8x32xf32> to vector<2x8x32xf32>
    %53 = vector.shape_cast %50 : vector<2x8x32xf32> to vector<1x1x2x8x32xf32>
    tpu.vector_store %arg35[%c0_30, %c0_31, %c0_32, %c0_33, %c0_34], %53 {strides = array<i32>} : memref<1x2x2x8x32xf32, #tpu.memory_space<vmem>>, vector<1x1x2x8x32xf32>,
    %54 = vector.shape_cast %49 : vector<16x32xf32> to vector<2x8x32xf32>
    %c0_35 = arith.constant 0 : index
    %c1 = arith.constant 1 : index
    %c0_36 = arith.constant 0 : index
    %c0_37 = arith.constant 0 : index
    %c0_38 = arith.constant 0 : index
    %55 = vector.load %arg35[%c0_35, %c1, %c0_36, %c0_37, %c0_38] : memref<1x2x2x8x32xf32, #tpu.memory_space<vmem>>, vector<1x1x2x8x32xf32>
    %56 = vector.shape_cast %55 : vector<1x1x2x8x32xf32> to vector<2x8x32xf32>
    %57 = vector.shape_cast %54 : vector<2x8x32xf32> to vector<1x1x2x8x32xf32>
    tpu.vector_store %arg35[%c0_35, %c1, %c0_36, %c0_37, %c0_38], %57 {strides = array<i32>} : memref<1x2x2x8x32xf32, #tpu.memory_space<vmem>>, vector<1x1x2x8x32xf32>,
    %c0_39 = arith.constant 0 : index
    %c0_40 = arith.constant 0 : index
    %58 = vector.load %arg7[%c0_39, %c0_40] : memref<8x8xf32, #tpu.memory_space<vmem>>, vector<8x8xf32>
    %59 = vector.shape_cast %58 : vector<8x8xf32> to vector<1x8x8xf32>
    %c0_41 = arith.constant 0 : index
    %c0_42 = arith.constant 0 : index
    %c0_43 = arith.constant 0 : index
    %60 = vector.load %arg12[%c0_41, %c0_42, %c0_43] : memref<1x32x32xbf16, #tpu.memory_space<vmem>>, vector<1x32x32xbf16>
    %61 = vector.shape_cast %60 : vector<1x32x32xbf16> to vector<32x32xbf16>
    %c0_44 = arith.constant 0 : index
    %c0_45 = arith.constant 0 : index
    %c0_46 = arith.constant 0 : index
    %62 = vector.load %arg13[%c0_44, %c0_45, %c0_46] : memref<1x1x32xf32, #tpu.memory_space<vmem>>, vector<1x1x32xf32>
    %63 = vector.shape_cast %62 : vector<1x1x32xf32> to vector<1x32xf32>
    %64 = vector.extract_strided_slice %40 {offsets = [0, 0], sizes = [16, 8], strides = [1, 1]} : vector<16x32xf32> to vector<16x8xf32>
    %65 = vector.extract_strided_slice %40 {offsets = [0, 8], sizes = [16, 8], strides = [1, 1]} : vector<16x32xf32> to vector<16x8xf32>
    %66 = vector.extract_strided_slice %40 {offsets = [0, 16], sizes = [16, 8], strides = [1, 1]} : vector<16x32xf32> to vector<16x8xf32>
    %67 = vector.extract_strided_slice %40 {offsets = [0, 24], sizes = [16, 8], strides = [1, 1]} : vector<16x32xf32> to vector<16x8xf32>
    %68 = vector.shape_cast %64 : vector<16x8xf32> to vector<1x16x8xf32>
    %69 = vector.shape_cast %65 : vector<16x8xf32> to vector<1x16x8xf32>
    %70 = vector.shape_cast %66 : vector<16x8xf32> to vector<1x16x8xf32>
    %71 = vector.shape_cast %67 : vector<16x8xf32> to vector<1x16x8xf32>
    %72 = tpu.concatenate %68, %69, %70, %71 in 0 : vector<1x16x8xf32>, vector<1x16x8xf32>, vector<1x16x8xf32>, vector<1x16x8xf32> -> vector<4x16x8xf32>
    %73 = vector.shape_cast %72 : vector<4x16x8xf32> to vector<8x8x8xf32>
    %74 = arith.truncf %73 : vector<8x8x8xf32> to vector<8x8x8xbf16>
    %75 = vector.extract_strided_slice %41 {offsets = [0, 0], sizes = [16, 8], strides = [1, 1]} : vector<16x32xf32> to vector<16x8xf32>
    %76 = vector.extract_strided_slice %41 {offsets = [0, 8], sizes = [16, 8], strides = [1, 1]} : vector<16x32xf32> to vector<16x8xf32>
    %77 = vector.extract_strided_slice %41 {offsets = [0, 16], sizes = [16, 8], strides = [1, 1]} : vector<16x32xf32> to vector<16x8xf32>
    %78 = vector.extract_strided_slice %41 {offsets = [0, 24], sizes = [16, 8], strides = [1, 1]} : vector<16x32xf32> to vector<16x8xf32>
    %79 = vector.shape_cast %75 : vector<16x8xf32> to vector<1x16x8xf32>
    %80 = vector.shape_cast %76 : vector<16x8xf32> to vector<1x16x8xf32>
    %81 = vector.shape_cast %77 : vector<16x8xf32> to vector<1x16x8xf32>
    %82 = vector.shape_cast %78 : vector<16x8xf32> to vector<1x16x8xf32>
    %83 = tpu.concatenate %79, %80, %81, %82 in 0 : vector<1x16x8xf32>, vector<1x16x8xf32>, vector<1x16x8xf32>, vector<1x16x8xf32> -> vector<4x16x8xf32>
    %84 = vector.shape_cast %83 : vector<4x16x8xf32> to vector<8x8x8xf32>
    %85 = arith.truncf %84 : vector<8x8x8xf32> to vector<8x8x8xbf16>
    %86 = vector.extract_strided_slice %49 {offsets = [0, 0], sizes = [16, 8], strides = [1, 1]} : vector<16x32xf32> to vector<16x8xf32>
    %87 = vector.extract_strided_slice %49 {offsets = [0, 8], sizes = [16, 8], strides = [1, 1]} : vector<16x32xf32> to vector<16x8xf32>
    %88 = vector.extract_strided_slice %49 {offsets = [0, 16], sizes = [16, 8], strides = [1, 1]} : vector<16x32xf32> to vector<16x8xf32>
    %89 = vector.extract_strided_slice %49 {offsets = [0, 24], sizes = [16, 8], strides = [1, 1]} : vector<16x32xf32> to vector<16x8xf32>
    %90 = vector.shape_cast %86 : vector<16x8xf32> to vector<1x16x8xf32>
    %91 = vector.shape_cast %87 : vector<16x8xf32> to vector<1x16x8xf32>
    %92 = vector.shape_cast %88 : vector<16x8xf32> to vector<1x16x8xf32>
    %93 = vector.shape_cast %89 : vector<16x8xf32> to vector<1x16x8xf32>
    %94 = tpu.concatenate %90, %91, %92, %93 in 0 : vector<1x16x8xf32>, vector<1x16x8xf32>, vector<1x16x8xf32>, vector<1x16x8xf32> -> vector<4x16x8xf32>
    %95 = vector.shape_cast %94 : vector<4x16x8xf32> to vector<8x8x8xf32>
    %96 = arith.truncf %95 : vector<8x8x8xf32> to vector<8x8x8xbf16>
    "tpu.trace_start"() <{level = 10 : i32, message = "nqd,nkd->nqk"}> : () -> ()
    %cst_47 = arith.constant dense<0.000000e+00> : vector<8x8x8xf32>
    %97 = tpu.matmul %74, %85, %cst_47 {dimension_numbers = #tpu.dot_dimension_numbers<[2], [2], [1], [1], [0, 0, 0, 1, 1, 1], [0], [0]>} : vector<8x8x8xbf16>, vector<8x8x8xbf16>, vector<8x8x8xf32> -> vector<8x8x8xf32>
    "tpu.trace_stop"() : () -> ()
    %98 = vector.broadcast %59 : vector<1x8x8xf32> to vector<8x8x8xf32>
    %99 = arith.addf %97, %98 : vector<8x8x8xf32>
    %cst_48 = arith.constant dense<0xFF800000> : vector<8x8xf32>
    %100 = vector.multi_reduction <maximumf>, %99, %cst_48 [2] : vector<8x8x8xf32> to vector<8x8xf32>
    %101 = vector.shape_cast %100 : vector<8x8xf32> to vector<8x8x1xf32>
    %102 = vector.broadcast %101 : vector<8x8x1xf32> to vector<8x8x8xf32>
    %103 = arith.subf %99, %102 : vector<8x8x8xf32>
    %104 = math.exp %103 : vector<8x8x8xf32>
    %cst_49 = arith.constant dense<0.000000e+00> : vector<8x8xf32>
    %105 = vector.multi_reduction <add>, %104, %cst_49 [2] : vector<8x8x8xf32> to vector<8x8xf32>
    %106 = vector.shape_cast %105 : vector<8x8xf32> to vector<8x8x1xf32>
    %107 = tpu.reciprocal %106 {approx = true} : vector<8x8x1xf32> -> vector<8x8x1xf32>
    %108 = vector.broadcast %107 : vector<8x8x1xf32> to vector<8x8x8xf32>
    %109 = arith.mulf %104, %108 : vector<8x8x8xf32>
    %110 = arith.truncf %109 : vector<8x8x8xf32> to vector<8x8x8xbf16>
    "tpu.trace_start"() <{level = 10 : i32, message = "nqk,nkd->nqd"}> : () -> ()
    %cst_50 = arith.constant dense<0.000000e+00> : vector<8x8x8xf32>
    %111 = tpu.matmul %110, %96, %cst_50 {dimension_numbers = #tpu.dot_dimension_numbers<[2], [1], [1], [2], [0, 0, 0, 1, 1, 2], [0], [0]>} : vector<8x8x8xbf16>, vector<8x8x8xbf16>, vector<8x8x8xf32> -> vector<8x8x8xf32>
    "tpu.trace_stop"() : () -> ()
    %112 = vector.shape_cast %111 : vector<8x8x8xf32> to vector<4x16x8xf32>
    %113 = vector.extract_strided_slice %112 {offsets = [0, 0, 0], sizes = [1, 16, 8], strides = [1, 1, 1]} : vector<4x16x8xf32> to vector<1x16x8xf32>
    %114 = vector.shape_cast %113 : vector<1x16x8xf32> to vector<16x8xf32>
    %115 = vector.extract_strided_slice %112 {offsets = [1, 0, 0], sizes = [1, 16, 8], strides = [1, 1, 1]} : vector<4x16x8xf32> to vector<1x16x8xf32>
    %116 = vector.shape_cast %115 : vector<1x16x8xf32> to vector<16x8xf32>
    %117 = vector.extract_strided_slice %112 {offsets = [2, 0, 0], sizes = [1, 16, 8], strides = [1, 1, 1]} : vector<4x16x8xf32> to vector<1x16x8xf32>
    %118 = vector.shape_cast %117 : vector<1x16x8xf32> to vector<16x8xf32>
    %119 = vector.extract_strided_slice %112 {offsets = [3, 0, 0], sizes = [1, 16, 8], strides = [1, 1, 1]} : vector<4x16x8xf32> to vector<1x16x8xf32>
    %120 = vector.shape_cast %119 : vector<1x16x8xf32> to vector<16x8xf32>
    %121 = tpu.concatenate %114, %116, %118, %120 in 1 : vector<16x8xf32>, vector<16x8xf32>, vector<16x8xf32>, vector<16x8xf32> -> vector<16x32xf32>
    %122 = arith.truncf %121 : vector<16x32xf32> to vector<16x32xbf16>
    %cst_51 = arith.constant dense<0.000000e+00> : vector<16x32xf32>
    %123 = tpu.matmul %122, %61, %cst_51 {dimension_numbers = #tpu.dot_dimension_numbers<[1], [0], [0], [1], [0, 0, 1, 1], [], []>} : vector<16x32xbf16>, vector<32x32xbf16>, vector<16x32xf32> -> vector<16x32xf32>
    %124 = vector.broadcast %63 : vector<1x32xf32> to vector<16x32xf32>
    %125 = arith.addf %123, %124 : vector<16x32xf32>
    %126 = arith.addf %4, %125 : vector<16x32xf32>
    %c0_52 = arith.constant 0 : index
    %c0_53 = arith.constant 0 : index
    %c0_54 = arith.constant 0 : index
    %127 = vector.load %arg24[%c0_52, %c0_53, %c0_54] : memref<1x1x32xf32, #tpu.memory_space<vmem>>, vector<1x1x32xf32>
    %128 = vector.shape_cast %127 : vector<1x1x32xf32> to vector<1x32xf32>
    %c0_55 = arith.constant 0 : index
    %c0_56 = arith.constant 0 : index
    %c0_57 = arith.constant 0 : index
    %129 = vector.load %arg25[%c0_55, %c0_56, %c0_57] : memref<1x1x32xf32, #tpu.memory_space<vmem>>, vector<1x1x32xf32>
    %130 = vector.shape_cast %129 : vector<1x1x32xf32> to vector<1x32xf32>
    %cst_58 = arith.constant dense<0.000000e+00> : vector<16xf32>
    %131 = vector.multi_reduction <add>, %126, %cst_58 [1] : vector<16x32xf32> to vector<16xf32>
    %132 = vector.shape_cast %131 : vector<16xf32> to vector<16x1xf32>
    %cst_59 = arith.constant 3.200000e+01 : f32
    %133 = vector.broadcast %cst_59 : f32 to vector<16x1xf32>
    %134 = arith.divf %132, %133 : vector<16x1xf32>
    %135 = vector.broadcast %134 : vector<16x1xf32> to vector<16x32xf32>
    %136 = arith.subf %126, %135 : vector<16x32xf32>
    %137 = arith.mulf %136, %136 : vector<16x32xf32>
    %cst_60 = arith.constant dense<0.000000e+00> : vector<16xf32>
    %138 = vector.multi_reduction <add>, %137, %cst_60 [1] : vector<16x32xf32> to vector<16xf32>
    %139 = vector.shape_cast %138 : vector<16xf32> to vector<16x1xf32>
    %cst_61 = arith.constant 3.200000e+01 : f32
    %140 = vector.broadcast %cst_61 : f32 to vector<16x1xf32>
    %141 = arith.divf %139, %140 : vector<16x1xf32>
    %cst_62 = arith.constant 9.99999974E-6 : f32
    %142 = vector.broadcast %cst_62 : f32 to vector<16x1xf32>
    %143 = arith.addf %141, %142 : vector<16x1xf32>
    %144 = math.rsqrt %143 : vector<16x1xf32>
    %145 = vector.broadcast %144 : vector<16x1xf32> to vector<16x32xf32>
    %146 = arith.mulf %136, %145 : vector<16x32xf32>
    %147 = vector.broadcast %128 : vector<1x32xf32> to vector<16x32xf32>
    %148 = arith.mulf %146, %147 : vector<16x32xf32>
    %149 = vector.broadcast %130 : vector<1x32xf32> to vector<16x32xf32>
    %150 = arith.addf %148, %149 : vector<16x32xf32>
    %151 = arith.addf %150, %6 : vector<16x32xf32>
    %c0_63 = arith.constant 0 : index
    %c0_64 = arith.constant 0 : index
    %c0_65 = arith.constant 0 : index
    %152 = vector.load %arg14[%c0_63, %c0_64, %c0_65] : memref<1x32x32xbf16, #tpu.memory_space<vmem>>, vector<1x32x32xbf16>
    %153 = vector.shape_cast %152 : vector<1x32x32xbf16> to vector<32x32xbf16>
    %c0_66 = arith.constant 0 : index
    %c0_67 = arith.constant 0 : index
    %c0_68 = arith.constant 0 : index
    %154 = vector.load %arg15[%c0_66, %c0_67, %c0_68] : memref<1x1x32xf32, #tpu.memory_space<vmem>>, vector<1x1x32xf32>
    %155 = vector.shape_cast %154 : vector<1x1x32xf32> to vector<1x32xf32>
    %156 = arith.truncf %151 : vector<16x32xf32> to vector<16x32xbf16>
    %cst_69 = arith.constant dense<0.000000e+00> : vector<16x32xf32>
    %157 = tpu.matmul %156, %153, %cst_69 {dimension_numbers = #tpu.dot_dimension_numbers<[1], [0], [0], [1], [0, 0, 1, 1], [], []>} : vector<16x32xbf16>, vector<32x32xbf16>, vector<16x32xf32> -> vector<16x32xf32>
    %158 = vector.broadcast %155 : vector<1x32xf32> to vector<16x32xf32>
    %159 = arith.addf %157, %158 : vector<16x32xf32>
    %c0_70 = arith.constant 0 : index
    %c0_71 = arith.constant 0 : index
    %c0_72 = arith.constant 0 : index
    %160 = vector.load %arg3[%c0_70, %c0_71, %c0_72] : memref<2x16x32xbf16, #tpu.memory_space<vmem>>, vector<2x16x32xbf16>
    %161 = vector.shape_cast %160 : vector<2x16x32xbf16> to vector<32x32xbf16>
    %c0_73 = arith.constant 0 : index
    %c0_74 = arith.constant 0 : index
    %c0_75 = arith.constant 0 : index
    %162 = vector.load %arg4[%c0_73, %c0_74, %c0_75] : memref<2x16x32xbf16, #tpu.memory_space<vmem>>, vector<2x16x32xbf16>
    %163 = vector.shape_cast %162 : vector<2x16x32xbf16> to vector<32x32xbf16>
    %c0_76 = arith.constant 0 : index
    %c0_77 = arith.constant 0 : index
    %c0_78 = arith.constant 0 : index
    %164 = vector.load %arg16[%c0_76, %c0_77, %c0_78] : memref<1x32x32xbf16, #tpu.memory_space<vmem>>, vector<1x32x32xbf16>
    %165 = vector.shape_cast %164 : vector<1x32x32xbf16> to vector<32x32xbf16>
    %c0_79 = arith.constant 0 : index
    %c0_80 = arith.constant 0 : index
    %c0_81 = arith.constant 0 : index
    %166 = vector.load %arg17[%c0_79, %c0_80, %c0_81] : memref<1x1x32xf32, #tpu.memory_space<vmem>>, vector<1x1x32xf32>
    %167 = vector.shape_cast %166 : vector<1x1x32xf32> to vector<1x32xf32>
    %cst_82 = arith.constant dense<0.000000e+00> : vector<32x32xf32>
    %168 = tpu.matmul %163, %165, %cst_82 {dimension_numbers = #tpu.dot_dimension_numbers<[1], [0], [0], [1], [0, 0, 1, 1], [], []>} : vector<32x32xbf16>, vector<32x32xbf16>, vector<32x32xf32> -> vector<32x32xf32>
    %169 = vector.broadcast %167 : vector<1x32xf32> to vector<32x32xf32>
    %170 = arith.addf %168, %169 : vector<32x32xf32>
    %c0_83 = arith.constant 0 : index
    %c0_84 = arith.constant 0 : index
    %c0_85 = arith.constant 0 : index
    %171 = vector.load %arg18[%c0_83, %c0_84, %c0_85] : memref<1x32x32xbf16, #tpu.memory_space<vmem>>, vector<1x32x32xbf16>
    %172 = vector.shape_cast %171 : vector<1x32x32xbf16> to vector<32x32xbf16>
    %c0_86 = arith.constant 0 : index
    %c0_87 = arith.constant 0 : index
    %c0_88 = arith.constant 0 : index
    %173 = vector.load %arg19[%c0_86, %c0_87, %c0_88] : memref<1x1x32xf32, #tpu.memory_space<vmem>>, vector<1x1x32xf32>
    %174 = vector.shape_cast %173 : vector<1x1x32xf32> to vector<1x32xf32>
    %cst_89 = arith.constant dense<0.000000e+00> : vector<32x32xf32>
    %175 = tpu.matmul %161, %172, %cst_89 {dimension_numbers = #tpu.dot_dimension_numbers<[1], [0], [0], [1], [0, 0, 1, 1], [], []>} : vector<32x32xbf16>, vector<32x32xbf16>, vector<32x32xf32> -> vector<32x32xf32>
    %176 = vector.broadcast %174 : vector<1x32xf32> to vector<32x32xf32>
    %177 = arith.addf %175, %176 : vector<32x32xf32>
    %c0_90 = arith.constant 0 : index
    %c0_91 = arith.constant 0 : index
    %c0_92 = arith.constant 0 : index
    %178 = vector.load %arg6[%c0_90, %c0_91, %c0_92] : memref<2x1x16xf32, #tpu.memory_space<vmem>>, vector<2x1x16xf32>
    %179 = tpu.concatenate %178, %178, %178, %178 in 0 : vector<2x1x16xf32>, vector<2x1x16xf32>, vector<2x1x16xf32>, vector<2x1x16xf32> -> vector<8x1x16xf32>
    %c0_93 = arith.constant 0 : index
    %c0_94 = arith.constant 0 : index
    %c0_95 = arith.constant 0 : index
    %180 = vector.load %arg20[%c0_93, %c0_94, %c0_95] : memref<1x32x32xbf16, #tpu.memory_space<vmem>>, vector<1x32x32xbf16>
    %181 = vector.shape_cast %180 : vector<1x32x32xbf16> to vector<32x32xbf16>
    %c0_96 = arith.constant 0 : index
    %c0_97 = arith.constant 0 : index
    %c0_98 = arith.constant 0 : index
    %182 = vector.load %arg21[%c0_96, %c0_97, %c0_98] : memref<1x1x32xf32, #tpu.memory_space<vmem>>, vector<1x1x32xf32>
    %183 = vector.shape_cast %182 : vector<1x1x32xf32> to vector<1x32xf32>
    %184 = vector.extract_strided_slice %159 {offsets = [0, 0], sizes = [16, 8], strides = [1, 1]} : vector<16x32xf32> to vector<16x8xf32>
    %185 = vector.extract_strided_slice %159 {offsets = [0, 8], sizes = [16, 8], strides = [1, 1]} : vector<16x32xf32> to vector<16x8xf32>
    %186 = vector.extract_strided_slice %159 {offsets = [0, 16], sizes = [16, 8], strides = [1, 1]} : vector<16x32xf32> to vector<16x8xf32>
    %187 = vector.extract_strided_slice %159 {offsets = [0, 24], sizes = [16, 8], strides = [1, 1]} : vector<16x32xf32> to vector<16x8xf32>
    %188 = vector.shape_cast %184 : vector<16x8xf32> to vector<1x16x8xf32>
    %189 = vector.shape_cast %185 : vector<16x8xf32> to vector<1x16x8xf32>
    %190 = vector.shape_cast %186 : vector<16x8xf32> to vector<1x16x8xf32>
    %191 = vector.shape_cast %187 : vector<16x8xf32> to vector<1x16x8xf32>
    %192 = tpu.concatenate %188, %189, %190, %191 in 0 : vector<1x16x8xf32>, vector<1x16x8xf32>, vector<1x16x8xf32>, vector<1x16x8xf32> -> vector<4x16x8xf32>
    %193 = vector.shape_cast %192 : vector<4x16x8xf32> to vector<8x8x8xf32>
    %194 = arith.truncf %193 : vector<8x8x8xf32> to vector<8x8x8xbf16>
    %195 = vector.extract_strided_slice %170 {offsets = [0, 0], sizes = [32, 8], strides = [1, 1]} : vector<32x32xf32> to vector<32x8xf32>
    %196 = vector.extract_strided_slice %170 {offsets = [0, 8], sizes = [32, 8], strides = [1, 1]} : vector<32x32xf32> to vector<32x8xf32>
    %197 = vector.extract_strided_slice %170 {offsets = [0, 16], sizes = [32, 8], strides = [1, 1]} : vector<32x32xf32> to vector<32x8xf32>
    %198 = vector.extract_strided_slice %170 {offsets = [0, 24], sizes = [32, 8], strides = [1, 1]} : vector<32x32xf32> to vector<32x8xf32>
    %199 = vector.shape_cast %195 : vector<32x8xf32> to vector<1x32x8xf32>
    %200 = vector.shape_cast %196 : vector<32x8xf32> to vector<1x32x8xf32>
    %201 = vector.shape_cast %197 : vector<32x8xf32> to vector<1x32x8xf32>
    %202 = vector.shape_cast %198 : vector<32x8xf32> to vector<1x32x8xf32>
    %203 = tpu.concatenate %199, %200, %201, %202 in 0 : vector<1x32x8xf32>, vector<1x32x8xf32>, vector<1x32x8xf32>, vector<1x32x8xf32> -> vector<4x32x8xf32>
    %204 = vector.shape_cast %203 : vector<4x32x8xf32> to vector<8x16x8xf32>
    %205 = arith.truncf %204 : vector<8x16x8xf32> to vector<8x16x8xbf16>
    %206 = vector.extract_strided_slice %177 {offsets = [0, 0], sizes = [32, 8], strides = [1, 1]} : vector<32x32xf32> to vector<32x8xf32>
    %207 = vector.extract_strided_slice %177 {offsets = [0, 8], sizes = [32, 8], strides = [1, 1]} : vector<32x32xf32> to vector<32x8xf32>
    %208 = vector.extract_strided_slice %177 {offsets = [0, 16], sizes = [32, 8], strides = [1, 1]} : vector<32x32xf32> to vector<32x8xf32>
    %209 = vector.extract_strided_slice %177 {offsets = [0, 24], sizes = [32, 8], strides = [1, 1]} : vector<32x32xf32> to vector<32x8xf32>
    %210 = vector.shape_cast %206 : vector<32x8xf32> to vector<1x32x8xf32>
    %211 = vector.shape_cast %207 : vector<32x8xf32> to vector<1x32x8xf32>
    %212 = vector.shape_cast %208 : vector<32x8xf32> to vector<1x32x8xf32>
    %213 = vector.shape_cast %209 : vector<32x8xf32> to vector<1x32x8xf32>
    %214 = tpu.concatenate %210, %211, %212, %213 in 0 : vector<1x32x8xf32>, vector<1x32x8xf32>, vector<1x32x8xf32>, vector<1x32x8xf32> -> vector<4x32x8xf32>
    %215 = vector.shape_cast %214 : vector<4x32x8xf32> to vector<8x16x8xf32>
    %216 = arith.truncf %215 : vector<8x16x8xf32> to vector<8x16x8xbf16>
    "tpu.trace_start"() <{level = 10 : i32, message = "nqd,nkd->nqk"}> : () -> ()
    %cst_99 = arith.constant dense<0.000000e+00> : vector<8x8x16xf32>
    %217 = tpu.matmul %194, %205, %cst_99 {dimension_numbers = #tpu.dot_dimension_numbers<[2], [2], [1], [1], [0, 0, 0, 1, 1, 1], [0], [0]>} : vector<8x8x8xbf16>, vector<8x16x8xbf16>, vector<8x8x16xf32> -> vector<8x8x16xf32>
    "tpu.trace_stop"() : () -> ()
    %218 = vector.broadcast %179 : vector<8x1x16xf32> to vector<8x8x16xf32>
    %219 = arith.addf %217, %218 : vector<8x8x16xf32>
    %cst_100 = arith.constant dense<0xFF800000> : vector<8x8xf32>
    %220 = vector.multi_reduction <maximumf>, %219, %cst_100 [2] : vector<8x8x16xf32> to vector<8x8xf32>
    %221 = vector.shape_cast %220 : vector<8x8xf32> to vector<8x8x1xf32>
    %222 = vector.broadcast %221 : vector<8x8x1xf32> to vector<8x8x16xf32>
    %223 = arith.subf %219, %222 : vector<8x8x16xf32>
    %224 = math.exp %223 : vector<8x8x16xf32>
    %cst_101 = arith.constant dense<0.000000e+00> : vector<8x8xf32>
    %225 = vector.multi_reduction <add>, %224, %cst_101 [2] : vector<8x8x16xf32> to vector<8x8xf32>
    %226 = vector.shape_cast %225 : vector<8x8xf32> to vector<8x8x1xf32>
    %227 = tpu.reciprocal %226 {approx = true} : vector<8x8x1xf32> -> vector<8x8x1xf32>
    %228 = vector.broadcast %227 : vector<8x8x1xf32> to vector<8x8x16xf32>
    %229 = arith.mulf %224, %228 : vector<8x8x16xf32>
    %230 = arith.truncf %229 : vector<8x8x16xf32> to vector<8x8x16xbf16>
    "tpu.trace_start"() <{level = 10 : i32, message = "nqk,nkd->nqd"}> : () -> ()
    %cst_102 = arith.constant dense<0.000000e+00> : vector<8x8x8xf32>
    %231 = tpu.matmul %230, %216, %cst_102 {dimension_numbers = #tpu.dot_dimension_numbers<[2], [1], [1], [2], [0, 0, 0, 1, 1, 2], [0], [0]>} : vector<8x8x16xbf16>, vector<8x16x8xbf16>, vector<8x8x8xf32> -> vector<8x8x8xf32>
    "tpu.trace_stop"() : () -> ()
    %232 = vector.shape_cast %231 : vector<8x8x8xf32> to vector<4x16x8xf32>
    %233 = vector.extract_strided_slice %232 {offsets = [0, 0, 0], sizes = [1, 16, 8], strides = [1, 1, 1]} : vector<4x16x8xf32> to vector<1x16x8xf32>
    %234 = vector.shape_cast %233 : vector<1x16x8xf32> to vector<16x8xf32>
    %235 = vector.extract_strided_slice %232 {offsets = [1, 0, 0], sizes = [1, 16, 8], strides = [1, 1, 1]} : vector<4x16x8xf32> to vector<1x16x8xf32>
    %236 = vector.shape_cast %235 : vector<1x16x8xf32> to vector<16x8xf32>
    %237 = vector.extract_strided_slice %232 {offsets = [2, 0, 0], sizes = [1, 16, 8], strides = [1, 1, 1]} : vector<4x16x8xf32> to vector<1x16x8xf32>
    %238 = vector.shape_cast %237 : vector<1x16x8xf32> to vector<16x8xf32>
    %239 = vector.extract_strided_slice %232 {offsets = [3, 0, 0], sizes = [1, 16, 8], strides = [1, 1, 1]} : vector<4x16x8xf32> to vector<1x16x8xf32>
    %240 = vector.shape_cast %239 : vector<1x16x8xf32> to vector<16x8xf32>
    %241 = tpu.concatenate %234, %236, %238, %240 in 1 : vector<16x8xf32>, vector<16x8xf32>, vector<16x8xf32>, vector<16x8xf32> -> vector<16x32xf32>
    %242 = arith.truncf %241 : vector<16x32xf32> to vector<16x32xbf16>
    %cst_103 = arith.constant dense<0.000000e+00> : vector<16x32xf32>
    %243 = tpu.matmul %242, %181, %cst_103 {dimension_numbers = #tpu.dot_dimension_numbers<[1], [0], [0], [1], [0, 0, 1, 1], [], []>} : vector<16x32xbf16>, vector<32x32xbf16>, vector<16x32xf32> -> vector<16x32xf32>
    %244 = vector.broadcast %183 : vector<1x32xf32> to vector<16x32xf32>
    %245 = arith.addf %243, %244 : vector<16x32xf32>
    %246 = arith.addf %126, %245 : vector<16x32xf32>
    %c0_104 = arith.constant 0 : index
    %c0_105 = arith.constant 0 : index
    %c0_106 = arith.constant 0 : index
    %247 = vector.load %arg26[%c0_104, %c0_105, %c0_106] : memref<1x1x32xf32, #tpu.memory_space<vmem>>, vector<1x1x32xf32>
    %248 = vector.shape_cast %247 : vector<1x1x32xf32> to vector<1x32xf32>
    %c0_107 = arith.constant 0 : index
    %c0_108 = arith.constant 0 : index
    %c0_109 = arith.constant 0 : index
    %249 = vector.load %arg27[%c0_107, %c0_108, %c0_109] : memref<1x1x32xf32, #tpu.memory_space<vmem>>, vector<1x1x32xf32>
    %250 = vector.shape_cast %249 : vector<1x1x32xf32> to vector<1x32xf32>
    %cst_110 = arith.constant dense<0.000000e+00> : vector<16xf32>
    %251 = vector.multi_reduction <add>, %246, %cst_110 [1] : vector<16x32xf32> to vector<16xf32>
    %252 = vector.shape_cast %251 : vector<16xf32> to vector<16x1xf32>
    %cst_111 = arith.constant 3.200000e+01 : f32
    %253 = vector.broadcast %cst_111 : f32 to vector<16x1xf32>
    %254 = arith.divf %252, %253 : vector<16x1xf32>
    %255 = vector.broadcast %254 : vector<16x1xf32> to vector<16x32xf32>
    %256 = arith.subf %246, %255 : vector<16x32xf32>
    %257 = arith.mulf %256, %256 : vector<16x32xf32>
    %cst_112 = arith.constant dense<0.000000e+00> : vector<16xf32>
    %258 = vector.multi_reduction <add>, %257, %cst_112 [1] : vector<16x32xf32> to vector<16xf32>
    %259 = vector.shape_cast %258 : vector<16xf32> to vector<16x1xf32>
    %cst_113 = arith.constant 3.200000e+01 : f32
    %260 = vector.broadcast %cst_113 : f32 to vector<16x1xf32>
    %261 = arith.divf %259, %260 : vector<16x1xf32>
    %cst_114 = arith.constant 9.99999974E-6 : f32
    %262 = vector.broadcast %cst_114 : f32 to vector<16x1xf32>
    %263 = arith.addf %261, %262 : vector<16x1xf32>
    %264 = math.rsqrt %263 : vector<16x1xf32>
    %265 = vector.broadcast %264 : vector<16x1xf32> to vector<16x32xf32>
    %266 = arith.mulf %256, %265 : vector<16x32xf32>
    %267 = vector.broadcast %248 : vector<1x32xf32> to vector<16x32xf32>
    %268 = arith.mulf %266, %267 : vector<16x32xf32>
    %269 = vector.broadcast %250 : vector<1x32xf32> to vector<16x32xf32>
    %270 = arith.addf %268, %269 : vector<16x32xf32>
    %c0_115 = arith.constant 0 : index
    %c0_116 = arith.constant 0 : index
    %c0_117 = arith.constant 0 : index
    %271 = vector.load %arg28[%c0_115, %c0_116, %c0_117] : memref<1x32x64xbf16, #tpu.memory_space<vmem>>, vector<1x32x64xbf16>
    %272 = vector.shape_cast %271 : vector<1x32x64xbf16> to vector<32x64xbf16>
    %c0_118 = arith.constant 0 : index
    %c0_119 = arith.constant 0 : index
    %c0_120 = arith.constant 0 : index
    %273 = vector.load %arg29[%c0_118, %c0_119, %c0_120] : memref<1x1x64xf32, #tpu.memory_space<vmem>>, vector<1x1x64xf32>
    %274 = vector.shape_cast %273 : vector<1x1x64xf32> to vector<1x64xf32>
    %275 = arith.truncf %270 : vector<16x32xf32> to vector<16x32xbf16>
    %cst_121 = arith.constant dense<0.000000e+00> : vector<16x64xf32>
    %276 = tpu.matmul %275, %272, %cst_121 {dimension_numbers = #tpu.dot_dimension_numbers<[1], [0], [0], [1], [0, 0, 1, 1], [], []>} : vector<16x32xbf16>, vector<32x64xbf16>, vector<16x64xf32> -> vector<16x64xf32>
    %277 = vector.broadcast %274 : vector<1x64xf32> to vector<16x64xf32>
    %278 = arith.addf %276, %277 : vector<16x64xf32>
    %cst_122 = arith.constant 0.000000e+00 : f32
    %279 = vector.broadcast %cst_122 : f32 to vector<16x64xf32>
    %280 = arith.maximumf %278, %279 : vector<16x64xf32>
    %c0_123 = arith.constant 0 : index
    %c0_124 = arith.constant 0 : index
    %c0_125 = arith.constant 0 : index
    %281 = vector.load %arg30[%c0_123, %c0_124, %c0_125] : memref<1x64x32xbf16, #tpu.memory_space<vmem>>, vector<1x64x32xbf16>
    %282 = vector.shape_cast %281 : vector<1x64x32xbf16> to vector<64x32xbf16>
    %c0_126 = arith.constant 0 : index
    %c0_127 = arith.constant 0 : index
    %c0_128 = arith.constant 0 : index
    %283 = vector.load %arg31[%c0_126, %c0_127, %c0_128] : memref<1x1x32xf32, #tpu.memory_space<vmem>>, vector<1x1x32xf32>
    %284 = vector.shape_cast %283 : vector<1x1x32xf32> to vector<1x32xf32>
    %285 = arith.truncf %280 : vector<16x64xf32> to vector<16x64xbf16>
    %cst_129 = arith.constant dense<0.000000e+00> : vector<16x32xf32>
    %286 = tpu.matmul %285, %282, %cst_129 {dimension_numbers = #tpu.dot_dimension_numbers<[1], [0], [0], [1], [0, 0, 1, 1], [], []>} : vector<16x64xbf16>, vector<64x32xbf16>, vector<16x32xf32> -> vector<16x32xf32>
    %287 = vector.broadcast %284 : vector<1x32xf32> to vector<16x32xf32>
    %288 = arith.addf %286, %287 : vector<16x32xf32>
    %289 = arith.addf %246, %288 : vector<16x32xf32>
    %c1_i32 = arith.constant 1 : i32
    %290 = arith.cmpi slt, %arg1, %c1_i32 : i32
    %291 = arith.extui %290 : i1 to i32
    %c0_i32_130 = arith.constant 0 : i32
    %292 = arith.cmpi ne, %291, %c0_i32_130 : i32
    scf.if %292 {
      %296 = vector.shape_cast %289 : vector<16x32xf32> to vector<2x8x32xf32>
      %c0_133 = arith.constant 0 : index
      %c0_134 = arith.constant 0 : index
      %c0_135 = arith.constant 0 : index
      %297 = vector.load %arg34[%c0_133, %c0_134, %c0_135] : memref<2x8x32xf32, #tpu.memory_space<vmem>>, vector<2x8x32xf32>
      tpu.vector_store %arg34[%c0_133, %c0_134, %c0_135], %296 {strides = array<i32>} : memref<2x8x32xf32, #tpu.memory_space<vmem>>, vector<2x8x32xf32>,
    } else {
    }
    %c1_i32_131 = arith.constant 1 : i32
    %293 = arith.cmpi eq, %arg1, %c1_i32_131 : i32
    %294 = arith.extui %293 : i1 to i32
    %c0_i32_132 = arith.constant 0 : i32
    %295 = arith.cmpi ne, %294, %c0_i32_132 : i32
    scf.if %295 {
      %c0_133 = arith.constant 0 : index
      %c0_134 = arith.constant 0 : index
      %296 = vector.load %arg32[%c0_133, %c0_134] : memref<1x32xf32, #tpu.memory_space<vmem>>, vector<1x32xf32>
      %c0_135 = arith.constant 0 : index
      %c0_136 = arith.constant 0 : index
      %297 = vector.load %arg33[%c0_135, %c0_136] : memref<1x32xf32, #tpu.memory_space<vmem>>, vector<1x32xf32>
      %cst_137 = arith.constant dense<0.000000e+00> : vector<16xf32>
      %298 = vector.multi_reduction <add>, %289, %cst_137 [1] : vector<16x32xf32> to vector<16xf32>
      %299 = vector.shape_cast %298 : vector<16xf32> to vector<16x1xf32>
      %cst_138 = arith.constant 3.200000e+01 : f32
      %300 = vector.broadcast %cst_138 : f32 to vector<16x1xf32>
      %301 = arith.divf %299, %300 : vector<16x1xf32>
      %302 = vector.broadcast %301 : vector<16x1xf32> to vector<16x32xf32>
      %303 = arith.subf %289, %302 : vector<16x32xf32>
      %304 = arith.mulf %303, %303 : vector<16x32xf32>
      %cst_139 = arith.constant dense<0.000000e+00> : vector<16xf32>
      %305 = vector.multi_reduction <add>, %304, %cst_139 [1] : vector<16x32xf32> to vector<16xf32>
      %306 = vector.shape_cast %305 : vector<16xf32> to vector<16x1xf32>
      %cst_140 = arith.constant 3.200000e+01 : f32
      %307 = vector.broadcast %cst_140 : f32 to vector<16x1xf32>
      %308 = arith.divf %306, %307 : vector<16x1xf32>
      %cst_141 = arith.constant 9.99999974E-6 : f32
      %309 = vector.broadcast %cst_141 : f32 to vector<16x1xf32>
      %310 = arith.addf %308, %309 : vector<16x1xf32>
      %311 = math.rsqrt %310 : vector<16x1xf32>
      %312 = vector.broadcast %311 : vector<16x1xf32> to vector<16x32xf32>
      %313 = arith.mulf %303, %312 : vector<16x32xf32>
      %314 = vector.broadcast %296 : vector<1x32xf32> to vector<16x32xf32>
      %315 = arith.mulf %313, %314 : vector<16x32xf32>
      %316 = vector.broadcast %297 : vector<1x32xf32> to vector<16x32xf32>
      %317 = arith.addf %315, %316 : vector<16x32xf32>
      %318 = vector.shape_cast %317 : vector<16x32xf32> to vector<2x8x32xf32>
      %c0_142 = arith.constant 0 : index
      %c0_143 = arith.constant 0 : index
      %c0_144 = arith.constant 0 : index
      %319 = vector.load %arg34[%c0_142, %c0_143, %c0_144] : memref<2x8x32xf32, #tpu.memory_space<vmem>>, vector<2x8x32xf32>
      tpu.vector_store %arg34[%c0_142, %c0_143, %c0_144], %318 {strides = array<i32>} : memref<2x8x32xf32, #tpu.memory_space<vmem>>, vector<2x8x32xf32>,
    } else {
    }
    return
  }
  func.func @transform_0(%arg0: i32, %arg1: i32) -> (i32, i32, i32) {
    %c0_i32 = arith.constant 0 : i32
    %c0_i32_0 = arith.constant 0 : i32
    %c0_i32_1 = arith.constant 0 : i32
    return %arg0, %c0_i32, %c0_i32_0 : i32, i32, i32
  }
  func.func @transform_1(%arg0: i32, %arg1: i32) -> (i32, i32, i32) {
    %c0_i32 = arith.constant 0 : i32
    %c0_i32_0 = arith.constant 0 : i32
    %c0_i32_1 = arith.constant 0 : i32
    return %arg0, %c0_i32, %c0_i32_0 : i32, i32, i32
  }
  func.func @transform_2(%arg0: i32, %arg1: i32) -> (i32, i32, i32) {
    %c0_i32 = arith.constant 0 : i32
    %c0_i32_0 = arith.constant 0 : i32
    %c0_i32_1 = arith.constant 0 : i32
    return %arg0, %c0_i32, %c0_i32_0 : i32, i32, i32
  }
  func.func @transform_3(%arg0: i32, %arg1: i32) -> (i32, i32, i32) {
    %c0_i32 = arith.constant 0 : i32
    %c0_i32_0 = arith.constant 0 : i32
    %c0_i32_1 = arith.constant 0 : i32
    return %arg0, %c0_i32, %c0_i32_0 : i32, i32, i32
  }
  func.func @transform_4(%arg0: i32, %arg1: i32) -> (i32, i32, i32) {
    %c0_i32 = arith.constant 0 : i32
    %c0_i32_0 = arith.constant 0 : i32
    %c0_i32_1 = arith.constant 0 : i32
    return %arg0, %c0_i32, %c0_i32_0 : i32, i32, i32
  }
  func.func @transform_5(%arg0: i32, %arg1: i32) -> (i32, i32) {
    %c0_i32 = arith.constant 0 : i32
    %c0_i32_0 = arith.constant 0 : i32
    %c0_i32_1 = arith.constant 0 : i32
    return %c0_i32, %c0_i32_0 : i32, i32
  }
  func.func @transform_6(%arg0: i32, %arg1: i32) -> (i32, i32, i32) {
    %c0_i32 = arith.constant 0 : i32
    %c0_i32_0 = arith.constant 0 : i32
    %c0_i32_1 = arith.constant 0 : i32
    return %arg1, %c0_i32, %c0_i32_0 : i32, i32, i32
  }
  func.func @transform_7(%arg0: i32, %arg1: i32) -> (i32, i32, i32) {
    %c0_i32 = arith.constant 0 : i32
    %c0_i32_0 = arith.constant 0 : i32
    %c0_i32_1 = arith.constant 0 : i32
    return %arg1, %c0_i32, %c0_i32_0 : i32, i32, i32
  }
  func.func @transform_8(%arg0: i32, %arg1: i32) -> (i32, i32, i32) {
    %c0_i32 = arith.constant 0 : i32
    %c0_i32_0 = arith.constant 0 : i32
    %c0_i32_1 = arith.constant 0 : i32
    return %arg1, %c0_i32, %c0_i32_0 : i32, i32, i32
  }
  func.func @transform_9(%arg0: i32, %arg1: i32) -> (i32, i32, i32) {
    %c0_i32 = arith.constant 0 : i32
    %c0_i32_0 = arith.constant 0 : i32
    %c0_i32_1 = arith.constant 0 : i32
    return %arg1, %c0_i32, %c0_i32_0 : i32, i32, i32
  }
  func.func @transform_10(%arg0: i32, %arg1: i32) -> (i32, i32, i32) {
    %c0_i32 = arith.constant 0 : i32
    %c0_i32_0 = arith.constant 0 : i32
    %c0_i32_1 = arith.constant 0 : i32
    return %arg1, %c0_i32, %c0_i32_0 : i32, i32, i32
  }
  func.func @transform_11(%arg0: i32, %arg1: i32) -> (i32, i32, i32) {
    %c0_i32 = arith.constant 0 : i32
    %c0_i32_0 = arith.constant 0 : i32
    %c0_i32_1 = arith.constant 0 : i32
    return %arg1, %c0_i32, %c0_i32_0 : i32, i32, i32
  }
  func.func @transform_12(%arg0: i32, %arg1: i32) -> (i32, i32, i32) {
    %c0_i32 = arith.constant 0 : i32
    %c0_i32_0 = arith.constant 0 : i32
    %c0_i32_1 = arith.constant 0 : i32
    return %arg1, %c0_i32, %c0_i32_0 : i32, i32, i32
  }
  func.func @transform_13(%arg0: i32, %arg1: i32) -> (i32, i32, i32) {
    %c0_i32 = arith.constant 0 : i32
    %c0_i32_0 = arith.constant 0 : i32
    %c0_i32_1 = arith.constant 0 : i32
    return %arg1, %c0_i32, %c0_i32_0 : i32, i32, i32
  }
  func.func @transform_14(%arg0: i32, %arg1: i32) -> (i32, i32, i32) {
    %c0_i32 = arith.constant 0 : i32
    %c0_i32_0 = arith.constant 0 : i32
    %c0_i32_1 = arith.constant 0 : i32
    return %arg1, %c0_i32, %c0_i32_0 : i32, i32, i32
  }
  func.func @transform_15(%arg0: i32, %arg1: i32) -> (i32, i32, i32) {
    %c0_i32 = arith.constant 0 : i32
    %c0_i32_0 = arith.constant 0 : i32
    %c0_i32_1 = arith.constant 0 : i32
    return %arg1, %c0_i32, %c0_i32_0 : i32, i32, i32
  }
  func.func @transform_16(%arg0: i32, %arg1: i32) -> (i32, i32, i32) {
    %c0_i32 = arith.constant 0 : i32
    %c0_i32_0 = arith.constant 0 : i32
    %c0_i32_1 = arith.constant 0 : i32
    return %arg1, %c0_i32, %c0_i32_0 : i32, i32, i32
  }
  func.func @transform_17(%arg0: i32, %arg1: i32) -> (i32, i32, i32) {
    %c0_i32 = arith.constant 0 : i32
    %c0_i32_0 = arith.constant 0 : i32
    %c0_i32_1 = arith.constant 0 : i32
    return %arg1, %c0_i32, %c0_i32_0 : i32, i32, i32
  }
  func.func @transform_18(%arg0: i32, %arg1: i32) -> (i32, i32, i32) {
    %c0_i32 = arith.constant 0 : i32
    %c0_i32_0 = arith.constant 0 : i32
    %c0_i32_1 = arith.constant 0 : i32
    return %arg1, %c0_i32, %c0_i32_0 : i32, i32, i32
  }
  func.func @transform_19(%arg0: i32, %arg1: i32) -> (i32, i32, i32) {
    %c0_i32 = arith.constant 0 : i32
    %c0_i32_0 = arith.constant 0 : i32
    %c0_i32_1 = arith.constant 0 : i32
    return %arg1, %c0_i32, %c0_i32_0 : i32, i32, i32
  }
  func.func @transform_20(%arg0: i32, %arg1: i32) -> (i32, i32, i32) {
    %c0_i32 = arith.constant 0 : i32
    %c0_i32_0 = arith.constant 0 : i32
    %c0_i32_1 = arith.constant 0 : i32
    return %arg1, %c0_i32, %c0_i32_0 : i32, i32, i32
  }
  func.func @transform_21(%arg0: i32, %arg1: i32) -> (i32, i32, i32) {
    %c0_i32 = arith.constant 0 : i32
    %c0_i32_0 = arith.constant 0 : i32
    %c0_i32_1 = arith.constant 0 : i32
    return %arg1, %c0_i32, %c0_i32_0 : i32, i32, i32
  }
  func.func @transform_22(%arg0: i32, %arg1: i32) -> (i32, i32, i32) {
    %c0_i32 = arith.constant 0 : i32
    %c0_i32_0 = arith.constant 0 : i32
    %c0_i32_1 = arith.constant 0 : i32
    return %arg1, %c0_i32, %c0_i32_0 : i32, i32, i32
  }
  func.func @transform_23(%arg0: i32, %arg1: i32) -> (i32, i32, i32) {
    %c0_i32 = arith.constant 0 : i32
    %c0_i32_0 = arith.constant 0 : i32
    %c0_i32_1 = arith.constant 0 : i32
    return %arg1, %c0_i32, %c0_i32_0 : i32, i32, i32
  }
  func.func @transform_24(%arg0: i32, %arg1: i32) -> (i32, i32, i32) {
    %c0_i32 = arith.constant 0 : i32
    %c0_i32_0 = arith.constant 0 : i32
    %c0_i32_1 = arith.constant 0 : i32
    return %arg1, %c0_i32, %c0_i32_0 : i32, i32, i32
  }
  func.func @transform_25(%arg0: i32, %arg1: i32) -> (i32, i32, i32) {
    %c0_i32 = arith.constant 0 : i32
    %c0_i32_0 = arith.constant 0 : i32
    %c0_i32_1 = arith.constant 0 : i32
    return %arg1, %c0_i32, %c0_i32_0 : i32, i32, i32
  }
  func.func @transform_26(%arg0: i32, %arg1: i32) -> (i32, i32, i32) {
    %c0_i32 = arith.constant 0 : i32
    %c0_i32_0 = arith.constant 0 : i32
    %c0_i32_1 = arith.constant 0 : i32
    return %arg1, %c0_i32, %c0_i32_0 : i32, i32, i32
  }
  func.func @transform_27(%arg0: i32, %arg1: i32) -> (i32, i32, i32) {
    %c0_i32 = arith.constant 0 : i32
    %c0_i32_0 = arith.constant 0 : i32
    %c0_i32_1 = arith.constant 0 : i32
    return %arg1, %c0_i32, %c0_i32_0 : i32, i32, i32
  }
  func.func @transform_28(%arg0: i32, %arg1: i32) -> (i32, i32, i32) {
    %c0_i32 = arith.constant 0 : i32
    %c0_i32_0 = arith.constant 0 : i32
    %c0_i32_1 = arith.constant 0 : i32
    return %arg1, %c0_i32, %c0_i32_0 : i32, i32, i32
  }
  func.func @transform_29(%arg0: i32, %arg1: i32) -> (i32, i32, i32) {
    %c0_i32 = arith.constant 0 : i32
    %c0_i32_0 = arith.constant 0 : i32
    %c0_i32_1 = arith.constant 0 : i32
    return %arg1, %c0_i32, %c0_i32_0 : i32, i32, i32
  }
  func.func @transform_30(%arg0: i32, %arg1: i32) -> (i32, i32) {
    %c0_i32 = arith.constant 0 : i32
    %c0_i32_0 = arith.constant 0 : i32
    %c0_i32_1 = arith.constant 0 : i32
    return %c0_i32, %c0_i32_0 : i32, i32
  }
  func.func @transform_31(%arg0: i32, %arg1: i32) -> (i32, i32) {
    %c0_i32 = arith.constant 0 : i32
    %c0_i32_0 = arith.constant 0 : i32
    %c0_i32_1 = arith.constant 0 : i32
    return %c0_i32, %c0_i32_0 : i32, i32
  }
  func.func @transform_32(%arg0: i32, %arg1: i32) -> (i32, i32, i32) {
    %c0_i32 = arith.constant 0 : i32
    %c0_i32_0 = arith.constant 0 : i32
    %c0_i32_1 = arith.constant 0 : i32
    return %arg0, %c0_i32, %c0_i32_0 : i32, i32, i32
  }
  func.func @transform_33(%arg0: i32, %arg1: i32) -> (i32, i32, i32, i32, i32) {
    %c0_i32 = arith.constant 0 : i32
    %c0_i32_0 = arith.constant 0 : i32
    %c0_i32_1 = arith.constant 0 : i32
    %c0_i32_2 = arith.constant 0 : i32
    return %arg1, %c0_i32, %arg0, %c0_i32_0, %c0_i32_1 : i32, i32, i32, i32, i32
  }
}

</mosaic_0001>

<bundles_post_ra>
// kernel: tpu_custom_call.1
= control target key start
LH: loop header
LB: loop body
LE: loop exit
PB: predicated region body
PF: predicated region fallthrough
CT: control target
= control target key end

     0   :  { %s7518_s6 = smov 1   ;;  %s7519_s10 = smov 2   ;;  %s9172_s0 = inlined_call_operand.smem [shape: u32[34], index: -1, kind: input, shape index: {}] }
   0x1   :  { %s7611_s5 = sld [smem:[%s9172_s0]]   ;;  %s7520_s14 = smov 3  }
   0x2   :  { %s7616_s9 = sld [smem:[%s9172_s0 + %s7518_s6]]   ;;  %s7521_s18 = smov 4  }
   0x3   :  { %s7621_s13 = sld [smem:[%s9172_s0 + %s7519_s10]]   ;;  %s7522_s22 = smov 5  }
   0x4   :  { %s7626_s17 = sld [smem:[%s9172_s0 + %s7520_s14]]   ;;  %s7523_s26 = smov 6  }
   0x5   :  { %s7631_s21 = sld [smem:[%s9172_s0 + %s7521_s18]]   ;;  %s7524_s30 = smov 7  }
   0x6   :  { %s7636_s25 = sld [smem:[%s9172_s0 + %s7522_s22]]   ;;  %s7525_s4 = smov 8  }
   0x7   :  { %9240 = sst [smem:[#allocation51_spill]] %s7611_s5  ;;  %s7526_s10 = smov 9  }
   0x8   :  { %9241 = sst [smem:[#allocation52_spill]] %s7616_s9  ;;  %s7527_s15 = smov 10  }
   0x9   :  { %9242 = sst [smem:[#allocation53_spill]] %s7621_s13  ;;  %s7528_s20 = smov 11  }
   0xa   :  { %9243 = sst [smem:[#allocation54_spill]] %s7626_s17  ;;  %s7530_s1 = smov 13  }
   0xb   :  { %s7641_s29 = sld [smem:[%s9172_s0 + %s7523_s26]]   ;;  %s7529_s26 = smov 12  }
   0xc   :  { %s7646_s3 = sld [smem:[%s9172_s0 + %s7524_s30]]   ;;  %s7531_s7 = smov 14  }
   0xd   :  { %s7651_s8 = sld [smem:[%s9172_s0 + %s7525_s4]]   ;;  %s7533_s22 = smov 16  }
   0xe   :  { %s7656_s14 = sld [smem:[%s9172_s0 + %s7526_s10]]   ;;  %s7534_s28 = smov 17  }
   0xf   :  { %s7661_s19 = sld [smem:[%s9172_s0 + %s7527_s15]]   ;;  %s7532_s15 = smov 15  }
  0x10   :  { %s7666_s24 = sld [smem:[%s9172_s0 + %s7528_s20]]  }
  0x11   :  { %s7671_s30 = sld [smem:[%s9172_s0 + %s7529_s26]]  }
  0x12   :  { %9244 = sst [smem:[#allocation55_spill]] %s7646_s3 }
  0x13   :  { %9245 = sst [smem:[#allocation56_spill]] %s7651_s8 }
  0x14   :  { %9246 = sst [smem:[#allocation57_spill]] %s7656_s14 }
  0x15   :  { %9247 = sst [smem:[#allocation58_spill]] %s7661_s19 }
  0x16   :  { %s7676_s6 = sld [smem:[%s9172_s0 + %s7530_s1]]  }
  0x17   :  { %s7681_s12 = sld [smem:[%s9172_s0 + %s7531_s7]]   ;;  %s7535_s7 = smov 18  }
  0x18   :  { %s7686_s20 = sld [smem:[%s9172_s0 + %s7532_s15]]   ;;  %s7536_s15 = smov 19  }
  0x19   :  { %s7691_s27 = sld [smem:[%s9172_s0 + %s7533_s22]]   ;;  %s7537_s22 = smov 20  }
  0x1a   :  { %s7696_s4 = sld [smem:[%s9172_s0 + %s7534_s28]]   ;;  %s7538_s28 = smov 21  }
  0x1c   :  { %9248 = sst [smem:[#allocation59_spill]] %s7676_s6 }
  0x1d   :  { %9249 = sst [smem:[#allocation60_spill]] %s7681_s12 }
  0x1e   :  { %9250 = sst [smem:[#allocation61_spill]] %s7686_s20 }
  0x1f   :  { %9251 = sst [smem:[#allocation62_spill]] %s7691_s27 }
  0x20   :  { %9252 = sst [smem:[#allocation63_spill]] %s7696_s4 }
  0x21   :  { %s7701_s12 = sld [smem:[%s9172_s0 + %s7535_s7]]   ;;  %s7539_s7 = smov 22  }
  0x22   :  { %s7706_s20 = sld [smem:[%s9172_s0 + %s7536_s15]]   ;;  %s7540_s15 = smov 23  }
  0x23   :  { %s7711_s27 = sld [smem:[%s9172_s0 + %s7537_s22]]   ;;  %s7541_s22 = smov 24  }
  0x24   :  { %s7716_s4 = sld [smem:[%s9172_s0 + %s7538_s28]]   ;;  %s7542_s28 = smov 25  }
  0x27   :  { %9253 = sst [smem:[#allocation64_spill]] %s7701_s12 }
  0x28   :  { %9254 = sst [smem:[#allocation65_spill]] %s7706_s20 }
  0x29   :  { %9255 = sst [smem:[#allocation66_spill]] %s7711_s27 }
  0x2a   :  { %9256 = sst [smem:[#allocation67_spill]] %s7716_s4 }
  0x2b   :  { %s7721_s12 = sld [smem:[%s9172_s0 + %s7539_s7]]   ;;  %s7543_s7 = smov 26  }
  0x2c   :  { %s7726_s20 = sld [smem:[%s9172_s0 + %s7540_s15]]   ;;  %s7544_s15 = smov 27  }
  0x2d   :  { %s7731_s27 = sld [smem:[%s9172_s0 + %s7541_s22]]   ;;  %s7545_s22 = smov 28  }
  0x2e   :  { %s7736_s4 = sld [smem:[%s9172_s0 + %s7542_s28]]   ;;  %s7546_s28 = smov 29  }
  0x31   :  { %9257 = sst [smem:[#allocation68_spill]] %s7721_s12 }
  0x32   :  { %9258 = sst [smem:[#allocation69_spill]] %s7726_s20 }
  0x33   :  { %9259 = sst [smem:[#allocation70_spill]] %s7731_s27 }
  0x34   :  { %9260 = sst [smem:[#allocation71_spill]] %s7736_s4 }
  0x35   :  { %s7741_s12 = sld [smem:[%s9172_s0 + %s7543_s7]]   ;;  %s7547_s7 = smov 30  }
  0x36   :  { %s7746_s20 = sld [smem:[%s9172_s0 + %s7544_s15]]   ;;  %s7548_s15 = smov 31  }
  0x37   :  { %s7751_s27 = sld [smem:[%s9172_s0 + %s7545_s22]]   ;;  %s7549_s22 = smov 32  }
  0x38   :  { %s7756_s4 = sld [smem:[%s9172_s0 + %s7546_s28]]   ;;  %s7550_s28 = smov 33  }
  0x3b   :  { %9261 = sst [smem:[#allocation72_spill]] %s7741_s12 }
  0x3c   :  { %9262 = sst [smem:[#allocation73_spill]] %s7746_s20 }
  0x3d   :  { %9263 = sst [smem:[#allocation74_spill]] %s7751_s27 }
  0x3e   :  { %9264 = sst [smem:[#allocation75_spill]] %s7756_s4 }
  0x3f   :  { %s7761_s12 = sld [smem:[%s9172_s0 + %s7547_s7]]  }
  0x40   :  { %s7766_s20 = sld [smem:[%s9172_s0 + %s7548_s15]]  }
  0x41   :  { %s7771_s27 = sld [smem:[%s9172_s0 + %s7549_s22]]  }
  0x42   :  { %s7776_s4 = sld [smem:[%s9172_s0 + %s7550_s28]]  }
  0x45   :  { %9265 = sst [smem:[#allocation76_spill]] %s7761_s12 }
  0x47   :  { %9266 = sst [smem:[#allocation77_spill]] %s7771_s27 }
  0x48   :  { %9267 = sst [smem:[#allocation78_spill]] %s7776_s4 }
  0x49   :  { %73 = vsyncpa [#allocation3], 0 }
  0x4a   :  { %74 = vsyncpa [#allocation6], 0 }
  0x4b   :  { %75 = vsyncpa [#allocation9], 0 }
  0x4c   :  { %76 = vsyncpa [#allocation12], 0 }
  0x4d   :  { %77 = vsyncpa [#allocation4], 0 }
  0x4e   :  { %78 = vsyncpa [#allocation41], 0 }
  0x4f   :  { %80 = vsyncpa [#allocation41 + $0x1], 0  ;;  %s7778_s7 = smov 0   ;;  %s7780_s10 = smov 0  }
  0x50   :  { %s7782_s11 = smov 0   ;;  %s7784_s15 = smov 0  }
  0x51   :  { %s7786_s16 = smov 0   ;;  %s7788_s18 = smov 0  }
  0x52 LB: > { %s9268_s6 = sld [smem:[#allocation59_spill]]  ;;  %s9269_s19 = sld [smem:[#allocation58_spill]]  ;;  %s7508_s15 = sphi %s7784_s15, %s9379_s15   ;;  %s7504_s11 = sphi %s7782_s11, %s9378_s11   ;;  %s7500_s10 = sphi %s7780_s10, %s9377_s10   ;;  %s7496_s7 = sphi %s7778_s7, %s9374_s7   ;;  %s7516_s18 = sphi %s7788_s18, %s86_s18   ;;  %s7512_s16 = sphi %s7786_s16, %s9380_s16  }
  0x53   : > { %s9270_s14 = sld [smem:[#allocation57_spill]]  ;;  %s9271_s8 = sld [smem:[#allocation56_spill]] }
  0x54   : > { %s9272_s3 = sld [smem:[#allocation55_spill]]  ;;  %s9273_s17 = sld [smem:[#allocation54_spill]] }
  0x55   : > { %s9274_s12 = sld [smem:[#allocation76_spill]]  ;;  %s9275_s5 = sld [smem:[#allocation51_spill]] }
  0x56   : > { %s9276_s13 = sld [smem:[#allocation53_spill]]  ;;  %s9277_s9 = sld [smem:[#allocation52_spill]] }
  0x57   : > { %9278 = sst [smem:[#allocation79_spill]] %s7496_s7  ;;  %s7809_s0 = sadd.s32 4294967295, %s7516_s18  }
  0x58   : > { %9279 = sst [smem:[#allocation80_spill]] %s7500_s10  ;;  %s5460_s22 = sadd.s32 4294967294, %s7516_s18  }
  0x59   : > { %9280 = sst [smem:[#allocation81_spill]] %s7508_s15  ;;  %s95_s23 = sadd.s32 1, %s7512_s16 }
  0x5a   : > { %s256_s26 = sadd.s32 1, %s7504_s11  ;;  %p96_p0 = scmp.ge.s32.totalorder %s95_s23, 2 }
  0x5b   : > { %p263_p1 = scmp.ne.s32.totalorder %s7504_s11, %s7500_s10  ;;  %p264_p2 = scmp.eq.s32.totalorder %s7516_s18, 0 }
  0x5c   : > { %p269_p3 = scmp.ne.s32.totalorder %s7500_s10, %s7496_s7  ;;  %s9382_s23 = smov (%p96_p0, %s95_s23), 0 }
  0x5d   : > { %9281 = sst [smem:[#allocation82_spill]] %s9382_s23  ;;  %p7821_p4 = por %p264_p2, %p263_p1 }
  0x5e   : > { %p9199_p5 = scmp.eq.s32.totalorder %s7809_s0, 0  ;;  %s253_s1 = ssub.s32 %s7512_s16, %s9382_s23 }
  0x5f   : > { %s9282_s28 = scalar_select %p7821_p4, 1, 0 }
  0x60   : > { %p9198_p6 = scmp.eq.s32.totalorder %s7809_s0, 1  ;;  %p254_p7 = scmp.eq.s32.totalorder %s253_s1, 0 }
  0x61   : > { %p7831_p8 = por %p9199_p5, %p269_p3  ;;  %p967_p10 = scmp.eq.s32.totalorder %s5460_s22, 1 }
  0x62   : > { %p7837_p9 = por %p9198_p6, %p263_p1  ;;  %p5461_p12 = scmp.ge.s32.totalorder %s7516_s18, 1 }
  0x63   : > { %s9283_s2 = scalar_select %p7831_p8, 1, 0 }
  0x64   : > { %s9285_s7 = scalar_select %p7837_p9, 1, 0 }
  0x65   : > { %9284 = sst [smem:[#allocation83_spill]] %s9283_s2  ;;  %p7844_p11 = por %p967_p10, %p269_p3 }
  0x66   : > { %9286 = sst [smem:[#allocation84_spill]] %s9285_s7  ;;  %p974_p13 = scmp.lt.s32.totalorder %s7516_s18, 3 }
  0x67   : > { %s7842_s4 = scalar_select %p254_p7, %s7504_s11, %s256_s26  }
  0x68   : > { %s9288_s27 = scalar_select %p7844_p11, 1, 0 }
  0x69   : > { %9287 = sst [smem:[#allocation85_spill]] %s7842_s4  ;;  %p7850_p0 = pnand %p5461_p12, %p974_p13 }
  0x6a   : > { %9289 = sst [smem:[#allocation86_spill]] %s9288_s27  ;;  %s7551_s23 = smov [#allocation5]  }
  0x6b   : > { %s9290_s1 = scalar_select %p7850_p0, 1, 0 }
  0x6c   : > { %s1006_s15 = sshll.u32 %s7551_s23, 4  ;;  %p6089_p1 = pneg %p7850_p0  ;;  %s7854_s15 = int_to_ptr.vmem [resolvable:$true] %s1006_s15 }
  0x6d   : > { %s7552_s26 = smov [#allocation8]   ;;  %s7553_s27 = smov [#allocation7]  }
  0x6e   : > { %p7860_p2 = pnand %p6089_p1, %p9199_p5  ;;  %s1039_s4 = sshll.u32 %s7552_s26, 4  ;;  %s7864_s4 = int_to_ptr.vmem [resolvable:$true] %s1039_s4 }
  0x6f   : > { %s7866_s7 = sshll.u32 %s7553_s27, 4  ;;  %s6484_s2 = scalar_lea.hbm %s9277_s9, 256  ;;  %s1024_s7 = int_to_ptr.vmem [resolvable:$true] %s7866_s7 }
  0x70   : > { %p6485_p3 = scmp.ne.s32.totalorder %s9277_s9, %s6484_s2  ;;  %p7872_p7 = pneg %p7860_p2 }
  0x71   : > { %p6491_p13 = scmp.lt.u32.totalorder %s6484_s2, %s9277_s9 }
  0x72   : > { %p6487_p10 = pnand %p7872_p7, %p6485_p3 }
  0x74   : > { %p6488_p12 = pneg %p6487_p10 }
  0x76   : > { %p6493_p1 = pnand %p6491_p13, %p6488_p12 }
  0x78   : > { %6496 = shalt.err (!%p6493_p1)
}
  0x79   : > { %s6497_s27 = scalar_lea.vmem %s7854_s15, 256  ;;  %p6505_p9 = scmp.lt.s32.totalorder %s7854_s15, %s7854_s15 }
  0x7a   : > { %p6498_p6 = scmp.ne.s32.totalorder %s7854_s15, %s6497_s27  ;;  %p6506_p8 = scmp.lt.s32.totalorder %s6497_s27, %s6497_s27 }
  0x7c   : > { %p6500_p5 = pnand %p6498_p6, %p7872_p7  ;;  %p6507_p0 = por %p6506_p8, %p6505_p9 }
  0x7e   : > { %p6501_p11 = pneg %p6500_p5 }
  0x80   : > { %p6508_p4 = pnand %p6507_p0, %p6501_p11 }
  0x82   : > { %6511 = shalt.err (!%p6508_p4)
}
  0x83   : > { %s9205_s26 = smov 64   ;;  %s7555_s2 = smov 4  }
  0x84   : > { %6095 = dma.hbm_to_vmem [thread:$0]  (!%p7860_p2), %s9277_s9, 256, %s7854_s15, [#allocation6], %s9205_s26, %s9205_s26, %s7555_s2  }
  0x85   : > { %s6512_s10 = scalar_lea.hbm %s9273_s17, 256 }
  0x86   : > { %p6513_p5 = scmp.ne.s32.totalorder %s9273_s17, %s6512_s10  ;;  %p6519_p4 = scmp.lt.u32.totalorder %s6512_s10, %s9273_s17 }
  0x88   : > { %p6515_p6 = pnand %p6513_p5, %p7872_p7 }
  0x8a   : > { %p6516_p8 = pneg %p6515_p6 }
  0x8c   : > { %p6521_p9 = pnand %p6519_p4, %p6516_p8 }
  0x8e   : > { %6524 = shalt.err (!%p6521_p9)
}
  0x8f   : > { %s6525_s27 = scalar_lea.vmem %s7864_s4, 256  ;;  %p6533_p10 = scmp.lt.s32.totalorder %s7864_s4, %s7864_s4 }
  0x90   : > { %p6526_p11 = scmp.ne.s32.totalorder %s7864_s4, %s6525_s27  ;;  %p6534_p12 = scmp.lt.s32.totalorder %s6525_s27, %s6525_s27 }
  0x92   : > { %p6528_p0 = pnand %p6526_p11, %p7872_p7  ;;  %p6535_p13 = por %p6534_p12, %p6533_p10 }
  0x94   : > { %p6529_p3 = pneg %p6528_p0 }
  0x96   : > { %p6536_p1 = pnand %p6535_p13, %p6529_p3 }
  0x98   : > { %6539 = shalt.err (!%p6536_p1)
}
  0x99   : > { %s9206_s15 = smov 128   ;;  %s9207_s10 = smov 8  }
  0x9a   : > { %6101 = dma.hbm_to_vmem [thread:$0]  (!%p7860_p2), %s9273_s17, 256, %s7864_s4, [#allocation9], %s9206_s15, %s9206_s15, %s9207_s10  }
  0x9b   : > { %s6540_s27 = scalar_lea.hbm %s9276_s13, 256 }
  0x9c   : > { %p6541_p5 = scmp.ne.s32.totalorder %s9276_s13, %s6540_s27  ;;  %p6547_p4 = scmp.lt.u32.totalorder %s6540_s27, %s9276_s13 }
  0x9e   : > { %p6543_p6 = pnand %p6541_p5, %p7872_p7 }
  0xa0   : > { %p6544_p8 = pneg %p6543_p6 }
  0xa2   : > { %p6549_p9 = pnand %p6547_p4, %p6544_p8 }
  0xa4   : > { %6552 = shalt.err (!%p6549_p9)
}
  0xa5   : > { %s6553_s26 = scalar_lea.vmem %s1024_s7, 256  ;;  %p6561_p10 = scmp.lt.s32.totalorder %s1024_s7, %s1024_s7 }
  0xa6   : > { %p6554_p11 = scmp.ne.s32.totalorder %s1024_s7, %s6553_s26  ;;  %p6562_p12 = scmp.lt.s32.totalorder %s6553_s26, %s6553_s26 }
  0xa8   : > { %p6556_p0 = pnand %p6554_p11, %p7872_p7  ;;  %p6563_p13 = por %p6562_p12, %p6561_p10 }
  0xaa   : > { %p6557_p3 = pneg %p6556_p0 }
  0xac   : > { %p6564_p1 = pnand %p6563_p13, %p6557_p3 }
  0xae   : > { %6567 = shalt.err (!%p6564_p1)
}
  0xaf   : > { %s9293_s4 = smov 64   ;;  %s7558_s27 = smov [#allocation10]  }
  0xb0   : > { %6098 = dma.hbm_to_vmem [thread:$0]  (!%p7860_p2), %s9276_s13, 256, %s1024_s7, [#allocation6], %s9293_s4, %s9293_s4, %s7555_s2  }
  0xb1   : > { %s1055_s15 = sshll.u32 %s7558_s27, 4  ;;  %s6568_s10 = scalar_lea.hbm %s7631_s21, 32  ;;  %s1056_s15 = int_to_ptr.vmem [resolvable:$true] %s1055_s15 }
  0xb2   : > { %p6569_p5 = scmp.ne.s32.totalorder %s7631_s21, %s6568_s10  ;;  %p6575_p4 = scmp.lt.u32.totalorder %s6568_s10, %s7631_s21 }
  0xb4   : > { %p6571_p6 = pnand %p6569_p5, %p7872_p7 }
  0xb6   : > { %p6572_p8 = pneg %p6571_p6 }
  0xb8   : > { %p6577_p9 = pnand %p6575_p4, %p6572_p8 }
  0xba   : > { %6580 = shalt.err (!%p6577_p9)
}
  0xbb   : > { %s6581_s26 = scalar_lea.vmem %s1056_s15, 32  ;;  %p6589_p10 = scmp.lt.s32.totalorder %s1056_s15, %s1056_s15 }
  0xbc   : > { %p6582_p11 = scmp.ne.s32.totalorder %s1056_s15, %s6581_s26  ;;  %p6590_p12 = scmp.lt.s32.totalorder %s6581_s26, %s6581_s26 }
  0xbe   : > { %p6584_p0 = pnand %p6582_p11, %p7872_p7  ;;  %p6591_p13 = por %p6590_p12, %p6589_p10 }
  0xc0   : > { %p6585_p3 = pneg %p6584_p0 }
  0xc2   : > { %p6592_p1 = pnand %p6591_p13, %p6585_p3 }
  0xc4   : > { %6595 = shalt.err (!%p6592_p1)
}
  0xc5   : > { %s7559_s7 = smov 16   ;;  %s7560_s2 = smov 1  }
  0xc6   : > { %6104 = dma.hbm_to_vmem [thread:$0]  (!%p7860_p2), %s7631_s21, 32, %s1056_s15, [#allocation9], %s7559_s7, %s7559_s7, %s7560_s2  }
  0xc7   : > { %s7561_s10 = smov [#allocation2]   ;;  %s6596_s27 = scalar_lea.hbm %s9275_s5, 256 }
  0xc8   : > { %s989_s4 = sshll.u32 %s7561_s10, 4  ;;  %p6597_p5 = scmp.ne.s32.totalorder %s9275_s5, %s6596_s27  ;;  %s990_s4 = int_to_ptr.vmem [resolvable:$true] %s989_s4 }
  0xc9   : > { %p6603_p4 = scmp.lt.u32.totalorder %s6596_s27, %s9275_s5 }
  0xca   : > { %p6599_p6 = pnand %p6597_p5, %p7872_p7 }
  0xcc   : > { %p6600_p8 = pneg %p6599_p6 }
  0xce   : > { %p6605_p9 = pnand %p6603_p4, %p6600_p8 }
  0xd0   : > { %6608 = shalt.err (!%p6605_p9)
}
  0xd1   : > { %s6609_s26 = scalar_lea.vmem %s990_s4, 256  ;;  %p6617_p10 = scmp.lt.s32.totalorder %s990_s4, %s990_s4 }
  0xd2   : > { %p6610_p11 = scmp.ne.s32.totalorder %s990_s4, %s6609_s26  ;;  %p6618_p12 = scmp.lt.s32.totalorder %s6609_s26, %s6609_s26 }
  0xd4   : > { %p6612_p0 = pnand %p6610_p11, %p7872_p7  ;;  %p6619_p13 = por %p6618_p12, %p6617_p10 }
  0xd6   : > { %p6613_p3 = pneg %p6612_p0 }
  0xd8   : > { %p6620_p1 = pnand %p6619_p13, %p6613_p3 }
  0xda   : > { %6623 = shalt.err (!%p6620_p1)
}
  0xdb   : > { %s9294_s15 = smov 8   ;;  %s9295_s7 = smov 128  }
  0xdc   : > { %6092 = dma.hbm_to_vmem [thread:$0]  (!%p7860_p2), %s9275_s5, 256, %s990_s4, [#allocation3], %s9295_s7, %s9295_s7, %s9294_s15  }
  0xdd   : > { %s7562_s2 = smov [#allocation11]   ;;  %s7563_s27 = smov [#allocation37]  }
  0xde   : > { %s1069_s10 = sshll.u32 %s7562_s2, 4  ;;  %s1080_s9 = sshll.u32 %s7563_s27, 4  ;;  %s1070_s10 = int_to_ptr.vmem [resolvable:$true] %s1069_s10  ;;  %s1081_s9 = int_to_ptr.vmem [resolvable:$true] %s1080_s9 }
  0xdf   : > { %s6624_s26 = scalar_lea.hbm %s7636_s25, 128 }
  0xe0   : > { %p6625_p5 = scmp.ne.s32.totalorder %s7636_s25, %s6624_s26  ;;  %p6631_p4 = scmp.lt.u32.totalorder %s6624_s26, %s7636_s25 }
  0xe2   : > { %p6627_p6 = pnand %p6625_p5, %p7872_p7 }
  0xe4   : > { %p6628_p8 = pneg %p6627_p6 }
  0xe6   : > { %p6633_p9 = pnand %p6631_p4, %p6628_p8 }
  0xe8   : > { %6636 = shalt.err (!%p6633_p9)
}
  0xe9   : > { %s6637_s13 = scalar_lea.vmem %s1070_s10, 128  ;;  %p6645_p10 = scmp.lt.s32.totalorder %s1070_s10, %s1070_s10 }
  0xea   : > { %p6638_p11 = scmp.ne.s32.totalorder %s1070_s10, %s6637_s13  ;;  %p6646_p12 = scmp.lt.s32.totalorder %s6637_s13, %s6637_s13 }
  0xec   : > { %p6640_p0 = pnand %p6638_p11, %p7872_p7  ;;  %p6647_p13 = por %p6646_p12, %p6645_p10 }
  0xee   : > { %p6641_p3 = pneg %p6640_p0 }
  0xf0   : > { %p6648_p1 = pnand %p6647_p13, %p6641_p3 }
  0xf2   : > { %6651 = shalt.err (!%p6648_p1)
}
  0xf3   : > { %6107 = dma.hbm_to_vmem [thread:$0]  (!%p7860_p2), %s7636_s25, 128, %s1070_s10, [#allocation12]  }
  0xf4   : > { %s6652_s4 = scalar_lea.hbm %s9274_s12, 16 }
  0xf5   : > { %p6653_p5 = scmp.ne.s32.totalorder %s9274_s12, %s6652_s4  ;;  %p6659_p4 = scmp.lt.u32.totalorder %s6652_s4, %s9274_s12 }
  0xf7   : > { %p6655_p6 = pnand %p6653_p5, %p7872_p7 }
  0xf9   : > { %p6656_p8 = pneg %p6655_p6 }
  0xfb   : > { %p6661_p9 = pnand %p6659_p4, %p6656_p8 }
  0xfd   : > { %6664 = shalt.err (!%p6661_p9)
}
  0xfe   : > { %s6665_s13 = scalar_lea.vmem %s1081_s9, 16  ;;  %s6672_s15 = scalar_lea.vmem %s1081_s9, 32 }
  0xff   : > { %p6666_p11 = scmp.ne.s32.totalorder %s1081_s9, %s6665_s13  ;;  %p6673_p10 = scmp.lt.s32.totalorder %s1081_s9, %s1081_s9 }
 0x100   : > { %p6674_p12 = scmp.lt.s32.totalorder %s6672_s15, %s6665_s13 }
 0x101   : > { %p6668_p0 = pnand %p6666_p11, %p7872_p7 }
 0x102   : > { %p6675_p13 = por %p6674_p12, %p6673_p10 }
 0x103   : > { %p6669_p3 = pneg %p6668_p0 }
 0x105   : > { %p6676_p1 = pnand %p6675_p13, %p6669_p3 }
 0x107   : > { %6679 = shalt.err (!%p6676_p1)
}
 0x108   : > { %6110 = dma.hbm_to_vmem [thread:$0]  (!%p7860_p2), %s9274_s12, 16, %s1081_s9, [#allocation6]  }
 0x109   : > { %s7564_s7 = smov [#allocation38]   ;;  %s6680_s10 = scalar_lea.hbm %s7766_s20, 16 }
 0x10a   : > { %s1091_s2 = sshll.u32 %s7564_s7, 4  ;;  %p6681_p5 = scmp.ne.s32.totalorder %s7766_s20, %s6680_s10  ;;  %s1092_s2 = int_to_ptr.vmem [resolvable:$true] %s1091_s2 }
 0x10b   : > { %p6687_p4 = scmp.lt.u32.totalorder %s6680_s10, %s7766_s20 }
 0x10c   : > { %p6683_p6 = pnand %p6681_p5, %p7872_p7 }
 0x10e   : > { %p6684_p8 = pneg %p6683_p6 }
 0x110   : > { %p6689_p9 = pnand %p6687_p4, %p6684_p8 }
 0x112   : > { %6692 = shalt.err (!%p6689_p9)
}
 0x113   : > { %s6693_s27 = scalar_lea.vmem %s1092_s2, 16  ;;  %s6700_s26 = scalar_lea.vmem %s1092_s2, 32 }
 0x114   : > { %p6694_p11 = scmp.ne.s32.totalorder %s1092_s2, %s6693_s27  ;;  %p6701_p10 = scmp.lt.s32.totalorder %s1092_s2, %s1092_s2 }
 0x115   : > { %p6702_p12 = scmp.lt.s32.totalorder %s6700_s26, %s6693_s27 }
 0x116   : > { %p6696_p0 = pnand %p6694_p11, %p7872_p7 }
 0x117   : > { %p6703_p13 = por %p6702_p12, %p6701_p10 }
 0x118   : > { %p6697_p3 = pneg %p6696_p0 }
 0x11a   : > { %p6704_p1 = pnand %p6703_p13, %p6697_p3 }
 0x11c   : > { %6707 = shalt.err (!%p6704_p1)
}
 0x11d   : > { %6113 = dma.hbm_to_vmem [thread:$0]  (!%p7860_p2), %s7766_s20, 16, %s1092_s2, [#allocation9]  }
 0x11e   : > { %p9215_p5 = scmp.ge.s32.totalorder %s7516_s18, 2 }
 0x11f   : > { %s1102_s9 = sand.u32 (!%p9215_p5), 1, %s7516_s18   ;;  %s7982_s23 = sand.u32 (!%p9215_p5), 1, %s7504_s11  }
 0x120   : > { %1098 = sbr.rel (%p9215_p5) target bundleno = 861 (0x35d), region = 48  ;;  %s7985_s4 = sshll.u32 (!%p9215_p5), %s7982_s23, 4 }
 0x121   : > { %s7988_s22 = sshll.u32 (!%p9215_p5), %s7512_s16, 8  ;;  %s1106_s15 = scalar_lea.vmem (!%p9215_p5), [#allocation13], %s7985_s4 }
 0x122   : > { %s7992_s13 = scalar_lea.hbm (!%p9215_p5), %s7641_s29, %s7988_s22  ;;  %s1113_s7 = sshll.u32 (!%p9215_p5), %s1106_s15, 4  ;;  %s7995_s7 = int_to_ptr.vmem [resolvable:$true] %s1113_s7 }
 0x123   : > { %s7997_s2 = scalar_lea.sflag (!%p9215_p5), [#allocation3], %s1102_s9  ;;  %s6708_s10 = scalar_lea.hbm (!%p9215_p5), %s7992_s13, 256 }
 0x124   : > { %p6709_p2 = scmp.ne.s32.totalorder (!%p9215_p5), %s7992_s13, %s6708_s10  ;;  %p9296_p7 = scmp.ne.s32.totalorder (!%p9215_p5), %s9282_s28, 0 }
 0x125   : > { %s6712_s27 = scalar_lea.hbm (!%p9215_p5), %s7641_s29, 512  ;;  %p6713_p4 = scmp.lt.u32.totalorder (!%p9215_p5), %s7992_s13, %s7641_s29 }
 0x126   : > { %p6710_p6 = pnand (!%p9215_p5), %p6709_p2, %p9296_p7  ;;  %p6714_p9 = scmp.lt.u32.totalorder (!%p9215_p5), %s6712_s27, %s6708_s10 }
 0x127   : > { %p6716_p0 = scmp.lt.u32.totalorder %s6708_s10, %s7992_s13 }
 0x128   : > { %p6711_p8 = pneg %p6710_p6  ;;  %p6715_p11 = por %p6714_p9, %p6713_p4 }
 0x12a   : > { %p6717_p3 = por %p6716_p0, %p6715_p11 }
 0x12c   : > { %p6718_p10 = pnand %p6717_p3, %p6711_p8 }
 0x12e   : > { %6721 = shalt.err (!%p6718_p10)
}
 0x12f   : > { %s6722_s26 = scalar_lea.vmem %s7995_s7, 256  ;;  %s7565_s9 = smov [#allocation13]  }
 0x130   : > { %p6723_p12 = scmp.ne.s32.totalorder %s7995_s7, %s6722_s26  ;;  %s6726_s15 = sshll.u32 %s7565_s9, 4  ;;  %s6727_s15 = int_to_ptr.vmem [resolvable:$false] %s6726_s15 }
 0x131   : > { %s6728_s5 = scalar_lea.vmem %s6727_s15, 512  ;;  %p6729_p2 = scmp.lt.s32.totalorder %s7995_s7, %s6727_s15 }
 0x132   : > { %p6724_p13 = pnand %p6723_p12, %p9296_p7  ;;  %p6730_p6 = scmp.lt.s32.totalorder %s6728_s5, %s6722_s26 }
 0x134   : > { %p6725_p1 = pneg %p6724_p13  ;;  %p6731_p4 = por %p6730_p6, %p6729_p2 }
 0x136   : > { %p6732_p9 = pnand %p6731_p4, %p6725_p1 }
 0x138   : > { %6735 = shalt.err (!%p6732_p9)
}
 0x139   : > { %s9213_s10 = smov 64   ;;  %s9216_s27 = smov 4  }
 0x13a   : > { %6019 = dma.hbm_to_vmem [thread:$0]  (%p9296_p7), %s7992_s13, 256, %s7995_s7, %s7997_s2, %s9213_s10, %s9213_s10, %s9216_s27  }
 0x13b   : > { %s8021_s5 = sshll.u32 %s7512_s16, 4  ;;  %s1126_s26 = scalar_lea.vmem [#allocation14], %s7982_s23 }
 0x13c   : > { %s1133_s9 = sshll.u32 %s1126_s26, 4  ;;  %s1131_s15 = scalar_lea.hbm %s9272_s3, %s8021_s5  ;;  %s1134_s9 = int_to_ptr.vmem [resolvable:$true] %s1133_s9 }
 0x13d   : > { %s6736_s12 = scalar_lea.hbm %s1131_s15, 16  ;;  %s6740_s17 = scalar_lea.hbm %s9272_s3, 32 }
 0x13e   : > { %p6737_p8 = scmp.ne.s32.totalorder %s1131_s15, %s6736_s12  ;;  %p6741_p3 = scmp.lt.u32.totalorder %s1131_s15, %s9272_s3 }
 0x13f   : > { %p6742_p10 = scmp.lt.u32.totalorder %s6740_s17, %s6736_s12  ;;  %p6744_p13 = scmp.lt.u32.totalorder %s6736_s12, %s1131_s15 }
 0x140   : > { %p6738_p11 = pnand %p6737_p8, %p9296_p7 }
 0x141   : > { %p6743_p12 = por %p6742_p10, %p6741_p3 }
 0x142   : > { %p6739_p0 = pneg %p6738_p11 }
 0x143   : > { %p6745_p1 = por %p6744_p13, %p6743_p12 }
 0x145   : > { %p6746_p2 = pnand %p6745_p1, %p6739_p0 }
 0x147   : > { %6749 = shalt.err (!%p6746_p2)
}
 0x148   : > { %s6750_s13 = scalar_lea.vmem %s1134_s9, 16  ;;  %s7568_s7 = smov [#allocation14]  }
 0x149   : > { %p6751_p6 = scmp.ne.s32.totalorder %s1134_s9, %s6750_s13  ;;  %s6754_s26 = sshll.u32 %s7568_s7, 4  ;;  %s6755_s26 = int_to_ptr.vmem [resolvable:$false] %s6754_s26 }
 0x14a   : > { %s6756_s10 = scalar_lea.vmem %s6755_s26, 32  ;;  %p6757_p8 = scmp.lt.s32.totalorder %s1134_s9, %s6755_s26 }
 0x14b   : > { %p6752_p4 = pnand %p6751_p6, %p9296_p7  ;;  %p6758_p11 = scmp.lt.s32.totalorder %s6756_s10, %s6750_s13 }
 0x14d   : > { %p6753_p9 = pneg %p6752_p4  ;;  %p6759_p5 = por %p6758_p11, %p6757_p8 }
 0x14f   : > { %p6760_p3 = pnand %p6759_p5, %p6753_p9 }
 0x151   : > { %6763 = shalt.err (!%p6760_p3)
}
 0x152   : > { %6020 = dma.hbm_to_vmem [thread:$0]  (%p9296_p7), %s1131_s15, 16, %s1134_s9, %s7997_s2  }
 0x153   : > { %s8037_s17 = scalar_lea.hbm %s9271_s8, %s7988_s22  ;;  %s1144_s12 = scalar_lea.vmem [#allocation15], %s7985_s4 }
 0x154   : > { %s1151_s10 = sshll.u32 %s1144_s12, 4  ;;  %s8044_s13 = scalar_lea.hbm %s9270_s14, %s8021_s5  ;;  %s8040_s10 = int_to_ptr.vmem [resolvable:$true] %s1151_s10 }
 0x155   : > { %s6764_s7 = scalar_lea.hbm %s8037_s17, 256  ;;  %s6768_s26 = scalar_lea.hbm %s9271_s8, 512 }
 0x156   : > { %p6765_p5 = scmp.ne.s32.totalorder %s8037_s17, %s6764_s7  ;;  %p6769_p12 = scmp.lt.u32.totalorder %s8037_s17, %s9271_s8 }
 0x157   : > { %p6770_p13 = scmp.lt.u32.totalorder %s6768_s26, %s6764_s7  ;;  %p6772_p2 = scmp.lt.u32.totalorder %s6764_s7, %s8037_s17 }
 0x158   : > { %p6766_p0 = pnand %p6765_p5, %p9296_p7 }
 0x159   : > { %p6771_p1 = por %p6770_p13, %p6769_p12 }
 0x15a   : > { %p6767_p10 = pneg %p6766_p0 }
 0x15b   : > { %p6773_p6 = por %p6772_p2, %p6771_p1 }
 0x15d   : > { %p6774_p4 = pnand %p6773_p6, %p6767_p10 }
 0x15f   : > { %6777 = shalt.err (!%p6774_p4)
}
 0x160   : > { %s6778_s9 = scalar_lea.vmem %s8040_s10, 256  ;;  %s7569_s15 = smov [#allocation15]  }
 0x161   : > { %p6779_p9 = scmp.ne.s32.totalorder %s8040_s10, %s6778_s9  ;;  %s6782_s12 = sshll.u32 %s7569_s15, 4  ;;  %s6783_s12 = int_to_ptr.vmem [resolvable:$false] %s6782_s12 }
 0x162   : > { %s6784_s27 = scalar_lea.vmem %s6783_s12, 512  ;;  %p6785_p3 = scmp.lt.s32.totalorder %s8040_s10, %s6783_s12 }
 0x163   : > { %p6780_p8 = pnand %p6779_p9, %p9296_p7  ;;  %p6786_p5 = scmp.lt.s32.totalorder %s6784_s27, %s6778_s9 }
 0x165   : > { %p6781_p11 = pneg %p6780_p8  ;;  %p6787_p0 = por %p6786_p5, %p6785_p3 }
 0x167   : > { %p6788_p12 = pnand %p6787_p0, %p6781_p11 }
 0x169   : > { %6791 = shalt.err (!%p6788_p12)
}
 0x16a   : > { %s9297_s7 = smov 4   ;;  %s9298_s26 = smov 64  }
 0x16b   : > { %6021 = dma.hbm_to_vmem [thread:$0]  (%p9296_p7), %s8037_s17, 256, %s8040_s10, %s7997_s2, %s9298_s26, %s9298_s26, %s9297_s7  }
 0x16c   : > { %s1164_s27 = scalar_lea.vmem [#allocation16], %s7982_s23  ;;  %s8070_s15 = scalar_lea.hbm %s9269_s19, %s7988_s22 }
 0x16d   : > { %s1171_s9 = sshll.u32 %s1164_s27, 4  ;;  %s6792_s12 = scalar_lea.hbm %s8044_s13, 16  ;;  %s1172_s9 = int_to_ptr.vmem [resolvable:$true] %s1171_s9 }
 0x16e   : > { %p6793_p10 = scmp.ne.s32.totalorder %s8044_s13, %s6792_s12  ;;  %s6796_s3 = scalar_lea.hbm %s9270_s14, 32 }
 0x16f   : > { %p6797_p2 = scmp.lt.u32.totalorder %s8044_s13, %s9270_s14  ;;  %p6798_p6 = scmp.lt.u32.totalorder %s6796_s3, %s6792_s12 }
 0x170   : > { %p6794_p13 = pnand %p6793_p10, %p9296_p7  ;;  %p6800_p9 = scmp.lt.u32.totalorder %s6792_s12, %s8044_s13 }
 0x171   : > { %p6799_p4 = por %p6798_p6, %p6797_p2 }
 0x172   : > { %p6795_p1 = pneg %p6794_p13 }
 0x173   : > { %p6801_p8 = por %p6800_p9, %p6799_p4 }
 0x175   : > { %p6802_p11 = pnand %p6801_p8, %p6795_p1 }
 0x177   : > { %6805 = shalt.err (!%p6802_p11)
}
 0x178   : > { %s6806_s8 = scalar_lea.vmem %s1172_s9, 16  ;;  %s7570_s17 = smov [#allocation16]  }
 0x179   : > { %p6807_p3 = scmp.ne.s32.totalorder %s1172_s9, %s6806_s8  ;;  %s6810_s10 = sshll.u32 %s7570_s17, 4  ;;  %s6811_s10 = int_to_ptr.vmem [resolvable:$false] %s6810_s10 }
 0x17a   : > { %s6812_s27 = scalar_lea.vmem %s6811_s10, 32  ;;  %p6813_p12 = scmp.lt.s32.totalorder %s1172_s9, %s6811_s10 }
 0x17b   : > { %p6808_p5 = pnand %p6807_p3, %p9296_p7  ;;  %p6814_p10 = scmp.lt.s32.totalorder %s6812_s27, %s6806_s8 }
 0x17d   : > { %p6809_p0 = pneg %p6808_p5  ;;  %p6815_p13 = por %p6814_p10, %p6813_p12 }
 0x17f   : > { %p6816_p2 = pnand %p6815_p13, %p6809_p0 }
 0x181   : > { %6819 = shalt.err (!%p6816_p2)
}
 0x182   : > { %6022 = dma.hbm_to_vmem [thread:$0]  (%p9296_p7), %s8044_s13, 16, %s1172_s9, %s7997_s2  }
 0x183   : > { %s1182_s3 = scalar_lea.vmem [#allocation17], %s7985_s4  ;;  %s8091_s12 = scalar_lea.hbm %s7666_s24, %s8021_s5 }
 0x184   : > { %s1189_s8 = sshll.u32 %s1182_s3, 4  ;;  %s6820_s17 = scalar_lea.hbm %s8070_s15, 256  ;;  %s8087_s8 = int_to_ptr.vmem [resolvable:$true] %s1189_s8 }
 0x185   : > { %p6821_p1 = scmp.ne.s32.totalorder %s8070_s15, %s6820_s17  ;;  %s6824_s10 = scalar_lea.hbm %s9269_s19, 512 }
 0x186   : > { %p6825_p9 = scmp.lt.u32.totalorder %s8070_s15, %s9269_s19  ;;  %p6826_p8 = scmp.lt.u32.totalorder %s6824_s10, %s6820_s17 }
 0x187   : > { %p6822_p6 = pnand %p6821_p1, %p9296_p7  ;;  %p6828_p3 = scmp.lt.u32.totalorder %s6820_s17, %s8070_s15 }
 0x188   : > { %p6827_p11 = por %p6826_p8, %p6825_p9 }
 0x189   : > { %p6823_p4 = pneg %p6822_p6 }
 0x18a   : > { %p6829_p5 = por %p6828_p3, %p6827_p11 }
 0x18c   : > { %p6830_p0 = pnand %p6829_p5, %p6823_p4 }
 0x18e   : > { %6833 = shalt.err (!%p6830_p0)
}
 0x18f   : > { %s6834_s13 = scalar_lea.vmem %s8087_s8, 256  ;;  %s7571_s9 = smov [#allocation17]  }
 0x190   : > { %p6835_p12 = scmp.ne.s32.totalorder %s8087_s8, %s6834_s13  ;;  %s6838_s27 = sshll.u32 %s7571_s9, 4  ;;  %s6839_s27 = int_to_ptr.vmem [resolvable:$false] %s6838_s27 }
 0x191   : > { %s6840_s3 = scalar_lea.vmem %s6839_s27, 512  ;;  %p6841_p2 = scmp.lt.s32.totalorder %s8087_s8, %s6839_s27 }
 0x192   : > { %p6836_p10 = pnand %p6835_p12, %p9296_p7  ;;  %p6842_p1 = scmp.lt.s32.totalorder %s6840_s3, %s6834_s13 }
 0x194   : > { %p6837_p13 = pneg %p6836_p10  ;;  %p6843_p6 = por %p6842_p1, %p6841_p2 }
 0x196   : > { %p6844_p9 = pnand %p6843_p6, %p6837_p13 }
 0x198   : > { %6847 = shalt.err (!%p6844_p9)
}
 0x199   : > { %6023 = dma.hbm_to_vmem [thread:$0]  (%p9296_p7), %s8070_s15, 256, %s8087_s8, %s7997_s2, %s9298_s26, %s9298_s26, %s9297_s7  }
 0x19a   : > { %s1202_s17 = scalar_lea.vmem [#allocation18], %s7982_s23  ;;  %s8117_s13 = scalar_lea.hbm %s7671_s30, %s7988_s22 }
 0x19b   : > { %s1209_s10 = sshll.u32 %s1202_s17, 4  ;;  %s6848_s9 = scalar_lea.hbm %s8091_s12, 16  ;;  %s1210_s10 = int_to_ptr.vmem [resolvable:$true] %s1209_s10 }
 0x19c   : > { %p6849_p4 = scmp.ne.s32.totalorder %s8091_s12, %s6848_s9  ;;  %s6852_s27 = scalar_lea.hbm %s7666_s24, 32 }
 0x19d   : > { %p6853_p3 = scmp.lt.u32.totalorder %s8091_s12, %s7666_s24  ;;  %p6854_p5 = scmp.lt.u32.totalorder %s6852_s27, %s6848_s9 }
 0x19e   : > { %p6850_p8 = pnand %p6849_p4, %p9296_p7  ;;  %p6856_p12 = scmp.lt.u32.totalorder %s6848_s9, %s8091_s12 }
 0x19f   : > { %p6855_p0 = por %p6854_p5, %p6853_p3 }
 0x1a0   : > { %p6851_p11 = pneg %p6850_p8 }
 0x1a1   : > { %p6857_p10 = por %p6856_p12, %p6855_p0 }
 0x1a3   : > { %p6858_p13 = pnand %p6857_p10, %p6851_p11 }
 0x1a5   : > { %6861 = shalt.err (!%p6858_p13)
}
 0x1a6   : > { %s6862_s3 = scalar_lea.vmem %s1210_s10, 16  ;;  %s7572_s15 = smov [#allocation18]  }
 0x1a7   : > { %p6863_p2 = scmp.ne.s32.totalorder %s1210_s10, %s6862_s3  ;;  %s6866_s8 = sshll.u32 %s7572_s15, 4  ;;  %s6867_s8 = int_to_ptr.vmem [resolvable:$false] %s6866_s8 }
 0x1a8   : > { %s6868_s17 = scalar_lea.vmem %s6867_s8, 32  ;;  %p6869_p9 = scmp.lt.s32.totalorder %s1210_s10, %s6867_s8 }
 0x1a9   : > { %p6864_p1 = pnand %p6863_p2, %p9296_p7  ;;  %p6870_p4 = scmp.lt.s32.totalorder %s6868_s17, %s6862_s3 }
 0x1ab   : > { %p6865_p6 = pneg %p6864_p1  ;;  %p6871_p8 = por %p6870_p4, %p6869_p9 }
 0x1ad   : > { %p6872_p3 = pnand %p6871_p8, %p6865_p6 }
 0x1af   : > { %6875 = shalt.err (!%p6872_p3)
}
 0x1b0   : > { %6024 = dma.hbm_to_vmem [thread:$0]  (%p9296_p7), %s8091_s12, 16, %s1210_s10, %s7997_s2  }
 0x1b1   : > { %s1220_s9 = scalar_lea.vmem [#allocation19], %s7985_s4  ;;  %s8138_s3 = scalar_lea.hbm %s9268_s6, %s8021_s5 }
 0x1b2   : > { %s1227_s27 = sshll.u32 %s1220_s9, 4  ;;  %s6876_s15 = scalar_lea.hbm %s8117_s13, 256  ;;  %s8134_s27 = int_to_ptr.vmem [resolvable:$true] %s1227_s27 }
 0x1b3   : > { %p6877_p11 = scmp.ne.s32.totalorder %s8117_s13, %s6876_s15  ;;  %s6880_s8 = scalar_lea.hbm %s7671_s30, 512 }
 0x1b4   : > { %p6881_p12 = scmp.lt.u32.totalorder %s8117_s13, %s7671_s30  ;;  %p6882_p10 = scmp.lt.u32.totalorder %s6880_s8, %s6876_s15 }
 0x1b5   : > { %p6878_p5 = pnand %p6877_p11, %p9296_p7  ;;  %p6884_p2 = scmp.lt.u32.totalorder %s6876_s15, %s8117_s13 }
 0x1b6   : > { %p6883_p13 = por %p6882_p10, %p6881_p12 }
 0x1b7   : > { %p6879_p0 = pneg %p6878_p5 }
 0x1b8   : > { %p6885_p1 = por %p6884_p2, %p6883_p13 }
 0x1ba   : > { %p6886_p6 = pnand %p6885_p1, %p6879_p0 }
 0x1bc   : > { %6889 = shalt.err (!%p6886_p6)
}
 0x1bd   : > { %s6890_s12 = scalar_lea.vmem %s8134_s27, 256  ;;  %s7573_s10 = smov [#allocation19]  }
 0x1be   : > { %p6891_p9 = scmp.ne.s32.totalorder %s8134_s27, %s6890_s12  ;;  %s6894_s17 = sshll.u32 %s7573_s10, 4  ;;  %s6895_s17 = int_to_ptr.vmem [resolvable:$false] %s6894_s17 }
 0x1bf   : > { %s6896_s9 = scalar_lea.vmem %s6895_s17, 512  ;;  %p6897_p3 = scmp.lt.s32.totalorder %s8134_s27, %s6895_s17 }
 0x1c0   : > { %p6892_p4 = pnand %p6891_p9, %p9296_p7  ;;  %p6898_p11 = scmp.lt.s32.totalorder %s6896_s9, %s6890_s12 }
 0x1c2   : > { %p6893_p8 = pneg %p6892_p4  ;;  %p6899_p5 = por %p6898_p11, %p6897_p3 }
 0x1c4   : > { %p6900_p12 = pnand %p6899_p5, %p6893_p8 }
 0x1c6   : > { %6903 = shalt.err (!%p6900_p12)
}
 0x1c7   : > { %s9299_s15 = sld [smem:[#allocation60_spill]]  ;;  %s1240_s12 = scalar_lea.vmem [#allocation20], %s7982_s23 }
 0x1c8   : > { %6025 = dma.hbm_to_vmem [thread:$0]  (%p9296_p7), %s8117_s13, 256, %s8134_s27, %s7997_s2, %s9298_s26, %s9298_s26, %s9297_s7  }
 0x1c9   : > { %s1247_s10 = sshll.u32 %s1240_s12, 4  ;;  %s6904_s9 = scalar_lea.hbm %s8138_s3, 16  ;;  %s1248_s10 = int_to_ptr.vmem [resolvable:$true] %s1247_s10 }
 0x1ca   : > { %p6905_p0 = scmp.ne.s32.totalorder %s8138_s3, %s6904_s9  ;;  %s6908_s14 = scalar_lea.hbm %s9268_s6, 32 }
 0x1cb   : > { %p6909_p2 = scmp.lt.u32.totalorder %s8138_s3, %s9268_s6  ;;  %p6910_p1 = scmp.lt.u32.totalorder %s6908_s14, %s6904_s9 }
 0x1cc   : > { %p6906_p10 = pnand %p6905_p0, %p9296_p7  ;;  %p6912_p9 = scmp.lt.u32.totalorder %s6904_s9, %s8138_s3 }
 0x1cd   : > { %s9300_s8 = smov %s9299_s15  ;;  %s8164_s17 = scalar_lea.hbm %s9299_s15, %s7988_s22 }
 0x1ce   : > { %p6907_p13 = pneg %p6906_p10  ;;  %p6911_p6 = por %p6910_p1, %p6909_p2 }
 0x1d0   : > { %p6913_p4 = por %p6912_p9, %p6911_p6 }
 0x1d2   : > { %p6914_p8 = pnand %p6913_p4, %p6907_p13 }
 0x1d4   : > { %6917 = shalt.err (!%p6914_p8)
}
 0x1d5   : > { %s6918_s19 = scalar_lea.vmem %s1248_s10, 16  ;;  %s7574_s13 = smov [#allocation20]  }
 0x1d6   : > { %p6919_p3 = scmp.ne.s32.totalorder %s1248_s10, %s6918_s19  ;;  %s6922_s27 = sshll.u32 %s7574_s13, 4  ;;  %s6923_s27 = int_to_ptr.vmem [resolvable:$false] %s6922_s27 }
 0x1d7   : > { %s6924_s15 = scalar_lea.vmem %s6923_s27, 32  ;;  %p6925_p12 = scmp.lt.s32.totalorder %s1248_s10, %s6923_s27 }
 0x1d8   : > { %p6920_p11 = pnand %p6919_p3, %p9296_p7  ;;  %p6926_p0 = scmp.lt.s32.totalorder %s6924_s15, %s6918_s19 }
 0x1da   : > { %p6921_p5 = pneg %p6920_p11  ;;  %p6927_p10 = por %p6926_p0, %p6925_p12 }
 0x1dc   : > { %p6928_p1 = pnand %p6927_p10, %p6921_p5 }
 0x1de   : > { %6931 = shalt.err (!%p6928_p1)
}
 0x1df   : > { %s9301_s14 = sld [smem:[#allocation61_spill]]  ;;  %s1258_s12 = scalar_lea.vmem [#allocation21], %s7985_s4 }
 0x1e0   : > { %6026 = dma.hbm_to_vmem [thread:$0]  (%p9296_p7), %s8138_s3, 16, %s1248_s10, %s7997_s2  }
 0x1e1   : > { %s1265_s19 = sshll.u32 %s1258_s12, 4  ;;  %s6932_s13 = scalar_lea.hbm %s8164_s17, 256  ;;  %s8181_s19 = int_to_ptr.vmem [resolvable:$true] %s1265_s19 }
 0x1e2   : > { %p6933_p13 = scmp.ne.s32.totalorder %s8164_s17, %s6932_s13  ;;  %s6936_s27 = scalar_lea.hbm %s9300_s8, 512 }
 0x1e3   : > { %p6937_p9 = scmp.lt.u32.totalorder %s8164_s17, %s9300_s8  ;;  %p6938_p4 = scmp.lt.u32.totalorder %s6936_s27, %s6932_s13 }
 0x1e4   : > { %p6934_p2 = pnand %p6933_p13, %p9296_p7  ;;  %p6940_p3 = scmp.lt.u32.totalorder %s6932_s13, %s8164_s17 }
 0x1e5   : > { %s8185_s9 = scalar_lea.hbm %s9301_s14, %s8021_s5  ;;  %p6939_p8 = por %p6938_p4, %p6937_p9 }
 0x1e6   : > { %p6935_p6 = pneg %p6934_p2 }
 0x1e7   : > { %p6941_p11 = por %p6940_p3, %p6939_p8 }
 0x1e9   : > { %p6942_p5 = pnand %p6941_p11, %p6935_p6 }
 0x1eb   : > { %6945 = shalt.err (!%p6942_p5)
}
 0x1ec   : > { %s6946_s3 = scalar_lea.vmem %s8181_s19, 256  ;;  %s7575_s10 = smov [#allocation21]  }
 0x1ed   : > { %p6947_p12 = scmp.ne.s32.totalorder %s8181_s19, %s6946_s3  ;;  %s6950_s15 = sshll.u32 %s7575_s10, 4  ;;  %s6951_s15 = int_to_ptr.vmem [resolvable:$false] %s6950_s15 }
 0x1ee   : > { %s6952_s12 = scalar_lea.vmem %s6951_s15, 512  ;;  %p6953_p1 = scmp.lt.s32.totalorder %s8181_s19, %s6951_s15 }
 0x1ef   : > { %p6948_p0 = pnand %p6947_p12, %p9296_p7  ;;  %p6954_p13 = scmp.lt.s32.totalorder %s6952_s12, %s6946_s3 }
 0x1f1   : > { %p6949_p10 = pneg %p6948_p0  ;;  %p6955_p2 = por %p6954_p13, %p6953_p1 }
 0x1f3   : > { %p6956_p9 = pnand %p6955_p2, %p6949_p10 }
 0x1f5   : > { %6959 = shalt.err (!%p6956_p9)
}
 0x1f6   : > { %s9302_s13 = sld [smem:[#allocation62_spill]]  ;;  %s1278_s27 = scalar_lea.vmem [#allocation22], %s7982_s23 }
 0x1f7   : > { %6027 = dma.hbm_to_vmem [thread:$0]  (%p9296_p7), %s8164_s17, 256, %s8181_s19, %s7997_s2, %s9298_s26, %s9298_s26, %s9297_s7  }
 0x1f8   : > { %s1285_s3 = sshll.u32 %s1278_s27, 4  ;;  %s6960_s15 = scalar_lea.hbm %s8185_s9, 16  ;;  %s1286_s3 = int_to_ptr.vmem [resolvable:$true] %s1285_s3 }
 0x1f9   : > { %p6961_p6 = scmp.ne.s32.totalorder %s8185_s9, %s6960_s15  ;;  %s6964_s12 = scalar_lea.hbm %s9301_s14, 32 }
 0x1fa   : > { %p6965_p3 = scmp.lt.u32.totalorder %s8185_s9, %s9301_s14  ;;  %p6966_p11 = scmp.lt.u32.totalorder %s6964_s12, %s6960_s15 }
 0x1fb   : > { %p6962_p4 = pnand %p6961_p6, %p9296_p7  ;;  %p6968_p12 = scmp.lt.u32.totalorder %s6960_s15, %s8185_s9 }
 0x1fc   : > { %s8211_s10 = scalar_lea.hbm %s9302_s13, %s7988_s22  ;;  %p6967_p5 = por %p6966_p11, %p6965_p3 }
 0x1fd   : > { %p6963_p8 = pneg %p6962_p4 }
 0x1fe   : > { %p6969_p0 = por %p6968_p12, %p6967_p5 }
 0x200   : > { %p6970_p10 = pnand %p6969_p0, %p6963_p8 }
 0x202   : > { %6973 = shalt.err (!%p6970_p10)
}
 0x203   : > { %s6974_s6 = scalar_lea.vmem %s1286_s3, 16  ;;  %s7576_s17 = smov [#allocation22]  }
 0x204   : > { %p6975_p1 = scmp.ne.s32.totalorder %s1286_s3, %s6974_s6  ;;  %s6978_s19 = sshll.u32 %s7576_s17, 4  ;;  %s6979_s19 = int_to_ptr.vmem [resolvable:$false] %s6978_s19 }
 0x205   : > { %s6980_s27 = scalar_lea.vmem %s6979_s19, 32  ;;  %p6981_p9 = scmp.lt.s32.totalorder %s1286_s3, %s6979_s19 }
 0x206   : > { %p6976_p13 = pnand %p6975_p1, %p9296_p7  ;;  %p6982_p6 = scmp.lt.s32.totalorder %s6980_s27, %s6974_s6 }
 0x208   : > { %p6977_p2 = pneg %p6976_p13  ;;  %p6983_p4 = por %p6982_p6, %p6981_p9 }
 0x20a   : > { %p6984_p3 = pnand %p6983_p4, %p6977_p2 }
 0x20c   : > { %6987 = shalt.err (!%p6984_p3)
}
 0x20d   : > { %s9303_s15 = sld [smem:[#allocation63_spill]]  ;;  %s1296_s17 = scalar_lea.vmem [#allocation23], %s7985_s4 }
 0x20e   : > { %6028 = dma.hbm_to_vmem [thread:$0]  (%p9296_p7), %s8185_s9, 16, %s1286_s3, %s7997_s2  }
 0x20f   : > { %s1303_s6 = sshll.u32 %s1296_s17, 4  ;;  %s6988_s27 = scalar_lea.hbm %s8211_s10, 256  ;;  %s8228_s6 = int_to_ptr.vmem [resolvable:$true] %s1303_s6 }
 0x210   : > { %p6989_p8 = scmp.ne.s32.totalorder %s8211_s10, %s6988_s27  ;;  %s6992_s8 = scalar_lea.hbm %s9302_s13, 512 }
 0x211   : > { %p6993_p12 = scmp.lt.u32.totalorder %s8211_s10, %s9302_s13  ;;  %p6994_p0 = scmp.lt.u32.totalorder %s6992_s8, %s6988_s27 }
 0x212   : > { %p6990_p11 = pnand %p6989_p8, %p9296_p7  ;;  %p6996_p1 = scmp.lt.u32.totalorder %s6988_s27, %s8211_s10 }
 0x213   : > { %s9304_s12 = smov %s9303_s15  ;;  %s8232_s19 = scalar_lea.hbm %s9303_s15, %s8021_s5 }
 0x214   : > { %p6991_p5 = pneg %p6990_p11  ;;  %p6995_p10 = por %p6994_p0, %p6993_p12 }
 0x216   : > { %p6997_p13 = por %p6996_p1, %p6995_p10 }
 0x218   : > { %p6998_p2 = pnand %p6997_p13, %p6991_p5 }
 0x21a   : > { %7001 = shalt.err (!%p6998_p2)
}
 0x21b   : > { %s7002_s9 = scalar_lea.vmem %s8228_s6, 256  ;;  %s7577_s3 = smov [#allocation23]  }
 0x21c   : > { %p7003_p9 = scmp.ne.s32.totalorder %s8228_s6, %s7002_s9  ;;  %s7006_s15 = sshll.u32 %s7577_s3, 4  ;;  %s7007_s15 = int_to_ptr.vmem [resolvable:$false] %s7006_s15 }
 0x21d   : > { %s7008_s17 = scalar_lea.vmem %s7007_s15, 512  ;;  %p7009_p3 = scmp.lt.s32.totalorder %s8228_s6, %s7007_s15 }
 0x21e   : > { %p7004_p6 = pnand %p7003_p9, %p9296_p7  ;;  %p7010_p8 = scmp.lt.s32.totalorder %s7008_s17, %s7002_s9 }
 0x220   : > { %p7005_p4 = pneg %p7004_p6  ;;  %p7011_p11 = por %p7010_p8, %p7009_p3 }
 0x222   : > { %p7012_p12 = pnand %p7011_p11, %p7005_p4 }
 0x224   : > { %7015 = shalt.err (!%p7012_p12)
}
 0x225   : > { %s9305_s8 = sld [smem:[#allocation64_spill]]  ;;  %s1316_s27 = scalar_lea.vmem [#allocation24], %s7982_s23 }
 0x226   : > { %6029 = dma.hbm_to_vmem [thread:$0]  (%p9296_p7), %s8211_s10, 256, %s8228_s6, %s7997_s2, %s9298_s26, %s9298_s26, %s9297_s7  }
 0x227   : > { %s1323_s9 = sshll.u32 %s1316_s27, 4  ;;  %s7016_s15 = scalar_lea.hbm %s8232_s19, 16  ;;  %s1324_s9 = int_to_ptr.vmem [resolvable:$true] %s1323_s9 }
 0x228   : > { %p7017_p5 = scmp.ne.s32.totalorder %s8232_s19, %s7016_s15  ;;  %s7020_s17 = scalar_lea.hbm %s9304_s12, 32 }
 0x229   : > { %p7021_p1 = scmp.lt.u32.totalorder %s8232_s19, %s9304_s12  ;;  %p7022_p13 = scmp.lt.u32.totalorder %s7020_s17, %s7016_s15 }
 0x22a   : > { %p7018_p0 = pnand %p7017_p5, %p9296_p7  ;;  %p7024_p9 = scmp.lt.u32.totalorder %s7016_s15, %s8232_s19 }
 0x22b   : > { %s8258_s3 = scalar_lea.hbm %s9305_s8, %s7988_s22  ;;  %p7023_p2 = por %p7022_p13, %p7021_p1 }
 0x22c   : > { %p7019_p10 = pneg %p7018_p0 }
 0x22d   : > { %p7025_p6 = por %p7024_p9, %p7023_p2 }
 0x22f   : > { %p7026_p4 = pnand %p7025_p6, %p7019_p10 }
 0x231   : > { %7029 = shalt.err (!%p7026_p4)
}
 0x232   : > { %s7030_s13 = scalar_lea.vmem %s1324_s9, 16  ;;  %s7578_s10 = smov [#allocation24]  }
 0x233   : > { %p7031_p3 = scmp.ne.s32.totalorder %s1324_s9, %s7030_s13  ;;  %s7034_s6 = sshll.u32 %s7578_s10, 4  ;;  %s7035_s6 = int_to_ptr.vmem [resolvable:$false] %s7034_s6 }
 0x234   : > { %s7036_s27 = scalar_lea.vmem %s7035_s6, 32  ;;  %p7037_p12 = scmp.lt.s32.totalorder %s1324_s9, %s7035_s6 }
 0x235   : > { %p7032_p8 = pnand %p7031_p3, %p9296_p7  ;;  %p7038_p5 = scmp.lt.s32.totalorder %s7036_s27, %s7030_s13 }
 0x237   : > { %p7033_p11 = pneg %p7032_p8  ;;  %p7039_p0 = por %p7038_p5, %p7037_p12 }
 0x239   : > { %p7040_p1 = pnand %p7039_p0, %p7033_p11 }
 0x23b   : > { %7043 = shalt.err (!%p7040_p1)
}
 0x23c   : > { %s9306_s15 = sld [smem:[#allocation65_spill]]  ;;  %s1334_s10 = scalar_lea.vmem [#allocation25], %s7985_s4 }
 0x23d   : > { %6030 = dma.hbm_to_vmem [thread:$0]  (%p9296_p7), %s8232_s19, 16, %s1324_s9, %s7997_s2  }
 0x23e   : > { %s1341_s13 = sshll.u32 %s1334_s10, 4  ;;  %s7044_s27 = scalar_lea.hbm %s8258_s3, 256  ;;  %s8275_s13 = int_to_ptr.vmem [resolvable:$true] %s1341_s13 }
 0x23f   : > { %p7045_p10 = scmp.ne.s32.totalorder %s8258_s3, %s7044_s27  ;;  %s7048_s12 = scalar_lea.hbm %s9305_s8, 512 }
 0x240   : > { %p7049_p9 = scmp.lt.u32.totalorder %s8258_s3, %s9305_s8  ;;  %p7050_p6 = scmp.lt.u32.totalorder %s7048_s12, %s7044_s27 }
 0x241   : > { %p7046_p13 = pnand %p7045_p10, %p9296_p7  ;;  %p7052_p3 = scmp.lt.u32.totalorder %s7044_s27, %s8258_s3 }
 0x242   : > { %s9307_s17 = smov %s9306_s15  ;;  %s8279_s6 = scalar_lea.hbm %s9306_s15, %s8021_s5 }
 0x243   : > { %p7047_p2 = pneg %p7046_p13  ;;  %p7051_p4 = por %p7050_p6, %p7049_p9 }
 0x245   : > { %p7053_p8 = por %p7052_p3, %p7051_p4 }
 0x247   : > { %p7054_p11 = pnand %p7053_p8, %p7047_p2 }
 0x249   : > { %7057 = shalt.err (!%p7054_p11)
}
 0x24a   : > { %s7058_s19 = scalar_lea.vmem %s8275_s13, 256  ;;  %s7579_s9 = smov [#allocation25]  }
 0x24b   : > { %p7059_p12 = scmp.ne.s32.totalorder %s8275_s13, %s7058_s19  ;;  %s7062_s15 = sshll.u32 %s7579_s9, 4  ;;  %s7063_s15 = int_to_ptr.vmem [resolvable:$false] %s7062_s15 }
 0x24c   : > { %s7064_s10 = scalar_lea.vmem %s7063_s15, 512  ;;  %p7065_p1 = scmp.lt.s32.totalorder %s8275_s13, %s7063_s15 }
 0x24d   : > { %p7060_p5 = pnand %p7059_p12, %p9296_p7  ;;  %p7066_p10 = scmp.lt.s32.totalorder %s7064_s10, %s7058_s19 }
 0x24f   : > { %p7061_p0 = pneg %p7060_p5  ;;  %p7067_p13 = por %p7066_p10, %p7065_p1 }
 0x251   : > { %p7068_p9 = pnand %p7067_p13, %p7061_p0 }
 0x253   : > { %7071 = shalt.err (!%p7068_p9)
}
 0x254   : > { %s9308_s12 = sld [smem:[#allocation66_spill]]  ;;  %s1354_s27 = scalar_lea.vmem [#allocation26], %s7982_s23 }
 0x255   : > { %6031 = dma.hbm_to_vmem [thread:$0]  (%p9296_p7), %s8258_s3, 256, %s8275_s13, %s7997_s2, %s9298_s26, %s9298_s26, %s9297_s7  }
 0x256   : > { %s1361_s19 = sshll.u32 %s1354_s27, 4  ;;  %s7072_s15 = scalar_lea.hbm %s8279_s6, 16  ;;  %s1362_s19 = int_to_ptr.vmem [resolvable:$true] %s1361_s19 }
 0x257   : > { %p7073_p2 = scmp.ne.s32.totalorder %s8279_s6, %s7072_s15  ;;  %s7076_s10 = scalar_lea.hbm %s9307_s17, 32 }
 0x258   : > { %p7077_p3 = scmp.lt.u32.totalorder %s8279_s6, %s9307_s17  ;;  %p7078_p8 = scmp.lt.u32.totalorder %s7076_s10, %s7072_s15 }
 0x259   : > { %p7074_p6 = pnand %p7073_p2, %p9296_p7  ;;  %p7080_p12 = scmp.lt.u32.totalorder %s7072_s15, %s8279_s6 }
 0x25a   : > { %s8305_s9 = scalar_lea.hbm %s9308_s12, %s8021_s5  ;;  %p7079_p11 = por %p7078_p8, %p7077_p3 }
 0x25b   : > { %p7075_p4 = pneg %p7074_p6 }
 0x25c   : > { %p7081_p5 = por %p7080_p12, %p7079_p11 }
 0x25e   : > { %p7082_p0 = pnand %p7081_p5, %p7075_p4 }
 0x260   : > { %7085 = shalt.err (!%p7082_p0)
}
 0x261   : > { %s7086_s8 = scalar_lea.vmem %s1362_s19, 16  ;;  %s7580_s3 = smov [#allocation26]  }
 0x262   : > { %p7087_p1 = scmp.ne.s32.totalorder %s1362_s19, %s7086_s8  ;;  %s7090_s13 = sshll.u32 %s7580_s3, 4  ;;  %s7091_s13 = int_to_ptr.vmem [resolvable:$false] %s7090_s13 }
 0x263   : > { %s7092_s27 = scalar_lea.vmem %s7091_s13, 32  ;;  %p7093_p9 = scmp.lt.s32.totalorder %s1362_s19, %s7091_s13 }
 0x264   : > { %p7088_p10 = pnand %p7087_p1, %p9296_p7  ;;  %p7094_p2 = scmp.lt.s32.totalorder %s7092_s27, %s7086_s8 }
 0x266   : > { %p7089_p13 = pneg %p7088_p10  ;;  %p7095_p6 = por %p7094_p2, %p7093_p9 }
 0x268   : > { %p7096_p3 = pnand %p7095_p6, %p7089_p13 }
 0x26a   : > { %7099 = shalt.err (!%p7096_p3)
}
 0x26b   : > { %s9309_s15 = sld [smem:[#allocation67_spill]]  ;;  %s1371_s10 = scalar_lea.vmem [#allocation27], %s7982_s23 }
 0x26c   : > { %6032 = dma.hbm_to_vmem [thread:$0]  (%p9296_p7), %s8279_s6, 16, %s1362_s19, %s7997_s2  }
 0x26d   : > { %s1378_s8 = sshll.u32 %s1371_s10, 4  ;;  %s7100_s13 = scalar_lea.hbm %s8305_s9, 16  ;;  %s1379_s8 = int_to_ptr.vmem [resolvable:$true] %s1378_s8 }
 0x26e   : > { %p7101_p4 = scmp.ne.s32.totalorder %s8305_s9, %s7100_s13  ;;  %s7104_s27 = scalar_lea.hbm %s9308_s12, 32 }
 0x26f   : > { %p7105_p12 = scmp.lt.u32.totalorder %s8305_s9, %s9308_s12  ;;  %p7106_p5 = scmp.lt.u32.totalorder %s7104_s27, %s7100_s13 }
 0x270   : > { %p7102_p8 = pnand %p7101_p4, %p9296_p7  ;;  %p7108_p1 = scmp.lt.u32.totalorder %s7100_s13, %s8305_s9 }
 0x271   : > { %s9310_s14 = smov %s9309_s15  ;;  %s8324_s3 = scalar_lea.hbm %s9309_s15, %s8021_s5 }
 0x272   : > { %p7103_p11 = pneg %p7102_p8  ;;  %p7107_p0 = por %p7106_p5, %p7105_p12 }
 0x274   : > { %p7109_p10 = por %p7108_p1, %p7107_p0 }
 0x276   : > { %p7110_p13 = pnand %p7109_p10, %p7103_p11 }
 0x278   : > { %7113 = shalt.err (!%p7110_p13)
}
 0x279   : > { %s7114_s17 = scalar_lea.vmem %s1379_s8, 16  ;;  %s7581_s6 = smov [#allocation27]  }
 0x27a   : > { %p7115_p9 = scmp.ne.s32.totalorder %s1379_s8, %s7114_s17  ;;  %s7118_s19 = sshll.u32 %s7581_s6, 4  ;;  %s7119_s19 = int_to_ptr.vmem [resolvable:$false] %s7118_s19 }
 0x27b   : > { %s7120_s15 = scalar_lea.vmem %s7119_s19, 32  ;;  %p7121_p3 = scmp.lt.s32.totalorder %s1379_s8, %s7119_s19 }
 0x27c   : > { %p7116_p2 = pnand %p7115_p9, %p9296_p7  ;;  %p7122_p4 = scmp.lt.s32.totalorder %s7120_s15, %s7114_s17 }
 0x27e   : > { %p7117_p6 = pneg %p7116_p2  ;;  %p7123_p8 = por %p7122_p4, %p7121_p3 }
 0x280   : > { %p7124_p5 = pnand %p7123_p8, %p7117_p6 }
 0x282   : > { %7127 = shalt.err (!%p7124_p5)
}
 0x283   : > { %s9311_s10 = sld [smem:[#allocation68_spill]]  ;;  %s1388_s27 = scalar_lea.vmem [#allocation28], %s7982_s23 }
 0x284   : > { %6033 = dma.hbm_to_vmem [thread:$0]  (%p9296_p7), %s8305_s9, 16, %s1379_s8, %s7997_s2  }
 0x285   : > { %s1395_s17 = sshll.u32 %s1388_s27, 4  ;;  %s7128_s19 = scalar_lea.hbm %s8324_s3, 16  ;;  %s1396_s17 = int_to_ptr.vmem [resolvable:$true] %s1395_s17 }
 0x286   : > { %p7129_p11 = scmp.ne.s32.totalorder %s8324_s3, %s7128_s19  ;;  %s7132_s15 = scalar_lea.hbm %s9310_s14, 32 }
 0x287   : > { %p7133_p1 = scmp.lt.u32.totalorder %s8324_s3, %s9310_s14  ;;  %p7134_p10 = scmp.lt.u32.totalorder %s7132_s15, %s7128_s19 }
 0x288   : > { %p7130_p12 = pnand %p7129_p11, %p9296_p7  ;;  %p7136_p9 = scmp.lt.u32.totalorder %s7128_s19, %s8324_s3 }
 0x289   : > { %s9312_s13 = smov %s9311_s10  ;;  %s8343_s6 = scalar_lea.hbm %s9311_s10, %s8021_s5 }
 0x28a   : > { %p7131_p0 = pneg %p7130_p12  ;;  %p7135_p13 = por %p7134_p10, %p7133_p1 }
 0x28c   : > { %p7137_p2 = por %p7136_p9, %p7135_p13 }
 0x28e   : > { %p7138_p6 = pnand %p7137_p2, %p7131_p0 }
 0x290   : > { %7141 = shalt.err (!%p7138_p6)
}
 0x291   : > { %s7142_s12 = scalar_lea.vmem %s1396_s17, 16  ;;  %s7582_s9 = smov [#allocation28]  }
 0x292   : > { %p7143_p3 = scmp.ne.s32.totalorder %s1396_s17, %s7142_s12  ;;  %s7146_s8 = sshll.u32 %s7582_s9, 4  ;;  %s7147_s8 = int_to_ptr.vmem [resolvable:$false] %s7146_s8 }
 0x293   : > { %s7148_s10 = scalar_lea.vmem %s7147_s8, 32  ;;  %p7149_p5 = scmp.lt.s32.totalorder %s1396_s17, %s7147_s8 }
 0x294   : > { %p7144_p4 = pnand %p7143_p3, %p9296_p7  ;;  %p7150_p11 = scmp.lt.s32.totalorder %s7148_s10, %s7142_s12 }
 0x296   : > { %p7145_p8 = pneg %p7144_p4  ;;  %p7151_p12 = por %p7150_p11, %p7149_p5 }
 0x298   : > { %p7152_p1 = pnand %p7151_p12, %p7145_p8 }
 0x29a   : > { %7155 = shalt.err (!%p7152_p1)
}
 0x29b   : > { %s9313_s27 = sld [smem:[#allocation69_spill]]  ;;  %s1405_s19 = scalar_lea.vmem [#allocation29], %s7982_s23 }
 0x29c   : > { %6034 = dma.hbm_to_vmem [thread:$0]  (%p9296_p7), %s8324_s3, 16, %s1396_s17, %s7997_s2  }
 0x29d   : > { %s1412_s12 = sshll.u32 %s1405_s19, 4  ;;  %s7156_s9 = scalar_lea.hbm %s8343_s6, 16  ;;  %s1413_s12 = int_to_ptr.vmem [resolvable:$true] %s1412_s12 }
 0x29e   : > { %p7157_p0 = scmp.ne.s32.totalorder %s8343_s6, %s7156_s9  ;;  %s7160_s8 = scalar_lea.hbm %s9312_s13, 32 }
 0x29f   : > { %p7161_p9 = scmp.lt.u32.totalorder %s8343_s6, %s9312_s13  ;;  %p7162_p2 = scmp.lt.u32.totalorder %s7160_s8, %s7156_s9 }
 0x2a0   : > { %p7158_p10 = pnand %p7157_p0, %p9296_p7  ;;  %p7164_p3 = scmp.lt.u32.totalorder %s7156_s9, %s8343_s6 }
 0x2a1   : > { %s8362_s15 = scalar_lea.hbm %s9313_s27, %s8021_s5  ;;  %p7163_p6 = por %p7162_p2, %p7161_p9 }
 0x2a2   : > { %p7159_p13 = pneg %p7158_p10 }
 0x2a3   : > { %p7165_p4 = por %p7164_p3, %p7163_p6 }
 0x2a5   : > { %p7166_p8 = pnand %p7165_p4, %p7159_p13 }
 0x2a7   : > { %7169 = shalt.err (!%p7166_p8)
}
 0x2a8   : > { %s7170_s10 = scalar_lea.vmem %s1413_s12, 16  ;;  %s7583_s3 = smov [#allocation29]  }
 0x2a9   : > { %p7171_p5 = scmp.ne.s32.totalorder %s1413_s12, %s7170_s10  ;;  %s7174_s17 = sshll.u32 %s7583_s3, 4  ;;  %s7175_s17 = int_to_ptr.vmem [resolvable:$false] %s7174_s17 }
 0x2aa   : > { %s7176_s19 = scalar_lea.vmem %s7175_s17, 32  ;;  %p7177_p1 = scmp.lt.s32.totalorder %s1413_s12, %s7175_s17 }
 0x2ab   : > { %p7172_p11 = pnand %p7171_p5, %p9296_p7  ;;  %p7178_p0 = scmp.lt.s32.totalorder %s7176_s19, %s7170_s10 }
 0x2ad   : > { %p7173_p12 = pneg %p7172_p11  ;;  %p7179_p10 = por %p7178_p0, %p7177_p1 }
 0x2af   : > { %p7180_p2 = pnand %p7179_p10, %p7173_p12 }
 0x2b1   : > { %7183 = shalt.err (!%p7180_p2)
}
 0x2b2   : > { %s9314_s9 = sld [smem:[#allocation70_spill]]  ;;  %s1422_s8 = scalar_lea.vmem [#allocation30], %s7982_s23 }
 0x2b3   : > { %6035 = dma.hbm_to_vmem [thread:$0]  (%p9296_p7), %s8343_s6, 16, %s1413_s12, %s7997_s2  }
 0x2b4   : > { %s1429_s10 = sshll.u32 %s1422_s8, 4  ;;  %s7184_s17 = scalar_lea.hbm %s8362_s15, 16  ;;  %s1430_s10 = int_to_ptr.vmem [resolvable:$true] %s1429_s10 }
 0x2b5   : > { %p7185_p13 = scmp.ne.s32.totalorder %s8362_s15, %s7184_s17  ;;  %s7188_s19 = scalar_lea.hbm %s9313_s27, 32 }
 0x2b6   : > { %p7189_p3 = scmp.lt.u32.totalorder %s8362_s15, %s9313_s27  ;;  %p7190_p4 = scmp.lt.u32.totalorder %s7188_s19, %s7184_s17 }
 0x2b7   : > { %p7186_p9 = pnand %p7185_p13, %p9296_p7  ;;  %p7192_p5 = scmp.lt.u32.totalorder %s7184_s17, %s8362_s15 }
 0x2b8   : > { %s8381_s3 = scalar_lea.hbm %s9314_s9, %s8021_s5  ;;  %p7191_p8 = por %p7190_p4, %p7189_p3 }
 0x2b9   : > { %p7187_p6 = pneg %p7186_p9 }
 0x2ba   : > { %p7193_p11 = por %p7192_p5, %p7191_p8 }
 0x2bc   : > { %p7194_p12 = pnand %p7193_p11, %p7187_p6 }
 0x2be   : > { %7197 = shalt.err (!%p7194_p12)
}
 0x2bf   : > { %s7198_s13 = scalar_lea.vmem %s1430_s10, 16  ;;  %s7584_s6 = smov [#allocation30]  }
 0x2c0   : > { %p7199_p1 = scmp.ne.s32.totalorder %s1430_s10, %s7198_s13  ;;  %s7202_s12 = sshll.u32 %s7584_s6, 4  ;;  %s7203_s12 = int_to_ptr.vmem [resolvable:$false] %s7202_s12 }
 0x2c1   : > { %s7204_s8 = scalar_lea.vmem %s7203_s12, 32  ;;  %p7205_p2 = scmp.lt.s32.totalorder %s1430_s10, %s7203_s12 }
 0x2c2   : > { %p7200_p0 = pnand %p7199_p1, %p9296_p7  ;;  %p7206_p13 = scmp.lt.s32.totalorder %s7204_s8, %s7198_s13 }
 0x2c4   : > { %p7201_p10 = pneg %p7200_p0  ;;  %p7207_p9 = por %p7206_p13, %p7205_p2 }
 0x2c6   : > { %p7208_p3 = pnand %p7207_p9, %p7201_p10 }
 0x2c8   : > { %7211 = shalt.err (!%p7208_p3)
}
 0x2c9   : > { %s9315_s17 = sld [smem:[#allocation71_spill]]  ;;  %s1439_s19 = scalar_lea.vmem [#allocation31], %s7982_s23 }
 0x2ca   : > { %6036 = dma.hbm_to_vmem [thread:$0]  (%p9296_p7), %s8362_s15, 16, %s1430_s10, %s7997_s2  }
 0x2cb   : > { %s1446_s13 = sshll.u32 %s1439_s19, 4  ;;  %s7212_s12 = scalar_lea.hbm %s8381_s3, 16  ;;  %s1447_s13 = int_to_ptr.vmem [resolvable:$true] %s1446_s13 }
 0x2cc   : > { %p7213_p6 = scmp.ne.s32.totalorder %s8381_s3, %s7212_s12  ;;  %s7216_s8 = scalar_lea.hbm %s9314_s9, 32 }
 0x2cd   : > { %p7217_p5 = scmp.lt.u32.totalorder %s8381_s3, %s9314_s9  ;;  %p7218_p11 = scmp.lt.u32.totalorder %s7216_s8, %s7212_s12 }
 0x2ce   : > { %p7214_p4 = pnand %p7213_p6, %p9296_p7  ;;  %p7220_p1 = scmp.lt.u32.totalorder %s7212_s12, %s8381_s3 }
 0x2cf   : > { %s8400_s6 = scalar_lea.hbm %s9315_s17, %s8021_s5  ;;  %p7219_p12 = por %p7218_p11, %p7217_p5 }
 0x2d0   : > { %p7215_p8 = pneg %p7214_p4 }
 0x2d1   : > { %p7221_p0 = por %p7220_p1, %p7219_p12 }
 0x2d3   : > { %p7222_p10 = pnand %p7221_p0, %p7215_p8 }
 0x2d5   : > { %7225 = shalt.err (!%p7222_p10)
}
 0x2d6   : > { %s7226_s14 = scalar_lea.vmem %s1447_s13, 16  ;;  %s7585_s15 = smov [#allocation31]  }
 0x2d7   : > { %p7227_p2 = scmp.ne.s32.totalorder %s1447_s13, %s7226_s14  ;;  %s7230_s10 = sshll.u32 %s7585_s15, 4  ;;  %s7231_s10 = int_to_ptr.vmem [resolvable:$false] %s7230_s10 }
 0x2d8   : > { %s7232_s19 = scalar_lea.vmem %s7231_s10, 32  ;;  %p7233_p3 = scmp.lt.s32.totalorder %s1447_s13, %s7231_s10 }
 0x2d9   : > { %p7228_p13 = pnand %p7227_p2, %p9296_p7  ;;  %p7234_p6 = scmp.lt.s32.totalorder %s7232_s19, %s7226_s14 }
 0x2db   : > { %p7229_p9 = pneg %p7228_p13  ;;  %p7235_p4 = por %p7234_p6, %p7233_p3 }
 0x2dd   : > { %p7236_p5 = pnand %p7235_p4, %p7229_p9 }
 0x2df   : > { %7239 = shalt.err (!%p7236_p5)
}
 0x2e0   : > { %s9316_s12 = sld [smem:[#allocation72_spill]]  ;;  %s1456_s8 = scalar_lea.vmem [#allocation32], %s7982_s23 }
 0x2e1   : > { %6037 = dma.hbm_to_vmem [thread:$0]  (%p9296_p7), %s8381_s3, 16, %s1447_s13, %s7997_s2  }
 0x2e2   : > { %s1463_s14 = sshll.u32 %s1456_s8, 4  ;;  %s7240_s10 = scalar_lea.hbm %s8400_s6, 16  ;;  %s1464_s14 = int_to_ptr.vmem [resolvable:$true] %s1463_s14 }
 0x2e3   : > { %p7241_p8 = scmp.ne.s32.totalorder %s8400_s6, %s7240_s10  ;;  %s7244_s19 = scalar_lea.hbm %s9315_s17, 32 }
 0x2e4   : > { %p7245_p1 = scmp.lt.u32.totalorder %s8400_s6, %s9315_s17  ;;  %p7246_p0 = scmp.lt.u32.totalorder %s7244_s19, %s7240_s10 }
 0x2e5   : > { %p7242_p11 = pnand %p7241_p8, %p9296_p7  ;;  %p7248_p2 = scmp.lt.u32.totalorder %s7240_s10, %s8400_s6 }
 0x2e6   : > { %s8419_s15 = scalar_lea.hbm %s9316_s12, %s7988_s22  ;;  %p7247_p10 = por %p7246_p0, %p7245_p1 }
 0x2e7   : > { %p7243_p12 = pneg %p7242_p11 }
 0x2e8   : > { %p7249_p13 = por %p7248_p2, %p7247_p10 }
 0x2ea   : > { %p7250_p9 = pnand %p7249_p13, %p7243_p12 }
 0x2ec   : > { %7253 = shalt.err (!%p7250_p9)
}
 0x2ed   : > { %s7254_s9 = scalar_lea.vmem %s1464_s14, 16  ;;  %s7586_s22 = smov [#allocation32]  }
 0x2ee   : > { %p7255_p3 = scmp.ne.s32.totalorder %s1464_s14, %s7254_s9  ;;  %s7258_s3 = sshll.u32 %s7586_s22, 4  ;;  %s7259_s3 = int_to_ptr.vmem [resolvable:$false] %s7258_s3 }
 0x2ef   : > { %s7260_s13 = scalar_lea.vmem %s7259_s3, 32  ;;  %p7261_p5 = scmp.lt.s32.totalorder %s1464_s14, %s7259_s3 }
 0x2f0   : > { %p7256_p6 = pnand %p7255_p3, %p9296_p7  ;;  %p7262_p8 = scmp.lt.s32.totalorder %s7260_s13, %s7254_s9 }
 0x2f2   : > { %p7257_p4 = pneg %p7256_p6  ;;  %p7263_p11 = por %p7262_p8, %p7261_p5 }
 0x2f4   : > { %p7264_p0 = pnand %p7263_p11, %p7257_p4 }
 0x2f6   : > { %7267 = shalt.err (!%p7264_p0)
}
 0x2f7   : > { %s9317_s8 = sld [smem:[#allocation73_spill]]  ;;  %s1474_s10 = scalar_lea.vmem [#allocation33], %s7985_s4 }
 0x2f8   : > { %6038 = dma.hbm_to_vmem [thread:$0]  (%p9296_p7), %s8400_s6, 16, %s1464_s14, %s7997_s2  }
 0x2f9   : > { %s1481_s9 = sshll.u32 %s1474_s10, 4  ;;  %s7268_s22 = scalar_lea.hbm %s8419_s15, 256  ;;  %s8436_s9 = int_to_ptr.vmem [resolvable:$true] %s1481_s9 }
 0x2fa   : > { %p7269_p12 = scmp.ne.s32.totalorder %s8419_s15, %s7268_s22  ;;  %s7272_s3 = scalar_lea.hbm %s9316_s12, 512 }
 0x2fb   : > { %p7273_p2 = scmp.lt.u32.totalorder %s8419_s15, %s9316_s12  ;;  %p7274_p13 = scmp.lt.u32.totalorder %s7272_s3, %s7268_s22 }
 0x2fc   : > { %p7270_p1 = pnand %p7269_p12, %p9296_p7  ;;  %p7276_p3 = scmp.lt.u32.totalorder %s7268_s22, %s8419_s15 }
 0x2fd   : > { %s8440_s19 = scalar_lea.hbm %s9317_s8, %s8021_s5  ;;  %p7275_p9 = por %p7274_p13, %p7273_p2 }
 0x2fe   : > { %p7271_p10 = pneg %p7270_p1 }
 0x2ff   : > { %p7277_p6 = por %p7276_p3, %p7275_p9 }
 0x301   : > { %p7278_p4 = pnand %p7277_p6, %p7271_p10 }
 0x303   : > { %7281 = shalt.err (!%p7278_p4)
}
 0x304   : > { %s7282_s4 = scalar_lea.vmem %s8436_s9, 256  ;;  %s7587_s6 = smov [#allocation33]  }
 0x305   : > { %p7283_p5 = scmp.ne.s32.totalorder %s8436_s9, %s7282_s4  ;;  %s7286_s14 = sshll.u32 %s7587_s6, 4  ;;  %s7287_s14 = int_to_ptr.vmem [resolvable:$false] %s7286_s14 }
 0x306   : > { %s7288_s13 = scalar_lea.vmem %s7287_s14, 512  ;;  %p7289_p0 = scmp.lt.s32.totalorder %s8436_s9, %s7287_s14 }
 0x307   : > { %p7284_p8 = pnand %p7283_p5, %p9296_p7  ;;  %p7290_p12 = scmp.lt.s32.totalorder %s7288_s13, %s7282_s4 }
 0x309   : > { %p7285_p11 = pneg %p7284_p8  ;;  %p7291_p1 = por %p7290_p12, %p7289_p0 }
 0x30b   : > { %p7292_p2 = pnand %p7291_p1, %p7285_p11 }
 0x30d   : > { %7295 = shalt.err (!%p7292_p2)
}
 0x30e   : > { %6039 = dma.hbm_to_vmem [thread:$0]  (%p9296_p7), %s8419_s15, 256, %s8436_s9, %s7997_s2, %s9298_s26, %s9298_s26, %s9297_s7  }
 0x30f   : > { %s1494_s10 = scalar_lea.vmem [#allocation34], %s7982_s23  ;;  %s5509_s3 = sshll.u32 %s7982_s23, 5 }
 0x310   : > { %s1501_s22 = sshll.u32 %s1494_s10, 4  ;;  %s7296_s4 = scalar_lea.hbm %s8440_s19, 16  ;;  %s1502_s22 = int_to_ptr.vmem [resolvable:$true] %s1501_s22 }
 0x311   : > { %p7297_p10 = scmp.ne.s32.totalorder %s8440_s19, %s7296_s4  ;;  %s7300_s6 = scalar_lea.hbm %s9317_s8, 32 }
 0x312   : > { %p7301_p3 = scmp.lt.u32.totalorder %s8440_s19, %s9317_s8  ;;  %p7302_p6 = scmp.lt.u32.totalorder %s7300_s6, %s7296_s4 }
 0x313   : > { %p7298_p13 = pnand %p7297_p10, %p9296_p7  ;;  %p7304_p5 = scmp.lt.u32.totalorder %s7296_s4, %s8440_s19 }
 0x314   : > { %p7303_p4 = por %p7302_p6, %p7301_p3 }
 0x315   : > { %p7299_p9 = pneg %p7298_p13 }
 0x316   : > { %p7305_p8 = por %p7304_p5, %p7303_p4 }
 0x318   : > { %p7306_p11 = pnand %p7305_p8, %p7299_p9 }
 0x31a   : > { %7309 = shalt.err (!%p7306_p11)
}
 0x31b   : > { %s7310_s14 = scalar_lea.vmem %s1502_s22, 16  ;;  %s7588_s15 = smov [#allocation34]  }
 0x31c   : > { %p7311_p0 = scmp.ne.s32.totalorder %s1502_s22, %s7310_s14  ;;  %s7314_s9 = sshll.u32 %s7588_s15, 4  ;;  %s7315_s9 = int_to_ptr.vmem [resolvable:$false] %s7314_s9 }
 0x31d   : > { %s7316_s13 = scalar_lea.vmem %s7315_s9, 32  ;;  %p7317_p2 = scmp.lt.s32.totalorder %s1502_s22, %s7315_s9 }
 0x31e   : > { %p7312_p12 = pnand %p7311_p0, %p9296_p7  ;;  %p7318_p10 = scmp.lt.s32.totalorder %s7316_s13, %s7310_s14 }
 0x320   : > { %p7313_p1 = pneg %p7312_p12  ;;  %p7319_p13 = por %p7318_p10, %p7317_p2 }
 0x322   : > { %p7320_p3 = pnand %p7319_p13, %p7313_p1 }
 0x324   : > { %7323 = shalt.err (!%p7320_p3)
}
 0x325   : > { %s9318_s10 = sld [smem:[#allocation74_spill]]  ;;  %s5638_s6 = sshll.u32 %s7512_s16, 9 }
 0x326   : > { %6040 = dma.hbm_to_vmem [thread:$0]  (%p9296_p7), %s8440_s19, 16, %s1502_s22, %s7997_s2  }
 0x327   : > { %s1512_s15 = scalar_lea.vmem [#allocation35], %s5509_s3 }
 0x328   : > { %s1519_s8 = sshll.u32 %s1512_s15, 4  ;;  %s8485_s8 = int_to_ptr.vmem [resolvable:$true] %s1519_s8 }
 0x32b   : > { %s9319_s4 = smov %s9318_s10  ;;  %s8483_s9 = scalar_lea.hbm %s9318_s10, %s5638_s6 }
 0x32c   : > { %s7324_s14 = scalar_lea.hbm %s8483_s9, 512  ;;  %s7328_s13 = scalar_lea.hbm %s9319_s4, 1024 }
 0x32d   : > { %p7325_p9 = scmp.ne.s32.totalorder %s8483_s9, %s7324_s14  ;;  %p7329_p5 = scmp.lt.u32.totalorder %s8483_s9, %s9319_s4 }
 0x32e   : > { %p7330_p8 = scmp.lt.u32.totalorder %s7328_s13, %s7324_s14  ;;  %p7332_p0 = scmp.lt.u32.totalorder %s7324_s14, %s8483_s9 }
 0x32f   : > { %p7326_p6 = pnand %p7325_p9, %p9296_p7 }
 0x330   : > { %p7331_p11 = por %p7330_p8, %p7329_p5 }
 0x331   : > { %p7327_p4 = pneg %p7326_p6 }
 0x332   : > { %p7333_p12 = por %p7332_p0, %p7331_p11 }
 0x334   : > { %p7334_p1 = pnand %p7333_p12, %p7327_p4 }
 0x336   : > { %7337 = shalt.err (!%p7334_p1)
}
 0x337   : > { %s7338_s19 = scalar_lea.vmem %s8485_s8, 512  ;;  %s7589_s22 = smov [#allocation35]  }
 0x338   : > { %p7339_p2 = scmp.ne.s32.totalorder %s8485_s8, %s7338_s19  ;;  %s7342_s3 = sshll.u32 %s7589_s22, 4  ;;  %s7343_s3 = int_to_ptr.vmem [resolvable:$false] %s7342_s3 }
 0x339   : > { %s7344_s10 = scalar_lea.vmem %s7343_s3, 1024  ;;  %p7345_p3 = scmp.lt.s32.totalorder %s8485_s8, %s7343_s3 }
 0x33a   : > { %p7340_p10 = pnand %p7339_p2, %p9296_p7  ;;  %p7346_p9 = scmp.lt.s32.totalorder %s7344_s10, %s7338_s19 }
 0x33c   : > { %p7341_p13 = pneg %p7340_p10  ;;  %p7347_p6 = por %p7346_p9, %p7345_p3 }
 0x33e   : > { %p7348_p5 = pnand %p7347_p6, %p7341_p13 }
 0x340   : > { %7351 = shalt.err (!%p7348_p5)
}
 0x341   : > { %s9320_s6 = sld [smem:[#allocation75_spill]]  ;;  %s1532_s14 = scalar_lea.vmem [#allocation36], %s7982_s23 }
 0x342   : > { %6041 = dma.hbm_to_vmem [thread:$0]  (%p9296_p7), %s8483_s9, 512, %s8485_s8, %s7997_s2, %s9298_s26, %s9298_s26, %s9297_s7  }
 0x343   : > { %s1539_s13 = sshll.u32 %s1532_s14, 4  ;;  %s1540_s13 = int_to_ptr.vmem [resolvable:$true] %s1539_s13 }
 0x347   : > { %s8510_s15 = scalar_lea.hbm %s9320_s6, %s8021_s5  ;;  %s7356_s22 = scalar_lea.hbm %s9320_s6, 32 }
 0x348   : > { %s7352_s19 = scalar_lea.hbm %s8510_s15, 16  ;;  %p7357_p0 = scmp.lt.u32.totalorder %s8510_s15, %s9320_s6 }
 0x349   : > { %p7353_p4 = scmp.ne.s32.totalorder %s8510_s15, %s7352_s19  ;;  %p7358_p12 = scmp.lt.u32.totalorder %s7356_s22, %s7352_s19 }
 0x34a   : > { %p7360_p2 = scmp.lt.u32.totalorder %s7352_s19, %s8510_s15 }
 0x34b   : > { %p7354_p8 = pnand %p7353_p4, %p9296_p7  ;;  %p7359_p1 = por %p7358_p12, %p7357_p0 }
 0x34d   : > { %p7355_p11 = pneg %p7354_p8  ;;  %p7361_p10 = por %p7360_p2, %p7359_p1 }
 0x34f   : > { %p7362_p13 = pnand %p7361_p10, %p7355_p11 }
 0x351   : > { %7365 = shalt.err (!%p7362_p13)
}
 0x352   : > { %s7366_s5 = scalar_lea.vmem %s1540_s13, 16  ;;  %s7590_s23 = smov [#allocation36]  }
 0x353   : > { %p7367_p3 = scmp.ne.s32.totalorder %s1540_s13, %s7366_s5  ;;  %s7370_s7 = sshll.u32 %s7590_s23, 4  ;;  %s7371_s7 = int_to_ptr.vmem [resolvable:$false] %s7370_s7 }
 0x354   : > { %s7372_s26 = scalar_lea.vmem %s7371_s7, 32  ;;  %p7373_p5 = scmp.lt.s32.totalorder %s1540_s13, %s7371_s7 }
 0x355   : > { %p7368_p9 = pnand %p7367_p3, %p9296_p7  ;;  %p7374_p4 = scmp.lt.s32.totalorder %s7372_s26, %s7366_s5 }
 0x357   : > { %p7369_p6 = pneg %p7368_p9  ;;  %p7375_p8 = por %p7374_p4, %p7373_p5 }
 0x359   : > { %p7376_p0 = pnand %p7375_p8, %p7369_p6 }
 0x35b   : > { %7379 = shalt.err (!%p7376_p0)
}
 0x35c   : > { %6042 = dma.hbm_to_vmem [thread:$0]  (%p9296_p7), %s8510_s15, 16, %s1540_s13, %s7997_s2  }
 0x35d PF: > { %p9321_p11 = scmp.ne.s32.totalorder %s9290_s1, 0 }
 0x35e   : > { %p9322_p12 = scmp.eq.s32.totalorder (!%p9321_p11), %s7809_s0, 0 }
 0x35f   : > { %1548 = sbr.rel (%p9321_p11) target bundleno = 5745 (0x1671), region = 148 }
 0x366   : > { %7459 = dma.done.wait (%p9322_p12), [#allocation3], 256   ;;  %p9323_p1 = pmov %p9322_p12 }
 0x368   : > { %7461 = vsyncadd (%p9323_p1), [#allocation3], 4294967040  ;;  %p9324_p2 = pmov %p9323_p1 }
 0x369   : > { %p9325_p10 = pmov %p9323_p1 }
 0x36a   : > { %7463 = dma.done.wait (%p9324_p2), [#allocation6], 512  }
 0x36b   : > { %7465 = vsyncadd (%p9325_p10), [#allocation6], 4294966784  ;;  %p9326_p13 = pmov %p9323_p1 }
 0x36c   : > { %p9327_p7 = pmov %p9323_p1 }
 0x36d   : > { %7467 = dma.done.wait (%p9326_p13), [#allocation9], 288  }
 0x36e   : > { %7469 = vsyncadd (%p9327_p7), [#allocation9], 4294967008  ;;  %p9328_p3 = pmov %p9323_p1 }
 0x36f   : > { %p9329_p9 = pmov %p9323_p1 }
 0x370   : > { %7471 = dma.done.wait (%p9328_p3), [#allocation12], 128  }
 0x371   : > { %7473 = vsyncadd (%p9329_p9), [#allocation12], 4294967168  ;;  %s9330_s28 = sld [smem:[#allocation80_spill]]  ;;  %s9331_s1 = sld [smem:[#allocation83_spill]] }
 0x372   : > { %s1574_s2 = sand.u32 1, %s7809_s0  }
 0x373   : > { %s1575_s3 = scalar_lea.sflag [#allocation3], %s1574_s2 }
 0x377   : > { %s8547_s8 = sand.u32 1, %s9330_s28   ;;  %p9332_p6 = scmp.ne.s32.totalorder %s9331_s1, 0 }
 0x378   : > { %s8550_s9 = sshll.u32 %s8547_s8, 4 }
 0x379   : > { %7475 = dma.done.wait (%p9332_p6), %s1575_s3, 2800  }
 0x37a   : > { %7477 = vsyncadd (%p9332_p6), %s1575_s3, 4294964496  ;;  %s5528_s15 = sshll.u32 %s8547_s8, 5  ;;  %s1637_s7 = scalar_lea.vmem [#allocation20], %s8547_s8 }
 0x37b   : > { %s1646_s26 = scalar_lea.vmem [#allocation21], %s8550_s9  ;;  %s1654_s28 = scalar_lea.vmem [#allocation22], %s8547_s8 }
 0x37c   : > { %s1663_s1 = scalar_lea.vmem [#allocation23], %s8550_s9  ;;  %s1671_s2 = scalar_lea.vmem [#allocation24], %s8547_s8 }
 0x37d   : > { %s1680_s3 = scalar_lea.vmem [#allocation25], %s8550_s9  ;;  %s1696_s14 = scalar_lea.vmem [#allocation27], %s8547_s8 }
 0x37e   : > { %s1704_s4 = scalar_lea.vmem [#allocation28], %s8547_s8  ;;  %s1712_s13 = scalar_lea.vmem [#allocation29], %s8547_s8 }
 0x37f   : > { %s1720_s6 = scalar_lea.vmem [#allocation30], %s8547_s8  ;;  %s8579_s5 = scalar_lea.vmem [#allocation35], %s5528_s15 }
 0x380   : > { %p9333_p5 = pmov %p9323_p1 }
 0x381   : > { %p9334_p4 = pmov %p9323_p1 }
 0x382   : > { %7479 = dma.done.wait (%p9333_p5), [#allocation6], 16  }
 0x383   : > { %7481 = vsyncadd (%p9334_p4), [#allocation6], 4294967280  ;;  %p9335_p8 = pmov %p9323_p1 }
 0x384   : > { %p9336_p0 = pmov %p9323_p1 }
 0x385   : > { %7483 = dma.done.wait (%p9335_p8), [#allocation9], 16  }
 0x386   : > { %7485 = vsyncadd (%p9336_p0), [#allocation9], 4294967280  ;;  %s8590_s10 = scalar_lea.vmem [#allocation40], %s5528_s15  ;;  %s9337_s19 = sld [smem:[#allocation81_spill]] }
 0x38c   : > { %p5532_p11 = scmp.ne.s32.totalorder %s9337_s19, 0 }
 0x38d   : > { %v1973_v0 = vld [vmem:[#allocation2] sm:$0xff] (!%p5532_p11)  ;;  %vm1975_vm0 = vcmask (!%p5532_p11), 261120   ;;  %v1974_v1 = vld [vmem:[#allocation2 + $0x8] sm:$0xff] (!%p5532_p11) }
 0x38e   : > { %1972 = sbr.rel (%p5532_p11) target bundleno = 917 (0x395), region = 280  ;;  %1976 = vst.msk [vmem:[#allocation39] sm:$0xff] (!%p5532_p11), %vm1975_vm0, %v1973_v0  ;;  %1977 = vst.msk [vmem:[#allocation39 + $0x8] sm:$0xff] (!%p5532_p11), %vm1975_vm0, %v1974_v1 }
 0x395 PF: > { %v8593_v2 = vld [vmem:[#allocation39] sm:$0xff]  ;;  %vm1984_vm1 = vcmask 261120   ;;  %v8595_v3 = vld [vmem:[#allocation39 + $0x8] sm:$0xff]  ;;  %s9338_s15 = scalar_lea.vmem [#allocation13], %s8550_s9  ;;  %v7591_v17 = vmov 0.0   ;;  %vm7592_vm2 = vmmov 0  }
 0x396   : > { %v1985_v4 = vsel %vm1984_vm1, %v8593_v2, 0.0  ;;  %v1988_v5 = vsel %vm1984_vm1, %v8595_v3, 0.0  ;;  %v6380_v16 = vld [vmem:[%s9338_s15] sm:$0xff]   ;;  %5735 = vmatprep.subr.bf16.mxu1 %v7591_v17  ;;  %5739 = vmatprep.mubr.msk.bf16.mxu1 %vm7592_vm2, %v7591_v17  ;;  %s9339_s19 = smov %s9338_s15  ;;  %s9342_s15 = scalar_lea.vmem [#allocation14], %s8547_s8  ;;  %vm2242_vm3 = vcmask 64512   ;;  %vm2731_vm4 = vcmask 1043456  }
 0x397   : > { %1986 = vadd.xlane.f32.xlu0 %v1985_v4  ;;  %5736 = vmatpush3.bf16.msra.mxu1 %v6380_v16  ;;  %v6381_v18 = vld [vmem:[%s9339_s19 + $0x8] sm:$0xff]   ;;  %v5533_v26 = vld [vmem:[%s1696_s14] ss:$0 sm:$0xff]  ;;  %v8621_v34 = vld [vmem:[#allocation8] sm:$0xff]  ;;  %s9340_s14 = scalar_lea.vmem [#allocation15], %s8550_s9  ;;  %s9343_s19 = scalar_lea.vmem [#allocation16], %s8547_s8 }
 0x398   : > { %5751 = vmatprep.subr.bf16.mxu0 %v7591_v17  ;;  %5737 = vmatprep.subr.bf16.mxu1 %v7591_v17  ;;  %v5534_v30 = vld [vmem:[%s1704_s4] ss:$0 sm:$0xff]  ;;  %v8623_v35 = vld [vmem:[#allocation8 + $0x8] sm:$0xff]  ;;  %s9341_s4 = smov %s9340_s14  ;;  %s9344_s23 = scalar_lea.vmem [#allocation17], %s8550_s9  ;;  %vm3123_vm5 = vcmask 130048   ;;  %vm3126_vm6 = vcmask 195584  }
 0x399   : > { %5753 = vmatprep.mubr.msk.bf16.mxu0 %vm7592_vm2, %v7591_v17  ;;  %v6382_v39 = vld [vmem:[%s9340_s14] sm:$0xff]   ;;  %s7593_s14 = smov 112   ;;  %s7597_s17 = smov 8   ;;  %vm4692_vm7 = vcmask 523264  }
 0x39a   : > { %v6383_v41 = vld [vmem:[%s9341_s4 + $0x8] sm:$0xff]   ;;  %v5535_v43 = vld [vmem:[%s9342_s15] ss:$0 sm:$0xff]  ;;  %s7594_s4 = smov 120   ;;  %s7595_s15 = smov 104  }
 0x39b   : > { %1989 = vadd.xlane.f32.xlu0 %v1988_v5  ;;  %5738 = vmatpush3.bf16.msra.mxu1 %v6381_v18  ;;  %v5539_v51 = vld [vmem:[%s9343_s19] ss:$0 sm:$0xff]  ;;  %s9238_s19 = smov 96   ;;  %s9345_s12 = smov %s9344_s23 }
 0x39c   : > { %5743 = vmatprep.subr.bf16.mxu1 %v7591_v17  ;;  %s7598_s22 = smov 16  }
 0x424   : > { %v1987_v6 = vpop.xlane.xlu0 %1986 }
 0x425   : > { %v1992_v7 = vmul.f32 0.03125, %v1987_v6 }
 0x427   : > { %v1994_v8 = vsub.f32 %v8593_v2, %v1992_v7 }
 0x428   : > { %v1990_v9 = vpop.xlane.xlu0 %1989 }
 0x429   : > { %v1993_v10 = vmul.f32 0.03125, %v1990_v9  ;;  %v1996_v11 = vmul.f32 %v1994_v8, %v1994_v8 }
 0x42b   : > { %v1995_v12 = vsub.f32 %v8595_v3, %v1993_v10  ;;  %v1998_v13 = vsel %vm1984_vm1, %v1996_v11, 0.0 }
 0x42c   : > { %1999 = vadd.xlane.f32.xlu1 %v1998_v13 }
 0x42d   : > { %v1997_v14 = vmul.f32 %v1995_v12, %v1995_v12 }
 0x42f   : > { %v2001_v15 = vsel %vm1984_vm1, %v1997_v14, 0.0 }
 0x430   : > { %2002 = vadd.xlane.f32.xlu1 %v2001_v15 }
 0x4b9   : > { %v2000_v19 = vpop.xlane.xlu1 %1999 }
 0x4ba   : > { %v2004_v20 = vmul.f32 0.03125, %v2000_v19 }
 0x4bc   : > { %v2006_v21 = vadd.f32 1e-05, %v2004_v20 }
 0x4bd   : > { %v2003_v22 = vpop.xlane.xlu1 %2002 }
 0x4be   : > { %6404 = vrsqrt.f32 %v2006_v21  ;;  %v2005_v23 = vmul.f32 0.03125, %v2003_v22 }
 0x4c0   : > { %v2007_v24 = vadd.f32 1e-05, %v2005_v23 }
 0x4c2   : > { %6406 = vrsqrt.f32 %v2007_v24 }
 0x4c8   : > { %v6405_v25 = vpop.eup %6404 }
 0x4c9   : > { %v2010_v27 = vmul.f32 %v6405_v25, %v1994_v8 }
 0x4cb   : > { %v2018_v28 = vmul.f32 %v5533_v26, %v2010_v27 }
 0x4cc   : > { %v6407_v29 = vpop.eup %6406 }
 0x4cd   : > { %v2011_v31 = vmul.f32 %v6407_v29, %v1995_v12  ;;  %v2026_v33 = vadd.f32 %v5534_v30, %v2018_v28 }
 0x4cf   : > { %v2019_v32 = vmul.f32 %v5533_v26, %v2011_v31  ;;  %v2028_v37 = vadd.f32 %v2026_v33, %v8621_v34 }
 0x4d1   : > { %v2027_v36 = vadd.f32 %v5534_v30, %v2019_v32 }
 0x4d3   : > { %v2029_v38 = vadd.f32 %v2027_v36, %v8623_v35  ;;  %v2103_v42 = vpack.c.bf16 %v2027_v36, %v2026_v33 }
 0x4d5   : > { %v2035_v40 = vpack.c.bf16 %v2029_v38, %v2028_v37  ;;  %v2179_v37 = vld [vmem:[#allocation11] sm:$0xff] }
 0x4d7   : > { %5740 = vmatmul.mubr.msk.bf16.vlgmr.msra.gmra.mrb[0].mxu1 %vm1984_vm1, %v2035_v40 }
 0x4d8   : > { %5744 = vmatpush3.bf16.msra.mxu1 %v6382_v39  ;;  %5747 = vmatprep.mubr.msk.bf16.mxu1 %vm7592_vm2, %v7591_v17 }
 0x4d9   : > { %5745 = vmatprep.subr.bf16.mxu1 %v7591_v17 }
 0x4dc   : > { %5746 = vmatpush3.bf16.msra.mxu1 %v6383_v41 }
 0x4dd   : > { %5757 = vmatprep.subr.bf16.mxu1 %v7591_v17 }
 0x4df   : > { %5748 = vmatmul.mubr.msk.bf16.vlgmr.msra.gmra.mrb[4].mxu1 %vm1984_vm1, %v2103_v42 }
 0x4e0   : > { %5759 = vmatprep.mubr.msk.bf16.mxu1 %vm7592_vm2, %v7591_v17 }
 0x5aa   : > { %v2091_v44 = vpop.f32.mrb[0].mxu1 }
 0x5ab   : > { %v5741_v45 = vpop.f32.mrb[1].mxu1  ;;  %v8641_v47 = vadd.f32 %v5535_v43, %v2091_v44 }
 0x5ac   : > { %v2094_v46 = vpop.f32.mrb[2].mxu1 }
 0x5ad   : > { %v8643_v48 = vadd.f32 %v5535_v43, %v2094_v46  ;;  %v5742_v49 = vpop.f32.mrb[3].mxu1  ;;  %v2203_v59 = vpack.c.bf16 %v8641_v47, %v8641_v47 }
 0x5af   : > { %v6250_v50 = vpack.i.bf16 %v8643_v48, %v8641_v47  ;;  %v2204_v55 = vpack.c.bf16 %v8643_v48, %v8643_v48 }
 0x5b1   : > { %6251 = vrot.lane.b32.xlu1 %v6250_v50, %s7593_s14  ;;  %6246 = vrot.lane.b32.xlu0 %v6250_v50, %s7594_s4 }
 0x5b2   : > { %v2159_v52 = vpop.f32.mrb[4].mxu1 }
 0x5b3   : > { %v8651_v53 = vadd.f32 %v5539_v51, %v2159_v52  ;;  %v5749_v54 = vpop.f32.mrb[5].mxu1 }
 0x5b4   : > { %v2162_v56 = vpop.f32.mrb[6].mxu1 }
 0x5b5   : > { %5543 = vst.msk [vmem:[%s8590_s10 + $0x10] sm:$0xff] %vm1984_vm1, %v8651_v53  ;;  %v8658_v57 = vadd.f32 %v5539_v51, %v2162_v56  ;;  %6256 = vrot.lane.b32.xlu1 %v6250_v50, %s7595_s15  ;;  %2290 = vrot.lane.b32.xlu0 %v2204_v55, %s9238_s19  ;;  %v5750_v58 = vpop.f32.mrb[7].mxu1  ;;  %v2231_v31 = vpack.c.bf16 %v8651_v53, %v8651_v53 }
 0x5b7   : > { %5544 = vst.msk [vmem:[%s8590_s10 + $0x18] sm:$0xff] %vm1984_vm1, %v8658_v57  ;;  %v8669_v60 = vpack.i.bf16 %v8658_v57, %v8651_v53  ;;  %v2232_v32 = vpack.c.bf16 %v8658_v57, %v8658_v57  ;;  %v2733_v33 = vsel %vm2731_vm4, %v2231_v31, 0 }
 0x5b9   : > { %2240 = vrot.lane.b32.xlu1 %v2203_v59, %s9238_s19  ;;  %v2779_v36 = vsel %vm2731_vm4, %v2232_v32, 0 }
 0x623   : > { %v6252_v61 = vpop.permute.xlu1 %6251  ;;  %v6247_v62 = vpop.permute.xlu0 %6246 }
 0x624   : > { %v6249_v63 = vunpack.i.h.bf16 %v6247_v62  ;;  %v6248_v0 = vunpack.i.l.bf16 %v6247_v62  ;;  %v6254_v1 = vunpack.i.h.bf16 %v6252_v61  ;;  %v6253_v4 = vunpack.i.l.bf16 %v6252_v61 }
 0x626   : > { %v2206_v5 = vpack.c.bf16 %v6249_v63, %v6249_v63  ;;  %v2205_v6 = vpack.c.bf16 %v6248_v0, %v6248_v0  ;;  %v2208_v10 = vpack.c.bf16 %v6254_v1, %v6254_v1  ;;  %v2207_v11 = vpack.c.bf16 %v6253_v4, %v6253_v4 }
 0x627   : > { %v6257_v7 = vpop.permute.xlu1 %6256  ;;  %v2291_v8 = vpop.permute.xlu0 %2290 }
 0x628   : > { %v2296_v9 = vsel %vm2242_vm3, %v2291_v8, 0  ;;  %2339 = vrot.lane.b32.xlu1 %v2205_v6, %s9238_s19  ;;  %2388 = vrot.lane.b32.xlu0 %v2206_v5, %s9238_s19  ;;  %v6259_v12 = vunpack.i.h.bf16 %v6257_v7  ;;  %v6258_v13 = vunpack.i.l.bf16 %v6257_v7 }
 0x629   : > { %5758 = vmatpush3.bf16.xpose.msra.mxu1 %v2296_v9 }
 0x62a   : > { %5769 = vmatprep.subr.bf16.mxu1 %v7591_v17  ;;  %v2210_v16 = vpack.c.bf16 %v6259_v12, %v6259_v12  ;;  %v2209_v18 = vpack.c.bf16 %v6258_v13, %v6258_v13 }
 0x62b   : > { %v2241_v14 = vpop.permute.xlu1 %2240 }
 0x62c   : > { %2437 = vrot.lane.b32.xlu1 %v2207_v11, %s9238_s19  ;;  %2486 = vrot.lane.b32.xlu0 %v2208_v10, %s9238_s19  ;;  %v2247_v15 = vsel %vm2242_vm3, %v2241_v14, 0 }
 0x62d   : > { %5752 = vmatpush3.bf16.xpose.msra.mxu0 %v2247_v15 }
 0x62e   : > { %5763 = vmatprep.subr.bf16.mxu0 %v7591_v17 }
 0x630   : > { %2535 = vrot.lane.b32.xlu1 %v2209_v18, %s9238_s19  ;;  %2584 = vrot.lane.b32.xlu0 %v2210_v16, %s9238_s19 }
 0x631   : > { %5760 = vmatmul.mubr.msk.bf16.vlgmr.msra.gmra.mrb[8].mxu1 %vm2242_vm3, %v2204_v55 }
 0x632   : > { %5771 = vmatprep.mubr.msk.bf16.mxu1 %vm7592_vm2, %v7591_v17 }
 0x634   : > { %5754 = vmatmul.mubr.msk.bf16.vlgmr.msra.gmra.mrb[0].mxu0 %vm2242_vm3, %v2203_v59 }
 0x635   : > { %5765 = vmatprep.mubr.msk.bf16.mxu0 %vm7592_vm2, %v7591_v17 }
 0x69a   : > { %v2340_v19 = vpop.permute.xlu1 %2339  ;;  %v2389_v20 = vpop.permute.xlu0 %2388 }
 0x69b   : > { %v2345_v21 = vsel %vm2242_vm3, %v2340_v19, 0  ;;  %v2394_v22 = vsel %vm2242_vm3, %v2389_v20, 0 }
 0x69c   : > { %5764 = vmatpush3.bf16.xpose.msra.mxu0 %v2345_v21  ;;  %5770 = vmatpush3.bf16.xpose.msra.mxu1 %v2394_v22 }
 0x69d   : > { %5775 = vmatprep.subr.bf16.mxu0 %v7591_v17  ;;  %5781 = vmatprep.subr.bf16.mxu1 %v7591_v17 }
 0x69e   : > { %v2438_v23 = vpop.permute.xlu1 %2437  ;;  %v2487_v24 = vpop.permute.xlu0 %2486 }
 0x69f   : > { %v2443_v25 = vsel %vm2242_vm3, %v2438_v23, 0  ;;  %v2492_v26 = vsel %vm2242_vm3, %v2487_v24, 0 }
 0x6a2   : > { %v2536_v27 = vpop.permute.xlu1 %2535  ;;  %v2585_v28 = vpop.permute.xlu0 %2584 }
 0x6a3   : > { %5766 = vmatmul.mubr.msk.bf16.vlgmr.msra.gmra.mrb[4].mxu0 %vm2242_vm3, %v2205_v6  ;;  %5772 = vmatmul.mubr.msk.bf16.vlgmr.msra.gmra.mrb[12].mxu1 %vm2242_vm3, %v2206_v5  ;;  %v2541_v29 = vsel %vm2242_vm3, %v2536_v27, 0  ;;  %v2590_v30 = vsel %vm2242_vm3, %v2585_v28, 0 }
 0x6a4   : > { %5776 = vmatpush3.bf16.xpose.msra.mxu0 %v2443_v25  ;;  %5782 = vmatpush3.bf16.xpose.msra.mxu1 %v2492_v26 }
 0x6a5   : > { %5777 = vmatprep.mubr.msk.bf16.mxu0 %vm7592_vm2, %v7591_v17  ;;  %5783 = vmatprep.mubr.msk.bf16.mxu1 %vm7592_vm2, %v7591_v17 }
 0x6a6   : > { %5787 = vmatprep.subr.bf16.mxu0 %v7591_v17  ;;  %5793 = vmatprep.subr.bf16.mxu1 %v7591_v17 }
 0x6ab   : > { %5778 = vmatmul.mubr.msk.bf16.vlgmr.msra.gmra.mrb[8].mxu0 %vm2242_vm3, %v2207_v11  ;;  %5784 = vmatmul.mubr.msk.bf16.vlgmr.msra.gmra.mrb[16].mxu1 %vm2242_vm3, %v2208_v10 }
 0x6ac   : > { %5788 = vmatpush3.bf16.xpose.msra.mxu0 %v2541_v29  ;;  %5794 = vmatpush3.bf16.xpose.msra.mxu1 %v2590_v30 }
 0x6ad   : > { %5789 = vmatprep.mubr.msk.bf16.mxu0 %vm7592_vm2, %v7591_v17  ;;  %5795 = vmatprep.mubr.msk.bf16.mxu1 %vm7592_vm2, %v7591_v17 }
 0x6ae   : > { %5799 = vmatprep.subr.bf16.mxu0 %v7591_v17  ;;  %5805 = vmatprep.subr.bf16.mxu1 %v7591_v17 }
 0x6b3   : > { %5790 = vmatmul.mubr.msk.bf16.vlgmr.msra.gmra.mrb[12].mxu0 %vm2242_vm3, %v2209_v18  ;;  %5796 = vmatmul.mubr.msk.bf16.vlgmr.msra.gmra.mrb[20].mxu1 %vm2242_vm3, %v2210_v16 }
 0x6b4   : > { %5800 = vmatpush3.bf16.msra.mxu0 %v2733_v33  ;;  %5806 = vmatpush3.bf16.msra.mxu1 %v2779_v36 }
 0x6b5   : > { %5807 = vmatprep.mubr.msk.bf16.mxu1 %vm7592_vm2, %v7591_v17  ;;  %5817 = vmatprep.subr.bf16.mxu1 %v7591_v17 }
 0x6b6   : > { %5801 = vmatprep.mubr.msk.bf16.mxu0 %vm7592_vm2, %v7591_v17  ;;  %5811 = vmatprep.subr.bf16.mxu0 %v7591_v17 }
 0x704   : > { %v2332_v38 = vpop.f32.mrb[8].mxu1 }
 0x705   : > { %v2333_v39 = vadd.f32 %v2332_v38, %v2179_v37  ;;  %v5761_v40 = vpop.f32.mrb[9].mxu1 }
 0x706   : > { %v2335_v41 = vpop.f32.mrb[10].mxu1 }
 0x707   : > { %v5762_v42 = vpop.f32.mrb[11].mxu1  ;;  %v2283_v43 = vpop.f32.mrb[0].mxu0  ;;  %v2635_v44 = vsel %vm2242_vm3, %v2333_v39, -inf }
 0x708   : > { %v2284_v45 = vadd.f32 %v2283_v43, %v2179_v37  ;;  %2636 = vmax.xlane.f32.xlu0 %v2635_v44  ;;  %v5755_v46 = vpop.f32.mrb[1].mxu0 }
 0x709   : > { %v2286_v49 = vpop.f32.mrb[2].mxu0 }
 0x70a   : > { %v5756_v50 = vpop.f32.mrb[3].mxu0  ;;  %v2632_v51 = vsel %vm2242_vm3, %v2284_v45, -inf }
 0x70b   : > { %2633 = vmax.xlane.f32.xlu1 %v2632_v51 }
 0x776   : > { %v2381_v52 = vpop.f32.mrb[4].mxu0  ;;  %v2430_v53 = vpop.f32.mrb[12].mxu1 }
 0x777   : > { %v2382_v54 = vadd.f32 %v2381_v52, %v2179_v37  ;;  %v5767_v55 = vpop.f32.mrb[5].mxu0  ;;  %v5773_v56 = vpop.f32.mrb[13].mxu1  ;;  %v2431_v59 = vadd.f32 %v2430_v53, %v2179_v37 }
 0x778   : > { %v2384_v57 = vpop.f32.mrb[6].mxu0  ;;  %v2433_v58 = vpop.f32.mrb[14].mxu1 }
 0x779   : > { %v5768_v61 = vpop.f32.mrb[7].mxu0  ;;  %v5774_v62 = vpop.f32.mrb[15].mxu1  ;;  %v2638_v63 = vsel %vm2242_vm3, %v2382_v54, -inf  ;;  %v2641_v0 = vsel %vm2242_vm3, %v2431_v59, -inf }
 0x77a   : > { %2639 = vmax.xlane.f32.xlu0 %v2638_v63 }
 0x77e   : > { %v2479_v1 = vpop.f32.mrb[8].mxu0  ;;  %2642 = vmax.xlane.f32.xlu0 %v2641_v0  ;;  %v2528_v4 = vpop.f32.mrb[16].mxu1 }
 0x77f   : > { %v2480_v5 = vadd.f32 %v2479_v1, %v2179_v37  ;;  %v2529_v6 = vadd.f32 %v2528_v4, %v2179_v37  ;;  %v5779_v7 = vpop.f32.mrb[9].mxu0  ;;  %v5785_v8 = vpop.f32.mrb[17].mxu1 }
 0x780   : > { %v2482_v9 = vpop.f32.mrb[10].mxu0  ;;  %v2531_v10 = vpop.f32.mrb[18].mxu1 }
 0x781   : > { %v5780_v11 = vpop.f32.mrb[11].mxu0  ;;  %v5786_v12 = vpop.f32.mrb[19].mxu1  ;;  %v2644_v13 = vsel %vm2242_vm3, %v2480_v5, -inf  ;;  %v2647_v14 = vsel %vm2242_vm3, %v2529_v6, -inf }
 0x782   : > { %2645 = vmax.xlane.f32.xlu1 %v2644_v13  ;;  %2648 = vmax.xlane.f32.xlu0 %v2647_v14 }
 0x786   : > { %v2577_v15 = vpop.f32.mrb[12].mxu0  ;;  %v2626_v16 = vpop.f32.mrb[20].mxu1 }
 0x787   : > { %v2578_v18 = vadd.f32 %v2577_v15, %v2179_v37  ;;  %v2627_v19 = vadd.f32 %v2626_v16, %v2179_v37  ;;  %v5791_v20 = vpop.f32.mrb[13].mxu0  ;;  %v5797_v21 = vpop.f32.mrb[21].mxu1 }
 0x788   : > { %v2580_v22 = vpop.f32.mrb[14].mxu0  ;;  %v2629_v23 = vpop.f32.mrb[22].mxu1 }
 0x789   : > { %v5792_v24 = vpop.f32.mrb[15].mxu0  ;;  %v5798_v25 = vpop.f32.mrb[23].mxu1  ;;  %v2650_v26 = vsel %vm2242_vm3, %v2578_v18, -inf  ;;  %v2653_v27 = vsel %vm2242_vm3, %v2627_v19, -inf }
 0x78a   : > { %2651 = vmax.xlane.f32.xlu1 %v2650_v26  ;;  %2654 = vmax.xlane.f32.xlu0 %v2653_v27 }
 0x795   : > { %v2637_v28 = vpop.xlane.xlu0 %2636 }
 0x796   : > { %v2657_v29 = vsub.f32 %v2333_v39, %v2637_v28 }
 0x798   : > { %v2666_v30 = vmul.f32 1.442695, %v2657_v29  ;;  %v2634_v33 = vpop.xlane.xlu1 %2633 }
 0x799   : > { %v2656_v36 = vsub.f32 %v2284_v45, %v2634_v33 }
 0x79a   : > { %6408 = vpow2.f32 %v2666_v30 }
 0x79b   : > { %6261 = vrot.lane.b32.xlu1 %v8669_v60, %s7594_s4  ;;  %v2664_v37 = vmul.f32 1.442695, %v2656_v36 }
 0x79d   : > { %6410 = vpow2.f32 %v2664_v37 }
 0x7a4   : > { %v6409_v31 = vpop.eup %6408 }
 0x7a5   : > { %v2683_v32 = vsel %vm2242_vm3, %v6409_v31, 0.0 }
 0x7a6   : > { %2684 = vadd.xlane.f32.xlu0 %v2683_v32 }
 0x7a7   : > { %v8737_v38 = vpop.eup %6410 }
 0x7a8   : > { %v2680_v40 = vsel %vm2242_vm3, %v8737_v38, 0.0 }
 0x7bf   : > { %2681 = vadd.xlane.f32.xlu1 %v2680_v40 }
 0x807   : > { %v2640_v39 = vpop.xlane.xlu0 %2639 }
 0x808   : > { %v2658_v41 = vsub.f32 %v2382_v54, %v2640_v39 }
 0x80a   : > { %v2668_v42 = vmul.f32 1.442695, %v2658_v41 }
 0x80b   : > { %v2643_v43 = vpop.xlane.xlu0 %2642 }
 0x80c   : > { %6412 = vpow2.f32 %v2668_v42  ;;  %v2659_v44 = vsub.f32 %v2431_v59, %v2643_v43 }
 0x80e   : > { %v2670_v46 = vmul.f32 1.442695, %v2659_v44 }
 0x80f   : > { %v2646_v49 = vpop.xlane.xlu1 %2645  ;;  %v2649_v50 = vpop.xlane.xlu0 %2648 }
 0x810   : > { %6414 = vpow2.f32 %v2670_v46  ;;  %v2660_v51 = vsub.f32 %v2480_v5, %v2646_v49  ;;  %v2661_v45 = vsub.f32 %v2529_v6, %v2649_v50 }
 0x812   : > { %v2672_v52 = vmul.f32 1.442695, %v2660_v51  ;;  %v2674_v53 = vmul.f32 1.442695, %v2661_v45 }
 0x814   : > { %6416 = vpow2.f32 %v2672_v52 }
 0x815   : > { %6418 = vpow2.f32 %v2674_v53 }
 0x816   : > { %v6413_v55 = vpop.eup %6412 }
 0x817   : > { %v2652_v56 = vpop.xlane.xlu1 %2651  ;;  %v2655_v57 = vpop.xlane.xlu0 %2654  ;;  %v2686_v58 = vsel %vm2242_vm3, %v6413_v55, 0.0 }
 0x818   : > { %v2662_v54 = vsub.f32 %v2578_v18, %v2652_v56  ;;  %v2663_v61 = vsub.f32 %v2627_v19, %v2655_v57  ;;  %2687 = vadd.xlane.f32.xlu1 %v2686_v58 }
 0x81a   : > { %v6415_v62 = vpop.eup %6414  ;;  %v2676_v59 = vmul.f32 1.442695, %v2662_v54  ;;  %v2678_v63 = vmul.f32 1.442695, %v2663_v61 }
 0x81b   : > { %v2689_v0 = vsel %vm2242_vm3, %v6415_v62, 0.0  ;;  %v6262_v12 = vpop.permute.xlu1 %6261 }
 0x81c   : > { %6420 = vpow2.f32 %v2676_v59  ;;  %2690 = vadd.xlane.f32.xlu0 %v2689_v0  ;;  %v6264_v13 = vunpack.i.h.bf16 %v6262_v12  ;;  %v6263_v21 = vunpack.i.l.bf16 %v6262_v12 }
 0x81d   : > { %6422 = vpow2.f32 %v2678_v63 }
 0x81e   : > { %v8743_v1 = vpop.eup %6416  ;;  %v2234_v15 = vpack.c.bf16 %v6264_v13, %v6264_v13  ;;  %v2233_v23 = vpack.c.bf16 %v6263_v21, %v6263_v21 }
 0x81f   : > { %v8745_v4 = vpop.eup %6418  ;;  %v2692_v5 = vsel %vm2242_vm3, %v8743_v1, 0.0 }
 0x820   : > { %2693 = vadd.xlane.f32.xlu1 %v2692_v5  ;;  %v2695_v6 = vsel %vm2242_vm3, %v8745_v4, 0.0  ;;  %v2871_v19 = vsel %vm2731_vm4, %v2234_v15, 0 }
 0x821   : > { %2696 = vadd.xlane.f32.xlu0 %v2695_v6 }
 0x826   : > { %v8751_v7 = vpop.eup %6420 }
 0x827   : > { %v8753_v8 = vpop.eup %6422  ;;  %v2698_v9 = vsel %vm2242_vm3, %v8751_v7, 0.0 }
 0x828   : > { %2699 = vadd.xlane.f32.xlu1 %v2698_v9  ;;  %v2701_v10 = vsel %vm2242_vm3, %v8753_v8, 0.0 }
 0x829   : > { %2702 = vadd.xlane.f32.xlu0 %v2701_v10 }
 0x833   : > { %v2685_v11 = vpop.xlane.xlu0 %2684 }
 0x834   : > { %6424 = vrcp.f32 %v2685_v11 }
 0x839   : > { %6271 = vrot.lane.b32.xlu1 %v8669_v60, %s7595_s15 }
 0x83e   : > { %v6425_v14 = vpop.eup %6424 }
 0x83f   : > { %v2713_v16 = vmul.f32 %v6425_v14, %v6409_v31  ;;  %6266 = vrot.lane.b32.xlu0 %v8669_v60, %s7593_s14  ;;  %v2825_v60 = vsel %vm2731_vm4, %v2233_v23, 0 }
 0x841   : > { %v2721_v18 = vpack.c.bf16 %v2713_v16, %v2713_v16 }
 0x843   : > { %5808 = vmatmul.mubr.msk.bf16.vlgmr.msra.gmra.mrb[24].mxu1 %vm2242_vm3, %v2721_v18 }
 0x844   : > { %5818 = vmatpush3.bf16.msra.mxu1 %v2871_v19  ;;  %5819 = vmatprep.mubr.msk.bf16.mxu1 %vm7592_vm2, %v7591_v17 }
 0x845   : > { %5829 = vmatprep.subr.bf16.mxu1 %v7591_v17 }
 0x84c   : > { %v2682_v20 = vpop.xlane.xlu1 %2681 }
 0x84d   : > { %6426 = vrcp.f32 %v2682_v20 }
 0x857   : > { %v6427_v22 = vpop.eup %6426 }
 0x858   : > { %v2712_v24 = vmul.f32 %v6427_v22, %v8737_v38 }
 0x85a   : > { %v2720_v25 = vpack.c.bf16 %v2712_v24, %v2712_v24  ;;  %v6384_v24 = vld [vmem:[%s9344_s23] sm:$0xff]   ;;  %s9346_s23 = scalar_lea.vmem [#allocation18], %s8547_s8 }
 0x85c   : > { %5802 = vmatmul.mubr.msk.bf16.vlgmr.msra.gmra.mrb[16].mxu0 %vm2242_vm3, %v2720_v25 }
 0x85d   : > { %5812 = vmatpush3.bf16.msra.mxu0 %v2825_v60  ;;  %5813 = vmatprep.mubr.msk.bf16.mxu0 %vm7592_vm2, %v7591_v17  ;;  %v6385_v60 = vld [vmem:[%s9345_s12 + $0x8] sm:$0xff]   ;;  %s7599_s12 = smov 24  }
 0x85e   : > { %5823 = vmatprep.subr.bf16.mxu0 %v7591_v17 }
 0x8a5   : > { %v2688_v26 = vpop.xlane.xlu1 %2687 }
 0x8a6   : > { %6428 = vrcp.f32 %v2688_v26 }
 0x8a9   : > { %v2691_v27 = vpop.xlane.xlu0 %2690 }
 0x8aa   : > { %6430 = vrcp.f32 %v2691_v27 }
 0x8ad   : > { %v2694_v28 = vpop.xlane.xlu1 %2693 }
 0x8ae   : > { %v2697_v29 = vpop.xlane.xlu0 %2696  ;;  %6432 = vrcp.f32 %v2694_v28 }
 0x8af   : > { %6434 = vrcp.f32 %v2697_v29 }
 0x8b0   : > { %v6429_v30 = vpop.eup %6428 }
 0x8b1   : > { %v2714_v31 = vmul.f32 %v6429_v30, %v6413_v55 }
 0x8b3   : > { %v2722_v32 = vpack.c.bf16 %v2714_v31, %v2714_v31 }
 0x8b4   : > { %v6431_v33 = vpop.eup %6430 }
 0x8b5   : > { %v2715_v36 = vmul.f32 %v6431_v33, %v6415_v62  ;;  %5814 = vmatmul.mubr.msk.bf16.vlgmr.msra.gmra.mrb[20].mxu0 %vm2242_vm3, %v2722_v32  ;;  %v2700_v37 = vpop.xlane.xlu1 %2699 }
 0x8b6   : > { %v2703_v38 = vpop.xlane.xlu0 %2702  ;;  %5825 = vmatprep.mubr.msk.bf16.mxu0 %vm7592_vm2, %v7591_v17  ;;  %6436 = vrcp.f32 %v2700_v37 }
 0x8b7   : > { %v2723_v40 = vpack.c.bf16 %v2715_v36, %v2715_v36  ;;  %6438 = vrcp.f32 %v2703_v38 }
 0x8b8   : > { %v6433_v39 = vpop.eup %6432 }
 0x8b9   : > { %v6272_v41 = vpop.permute.xlu1 %6271  ;;  %5820 = vmatmul.mubr.msk.bf16.vlgmr.msra.gmra.mrb[28].mxu1 %vm2242_vm3, %v2723_v40  ;;  %v6435_v42 = vpop.eup %6434  ;;  %v2716_v51 = vmul.f32 %v6433_v39, %v8743_v1 }
 0x8ba   : > { %v6267_v43 = vpop.permute.xlu0 %6266  ;;  %5831 = vmatprep.mubr.msk.bf16.mxu1 %vm7592_vm2, %v7591_v17  ;;  %v6274_v44 = vunpack.i.h.bf16 %v6272_v41  ;;  %v6273_v46 = vunpack.i.l.bf16 %v6272_v41  ;;  %v2717_v45 = vmul.f32 %v6435_v42, %v8745_v4 }
 0x8bb   : > { %v6269_v49 = vunpack.i.h.bf16 %v6267_v43  ;;  %v6268_v50 = vunpack.i.l.bf16 %v6267_v43  ;;  %v2724_v61 = vpack.c.bf16 %v2716_v51, %v2716_v51 }
 0x8bc   : > { %v2238_v55 = vpack.c.bf16 %v6274_v44, %v6274_v44  ;;  %v2237_v56 = vpack.c.bf16 %v6273_v46, %v6273_v46  ;;  %v2725_v62 = vpack.c.bf16 %v2717_v45, %v2717_v45 }
 0x8bd   : > { %v2236_v52 = vpack.c.bf16 %v6269_v49, %v6269_v49  ;;  %v2235_v53 = vpack.c.bf16 %v6268_v50, %v6268_v50 }
 0x8be   : > { %v3009_v63 = vsel %vm2731_vm4, %v2237_v56, 0  ;;  %v3055_v0 = vsel %vm2731_vm4, %v2238_v55, 0 }
 0x8bf   : > { %v2917_v57 = vsel %vm2731_vm4, %v2235_v53, 0  ;;  %v2963_v58 = vsel %vm2731_vm4, %v2236_v52, 0 }
 0x8c0   : > { %5824 = vmatpush3.bf16.msra.mxu0 %v2917_v57  ;;  %5830 = vmatpush3.bf16.msra.mxu1 %v2963_v58  ;;  %v6437_v54 = vpop.eup %6436 }
 0x8c1   : > { %5835 = vmatprep.subr.bf16.mxu0 %v7591_v17  ;;  %5841 = vmatprep.subr.bf16.mxu1 %v7591_v17  ;;  %v6439_v59 = vpop.eup %6438  ;;  %v2718_v1 = vmul.f32 %v6437_v54, %v8751_v7 }
 0x8c2   : > { %v2719_v4 = vmul.f32 %v6439_v59, %v8753_v8 }
 0x8c3   : > { %5826 = vmatmul.mubr.msk.bf16.vlgmr.msra.gmra.mrb[24].mxu0 %vm2242_vm3, %v2724_v61  ;;  %5832 = vmatmul.mubr.msk.bf16.vlgmr.msra.gmra.mrb[32].mxu1 %vm2242_vm3, %v2725_v62  ;;  %v2726_v5 = vpack.c.bf16 %v2718_v1, %v2718_v1  ;;  %v5561_v1 = vld [vmem:[%s9346_s23] ss:$0 sm:$0xff]  ;;  %s9347_s23 = scalar_lea.vmem [#allocation19], %s8550_s9 }
 0x8c4   : > { %5836 = vmatpush3.bf16.msra.mxu0 %v3009_v63  ;;  %5842 = vmatpush3.bf16.msra.mxu1 %v3055_v0  ;;  %v2727_v6 = vpack.c.bf16 %v2719_v4, %v2719_v4  ;;  %s9348_s19 = smov %s9347_s23 }
 0x8c5   : > { %5837 = vmatprep.mubr.msk.bf16.mxu0 %vm7592_vm2, %v7591_v17  ;;  %5843 = vmatprep.mubr.msk.bf16.mxu1 %vm7592_vm2, %v7591_v17 }
 0x8c6   : > { %5847 = vmatprep.subr.bf16.mxu0 %v7591_v17  ;;  %5855 = vmatprep.subr.bf16.mxu1 %v7591_v17 }
 0x8cb   : > { %5838 = vmatmul.mubr.msk.bf16.vlgmr.msra.gmra.mrb[28].mxu0 %vm2242_vm3, %v2726_v5  ;;  %5844 = vmatmul.mubr.msk.bf16.vlgmr.msra.gmra.mrb[36].mxu1 %vm2242_vm3, %v2727_v6 }
 0x8cc   : > { %5851 = vmatprep.mubr.msk.bf16.mxu0 %vm7592_vm2, %v7591_v17  ;;  %5859 = vmatprep.mubr.msk.bf16.mxu1 %vm7592_vm2, %v7591_v17 }
 0x8cd   : > { %5848 = vmatpush3.bf16.msra.mxu0 %v6384_v24  ;;  %v6387_v24 = vld [vmem:[%s1646_s26 + $0x8] sm:$0xff]  }
 0x8ce   : > { %5849 = vmatprep.subr.bf16.mxu0 %v7591_v17 }
 0x8d1   : > { %5850 = vmatpush3.bf16.msra.mxu0 %v6385_v60  ;;  %v6389_v60 = vld [vmem:[#allocation7 + $0x8] sm:$0xff]  }
 0x916   : > { %v2815_v7 = vpop.f32.mrb[24].mxu1 }
 0x917   : > { %v5809_v8 = vpop.f32.mrb[25].mxu1 }
 0x918   : > { %v2818_v9 = vpop.f32.mrb[26].mxu1 }
 0x919   : > { %v5810_v10 = vpop.f32.mrb[27].mxu1 }
 0x92f   : > { %v2769_v11 = vpop.f32.mrb[16].mxu0 }
 0x930   : > { %v5803_v12 = vpop.f32.mrb[17].mxu0 }
 0x931   : > { %v2772_v13 = vpop.f32.mrb[18].mxu0 }
 0x932   : > { %v5804_v14 = vpop.f32.mrb[19].mxu0 }
 0x988   : > { %v2861_v15 = vpop.f32.mrb[20].mxu0 }
 0x989   : > { %v5815_v16 = vpop.f32.mrb[21].mxu0 }
 0x98a   : > { %v2864_v18 = vpop.f32.mrb[22].mxu0 }
 0x98b   : > { %v5816_v19 = vpop.f32.mrb[23].mxu0 }
 0x98c   : > { %v2907_v20 = vpop.f32.mrb[28].mxu1 }
 0x98d   : > { %v6275_v21 = vpack.i.bf16 %v2907_v20, %v2861_v15  ;;  %v5821_v22 = vpop.f32.mrb[29].mxu1 }
 0x98e   : > { %v2910_v23 = vpop.f32.mrb[30].mxu1 }
 0x98f   : > { %6276 = vrot.lane.b32.xlu1 %v6275_v21, %s7597_s17  ;;  %v5822_v25 = vpop.f32.mrb[31].mxu1  ;;  %v6386_v23 = vld [vmem:[%s1646_s26] sm:$0xff]   ;;  %s9354_s26 = scalar_lea.vmem [#allocation32], %s8547_s8 }
 0x990   : > { %5863 = vmatprep.subr.bf16.mxu0 %v6386_v23  ;;  %v6388_v25 = vld [vmem:[#allocation7] sm:$0xff]  }
 0x996   : > { %v2953_v26 = vpop.f32.mrb[24].mxu0  ;;  %v2999_v27 = vpop.f32.mrb[32].mxu1 }
 0x997   : > { %v6280_v28 = vpack.i.bf16 %v2999_v27, %v2953_v26  ;;  %v5827_v29 = vpop.f32.mrb[25].mxu0  ;;  %v5833_v30 = vpop.f32.mrb[33].mxu1  ;;  %v6390_v26 = vld [vmem:[%s9347_s23] sm:$0xff]   ;;  %v6391_v27 = vld [vmem:[%s9348_s19 + $0x8] sm:$0xff]  }
 0x998   : > { %v2956_v31 = vpop.f32.mrb[26].mxu0  ;;  %v3002_v32 = vpop.f32.mrb[34].mxu1  ;;  %5856 = vmatpush3.bf16.msra.mxu1 %v6390_v26 }
 0x999   : > { %v5828_v33 = vpop.f32.mrb[27].mxu0  ;;  %6281 = vrot.lane.b32.xlu1 %v6280_v28, %s7598_s22  ;;  %v5834_v36 = vpop.f32.mrb[35].mxu1  ;;  %5857 = vmatprep.subr.bf16.mxu1 %v7591_v17  ;;  %v6392_v28 = vld [vmem:[%s1663_s1] sm:$0xff]  }
 0x99c   : > { %5858 = vmatpush3.bf16.msra.mxu1 %v6391_v27 }
 0x99d   : > { %5871 = vmatprep.subr.bf16.mxu1 %v6392_v28 }
 0x99e   : > { %v3045_v37 = vpop.f32.mrb[28].mxu0  ;;  %v3091_v38 = vpop.f32.mrb[36].mxu1 }
 0x99f   : > { %v6285_v40 = vpack.i.bf16 %v3091_v38, %v3045_v37  ;;  %v5839_v39 = vpop.f32.mrb[29].mxu0  ;;  %v5845_v41 = vpop.f32.mrb[37].mxu1  ;;  %v5565_v38 = vld [vmem:[%s1712_s13] ss:$0 sm:$0xff]  ;;  %s9350_s13 = smov 96  }
 0x9a0   : > { %v3048_v42 = vpop.f32.mrb[30].mxu0  ;;  %v3094_v43 = vpop.f32.mrb[38].mxu1 }
 0x9a1   : > { %v5840_v44 = vpop.f32.mrb[31].mxu0  ;;  %6286 = vrot.lane.b32.xlu0 %v6285_v40, %s7599_s12  ;;  %v5846_v46 = vpop.f32.mrb[39].mxu1  ;;  %v5566_v42 = vld [vmem:[%s1720_s6] ss:$0 sm:$0xff]  ;;  %s9349_s6 = scalar_lea.vmem [#allocation26], %s8547_s8 }
 0xa01   : > { %v6277_v49 = vpop.permute.xlu1 %6276 }
 0xa02   : > { %v6279_v51 = vunpack.i.h.bf16 %v6277_v49  ;;  %v6278_v45 = vunpack.i.l.bf16 %v6277_v49 }
 0xa04   : > { %v3122_v56 = vsel %vm2242_vm3, %v2815_v7, %v6279_v51  ;;  %v3121_v57 = vsel %vm2242_vm3, %v2769_v11, %v6278_v45  ;;  %v6394_v45 = vld [vmem:[#allocation5] sm:$0xff]  }
 0xa0b   : > { %v6282_v50 = vpop.permute.xlu1 %6281 }
 0xa0c   : > { %v6284_v52 = vunpack.i.h.bf16 %v6282_v50  ;;  %v6283_v53 = vunpack.i.l.bf16 %v6282_v50 }
 0xa0e   : > { %v3125_v61 = vsel %vm3123_vm5, %v3122_v56, %v6284_v52  ;;  %v3124_v62 = vsel %vm3123_vm5, %v3121_v57, %v6283_v53  ;;  %v6393_v53 = vld [vmem:[%s1663_s1 + $0x8] sm:$0xff]   ;;  %s9356_s1 = scalar_lea.vmem [#allocation36], %s8547_s8 }
 0xa13   : > { %v6287_v55 = vpop.permute.xlu0 %6286 }
 0xa14   : > { %v6289_v58 = vunpack.i.h.bf16 %v6287_v55  ;;  %v6288_v54 = vunpack.i.l.bf16 %v6287_v55  ;;  %v6395_v55 = vld [vmem:[#allocation5 + $0x8] sm:$0xff]  }
 0xa16   : > { %v3128_v59 = vsel %vm3126_vm6, %v3125_v61, %v6289_v58  ;;  %v3127_v63 = vsel %vm3126_vm6, %v3124_v62, %v6288_v54 }
 0xa17   : > { %v3129_v0 = vpack.c.bf16 %v3128_v59, %v3127_v63 }
 0xa19   : > { %5852 = vmatmul.mubr.msk.bf16.vlgmr.msra.gmra.mrb[32].mxu0 %vm1984_vm1, %v3129_v0 }
 0xa1a   : > { %5864 = vmatpush3.bf16.msra.mxu0 %v6386_v23  ;;  %5867 = vmatprep.mubr.msk.bf16.mxu0 %vm1984_vm1, %v6388_v25 }
 0xa1b   : > { %5865 = vmatprep.subr.bf16.mxu0 %v6387_v24 }
 0xa1e   : > { %5866 = vmatpush3.bf16.msra.mxu0 %v6387_v24 }
 0xa1f   : > { %5879 = vmatprep.subr.bf16.mxu0 %v7591_v17 }
 0xa21   : > { %5868 = vmatmul.mubr.msk.bf16.vlgmr.msra.gmra.mrb[36].mxu0 %vm1984_vm1, %v6389_v60 }
 0xa22   : > { %5881 = vmatprep.mubr.msk.bf16.mxu0 %vm7592_vm2, %v7591_v17 }
 0xaec   : > { %v3185_v4 = vpop.f32.mrb[32].mxu0 }
 0xaed   : > { %v3186_v5 = vadd.f32 %v5561_v1, %v3185_v4  ;;  %v5853_v6 = vpop.f32.mrb[33].mxu0 }
 0xaee   : > { %v3188_v7 = vpop.f32.mrb[34].mxu0 }
 0xaef   : > { %v8822_v8 = vadd.f32 %v3186_v5, %v8593_v2  ;;  %v3189_v9 = vadd.f32 %v5561_v1, %v3188_v7  ;;  %v5854_v10 = vpop.f32.mrb[35].mxu0 }
 0xaf1   : > { %v8825_v11 = vadd.f32 %v3189_v9, %v8595_v3  ;;  %v3196_v12 = vsel %vm1984_vm1, %v8822_v8, 0.0 }
 0xaf2   : > { %3197 = vadd.xlane.f32.xlu1 %v3196_v12 }
 0xaf3   : > { %v3199_v13 = vsel %vm1984_vm1, %v8825_v11, 0.0 }
 0xaf4   : > { %3200 = vadd.xlane.f32.xlu0 %v3199_v13  ;;  %v5567_v13 = vld [vmem:[%s1637_s7] ss:$0 sm:$0xff] }
 0xb7f   : > { %v3198_v14 = vpop.xlane.xlu1 %3197 }
 0xb80   : > { %v3202_v15 = vmul.f32 0.03125, %v3198_v14 }
 0xb81   : > { %v3201_v16 = vpop.xlane.xlu0 %3200 }
 0xb82   : > { %v3204_v2 = vsub.f32 %v8822_v8, %v3202_v15  ;;  %v3203_v18 = vmul.f32 0.03125, %v3201_v16 }
 0xb84   : > { %v3205_v19 = vsub.f32 %v8825_v11, %v3203_v18  ;;  %v3206_v3 = vmul.f32 %v3204_v2, %v3204_v2 }
 0xb86   : > { %v3208_v20 = vsel %vm1984_vm1, %v3206_v3, 0.0  ;;  %v3207_v21 = vmul.f32 %v3205_v19, %v3205_v19 }
 0xb87   : > { %3209 = vadd.xlane.f32.xlu0 %v3208_v20 }
 0xb88   : > { %v3211_v22 = vsel %vm1984_vm1, %v3207_v21, 0.0 }
 0xb8b   : > { %3212 = vadd.xlane.f32.xlu0 %v3211_v22 }
 0xc14   : > { %v3210_v29 = vpop.xlane.xlu0 %3209 }
 0xc15   : > { %v3214_v30 = vmul.f32 0.03125, %v3210_v29 }
 0xc17   : > { %v3216_v31 = vadd.f32 1e-05, %v3214_v30 }
 0xc18   : > { %v3213_v32 = vpop.xlane.xlu0 %3212 }
 0xc19   : > { %6440 = vrsqrt.f32 %v3216_v31  ;;  %v3215_v33 = vmul.f32 0.03125, %v3213_v32 }
 0xc1b   : > { %v3217_v36 = vadd.f32 1e-05, %v3215_v33 }
 0xc1d   : > { %6442 = vrsqrt.f32 %v3217_v36 }
 0xc23   : > { %v6441_v37 = vpop.eup %6440 }
 0xc24   : > { %v3220_v40 = vmul.f32 %v6441_v37, %v3204_v2 }
 0xc26   : > { %v3228_v39 = vmul.f32 %v5565_v38, %v3220_v40 }
 0xc27   : > { %v6443_v41 = vpop.eup %6442 }
 0xc28   : > { %v3221_v43 = vmul.f32 %v6443_v41, %v3205_v19  ;;  %v3236_v46 = vadd.f32 %v5566_v42, %v3228_v39 }
 0xc2a   : > { %v3229_v44 = vmul.f32 %v5565_v38, %v3221_v43  ;;  %v3238_v50 = vadd.f32 %v3236_v46, %v8621_v34  ;;  %v5571_v34 = vld [vmem:[%s1654_s28] ss:$0 sm:$0xff]  ;;  %s9355_s28 = scalar_lea.vmem [#allocation34], %s8547_s8 }
 0xc2c   : > { %v3237_v49 = vadd.f32 %v5566_v42, %v3229_v44 }
 0xc2e   : > { %v3239_v51 = vadd.f32 %v3237_v49, %v8623_v35  ;;  %v5869_v35 = vpop.f32.mrb[36].mxu0 }
 0xc2f   : > { %v3398_v56 = vadd.f32 %v5869_v35, %v5571_v34  ;;  %v3389_v57 = vpop.f32.mrb[37].mxu0 }
 0xc30   : > { %v3245_v52 = vpack.c.bf16 %v3239_v51, %v3238_v50  ;;  %v3390_v58 = vadd.f32 %v5571_v34, %v3389_v57  ;;  %v5870_v54 = vpop.f32.mrb[38].mxu0 }
 0xc31   : > { %v3401_v61 = vadd.f32 %v5870_v54, %v5571_v34  ;;  %v3392_v62 = vpop.f32.mrb[39].mxu0 }
 0xc32   : > { %5860 = vmatmul.mubr.msk.bf16.vlgmr.msra.gmra.mrb[40].mxu1 %vm1984_vm1, %v3245_v52  ;;  %v3393_v59 = vadd.f32 %v5571_v34, %v3392_v62 }
 0xc33   : > { %5872 = vmatpush3.bf16.msra.mxu1 %v6392_v28  ;;  %5875 = vmatprep.mubr.msk.bf16.mxu1 %vm1984_vm1, %v6394_v45  ;;  %v6295_v63 = vpack.i.bf16 %v3401_v61, %v3398_v56  ;;  %v3568_v0 = vpack.c.bf16 %v3401_v61, %v3398_v56  ;;  %v5578_v61 = vld [vmem:[%s1671_s2] ss:$0 sm:$0xff] }
 0xc34   : > { %5873 = vmatprep.subr.bf16.mxu1 %v6393_v53  ;;  %v6290_v1 = vpack.i.bf16 %v3393_v59, %v3390_v58  ;;  %v3567_v4 = vpack.c.bf16 %v3393_v59, %v3390_v58 }
 0xc35   : > { %6296 = vrot.lane.b32.xlu0 %v6295_v63, %s7594_s4  ;;  %v3685_v5 = vsel %vm2242_vm3, %v3568_v0, 0 }
 0xc36   : > { %6291 = vrot.lane.b32.xlu1 %v6290_v1, %s7594_s4  ;;  %v3639_v6 = vsel %vm2242_vm3, %v3567_v4, 0 }
 0xc37   : > { %5874 = vmatpush3.bf16.msra.mxu1 %v6393_v53  ;;  %5880 = vmatpush3.bf16.xpose.msra.mxu0 %v3639_v6 }
 0xc38   : > { %5885 = vmatprep.subr.bf16.mxu1 %v7591_v17  ;;  %5891 = vmatprep.subr.bf16.mxu0 %v7591_v17 }
 0xc3a   : > { %5876 = vmatmul.mubr.msk.bf16.vlgmr.msra.gmra.mrb[44].mxu1 %vm1984_vm1, %v6395_v55  ;;  %6301 = vrot.lane.b32.xlu1 %v6290_v1, %s7593_s14 }
 0xc3b   : > { %5887 = vmatprep.mubr.msk.bf16.mxu1 %vm7592_vm2, %v7591_v17 }
 0xc40   : > { %5886 = vmatpush3.bf16.xpose.msra.mxu1 %v3685_v5 }
 0xc41   : > { %5897 = vmatprep.subr.bf16.mxu1 %v7591_v17 }
 0xca7   : > { %v6297_v12 = vpop.permute.xlu0 %6296 }
 0xca8   : > { %v6292_v7 = vpop.permute.xlu1 %6291  ;;  %v6299_v14 = vunpack.i.h.bf16 %v6297_v12  ;;  %v6298_v15 = vunpack.i.l.bf16 %v6297_v12 }
 0xca9   : > { %v6294_v9 = vunpack.i.h.bf16 %v6292_v7  ;;  %v6293_v10 = vunpack.i.l.bf16 %v6292_v7 }
 0xcaa   : > { %v3570_v20 = vpack.c.bf16 %v6299_v14, %v6298_v15 }
 0xcab   : > { %v3569_v16 = vpack.c.bf16 %v6294_v9, %v6293_v10 }
 0xcac   : > { %v3777_v26 = vsel %vm2242_vm3, %v3570_v20, 0  ;;  %v6302_v31 = vpop.permute.xlu1 %6301 }
 0xcad   : > { %v3731_v24 = vsel %vm2242_vm3, %v3569_v16, 0  ;;  %v6304_v32 = vunpack.i.h.bf16 %v6302_v31  ;;  %v6303_v33 = vunpack.i.l.bf16 %v6302_v31  ;;  %v5585_v16 = vld [vmem:[#allocation10] ss:$0 sm:$0xff] }
 0xcaf   : > { %v3571_v38 = vpack.c.bf16 %v6304_v32, %v6303_v33 }
 0xcb1   : > { %v3823_v50 = vsel %vm2242_vm3, %v3571_v38, 0 }
 0xd05   : > { %v3301_v2 = vpop.f32.mrb[40].mxu1 }
 0xd06   : > { %v3302_v18 = vadd.f32 %v5567_v13, %v3301_v2  ;;  %v5861_v19 = vpop.f32.mrb[41].mxu1 }
 0xd07   : > { %v3304_v3 = vpop.f32.mrb[42].mxu1 }
 0xd08   : > { %v3519_v21 = vpack.c.bf16 %v3302_v18, %v3302_v18  ;;  %v3305_v22 = vadd.f32 %v5567_v13, %v3304_v3  ;;  %v5862_v23 = vpop.f32.mrb[43].mxu1  ;;  %v5586_v3 = vld [vmem:[#allocation10 + $0x1] ss:$0 sm:$0xff] }
 0xd0a   : > { %v3520_v25 = vpack.c.bf16 %v3305_v22, %v3305_v22  ;;  %5882 = vmatmul.mubr.msk.bf16.vlgmr.msra.gmra.mrb[40].mxu0 %vm2242_vm3, %v3519_v21  ;;  %v6320_v60 = vpack.i.bf16 %v3305_v22, %v3302_v18 }
 0xd0b   : > { %5892 = vmatpush3.bf16.xpose.msra.mxu0 %v3731_v24  ;;  %5893 = vmatprep.mubr.msk.bf16.mxu0 %vm7592_vm2, %v7591_v17 }
 0xd0c   : > { %6321 = vrot.lane.b32.xlu0 %v6320_v60, %s7593_s14  ;;  %6306 = vrot.lane.b32.xlu1 %v6320_v60, %s7594_s4 }
 0xd0d   : > { %5888 = vmatmul.mubr.msk.bf16.vlgmr.msra.gmra.mrb[48].mxu1 %vm2242_vm3, %v3520_v25  ;;  %5903 = vmatprep.subr.bf16.mxu0 %v7591_v17  ;;  %v5877_v27 = vpop.f32.mrb[44].mxu1 }
 0xd0e   : > { %5898 = vmatpush3.bf16.xpose.msra.mxu1 %v3777_v26  ;;  %5899 = vmatprep.mubr.msk.bf16.mxu1 %vm7592_vm2, %v7591_v17  ;;  %v3477_v28 = vpop.f32.mrb[45].mxu1  ;;  %v8917_v7 = vadd.f32 %v5877_v27, %v5578_v61 }
 0xd0f   : > { %5909 = vmatprep.subr.bf16.mxu1 %v7591_v17  ;;  %v5878_v29 = vpop.f32.mrb[46].mxu1  ;;  %v8908_v0 = vadd.f32 %v5578_v61, %v3477_v28 }
 0xd10   : > { %6326 = vrot.lane.b32.xlu0 %v6295_v63, %s7595_s15  ;;  %6311 = vrot.lane.b32.xlu1 %v6295_v63, %s7593_s14  ;;  %v3480_v30 = vpop.f32.mrb[47].mxu1  ;;  %v8919_v9 = vadd.f32 %v5878_v29, %v5578_v61 }
 0xd12   : > { %v3616_v14 = vpack.c.bf16 %v8919_v9, %v8917_v7 }
 0xd14   : > { %6316 = vrot.lane.b32.xlu1 %v6290_v1, %s7595_s15  ;;  %v8910_v1 = vadd.f32 %v5578_v61, %v3480_v30 }
 0xd16   : > { %v3615_v10 = vpack.c.bf16 %v8910_v1, %v8908_v0 }
 0xd18   : > { %6331 = vrot.lane.b32.xlu1 %v6320_v60, %s7595_s15 }
 0xd7e   : > { %v6322_v36 = vpop.permute.xlu0 %6321  ;;  %v6307_v37 = vpop.permute.xlu1 %6306 }
 0xd7f   : > { %v6309_v40 = vunpack.i.h.bf16 %v6307_v37  ;;  %v6308_v39 = vunpack.i.l.bf16 %v6307_v37  ;;  %v6323_v51 = vunpack.i.l.bf16 %v6322_v36  ;;  %v6324_v57 = vunpack.i.h.bf16 %v6322_v36 }
 0xd81   : > { %v3522_v41 = vpack.c.bf16 %v6309_v40, %v6309_v40  ;;  %v3521_v42 = vpack.c.bf16 %v6308_v39, %v6308_v39  ;;  %v3523_v58 = vpack.c.bf16 %v6323_v51, %v6323_v51  ;;  %v3524_v4 = vpack.c.bf16 %v6324_v57, %v6324_v57 }
 0xd82   : > { %v6312_v43 = vpop.permute.xlu1 %6311  ;;  %v6327_v44 = vpop.permute.xlu0 %6326 }
 0xd83   : > { %v6314_v46 = vunpack.i.h.bf16 %v6312_v43  ;;  %v6313_v49 = vunpack.i.l.bf16 %v6312_v43  ;;  %5894 = vmatmul.mubr.msk.bf16.vlgmr.msra.gmra.mrb[44].mxu0 %vm2242_vm3, %v3521_v42  ;;  %5900 = vmatmul.mubr.msk.bf16.vlgmr.msra.gmra.mrb[52].mxu1 %vm2242_vm3, %v3522_v41  ;;  %v6329_v52 = vunpack.i.h.bf16 %v6327_v44  ;;  %v6328_v55 = vunpack.i.l.bf16 %v6327_v44 }
 0xd84   : > { %5904 = vmatpush3.bf16.xpose.msra.mxu0 %v3823_v50  ;;  %5905 = vmatprep.mubr.msk.bf16.mxu0 %vm7592_vm2, %v7591_v17 }
 0xd85   : > { %v3572_v45 = vpack.c.bf16 %v6314_v46, %v6313_v49  ;;  %5915 = vmatprep.subr.bf16.mxu0 %v7591_v17  ;;  %5911 = vmatprep.mubr.msk.bf16.mxu1 %vm7592_vm2, %v7591_v17  ;;  %v3574_v59 = vpack.c.bf16 %v6329_v52, %v6328_v55 }
 0xd86   : > { %v6317_v53 = vpop.permute.xlu1 %6316 }
 0xd87   : > { %v6319_v34 = vunpack.i.h.bf16 %v6317_v53  ;;  %v6318_v35 = vunpack.i.l.bf16 %v6317_v53  ;;  %v3869_v56 = vsel %vm2242_vm3, %v3572_v45, 0  ;;  %v3961_v6 = vsel %vm2242_vm3, %v3574_v59, 0 }
 0xd88   : > { %5910 = vmatpush3.bf16.xpose.msra.mxu1 %v3869_v56 }
 0xd89   : > { %v3573_v54 = vpack.c.bf16 %v6319_v34, %v6318_v35  ;;  %5921 = vmatprep.subr.bf16.mxu1 %v7591_v17 }
 0xd8a   : > { %v6332_v62 = vpop.permute.xlu1 %6331 }
 0xd8b   : > { %5906 = vmatmul.mubr.msk.bf16.vlgmr.msra.gmra.mrb[48].mxu0 %vm2242_vm3, %v3523_v58  ;;  %v3915_v63 = vsel %vm2242_vm3, %v3573_v54, 0  ;;  %v6333_v5 = vunpack.i.l.bf16 %v6332_v62  ;;  %v6334_v12 = vunpack.i.h.bf16 %v6332_v62 }
 0xd8c   : > { %5916 = vmatpush3.bf16.xpose.msra.mxu0 %v3915_v63  ;;  %5917 = vmatprep.mubr.msk.bf16.mxu0 %vm7592_vm2, %v7591_v17 }
 0xd8d   : > { %5927 = vmatprep.subr.bf16.mxu0 %v7591_v17  ;;  %v3525_v13 = vpack.c.bf16 %v6333_v5, %v6333_v5  ;;  %v3526_v15 = vpack.c.bf16 %v6334_v12, %v6334_v12 }
 0xd8f   : > { %5912 = vmatmul.mubr.msk.bf16.vlgmr.msra.gmra.mrb[56].mxu1 %vm2242_vm3, %v3524_v4 }
 0xd90   : > { %5922 = vmatpush3.bf16.xpose.msra.mxu1 %v3961_v6  ;;  %5923 = vmatprep.mubr.msk.bf16.mxu1 %vm7592_vm2, %v7591_v17 }
 0xd91   : > { %5933 = vmatprep.subr.bf16.mxu1 %v7591_v17 }
 0xd93   : > { %5918 = vmatmul.mubr.msk.bf16.vlgmr.msra.gmra.mrb[52].mxu0 %vm2242_vm3, %v3525_v13 }
 0xd94   : > { %5928 = vmatpush3.bf16.msra.mxu0 %v3615_v10  ;;  %5929 = vmatprep.mubr.msk.bf16.mxu0 %vm7592_vm2, %v7591_v17 }
 0xd95   : > { %5939 = vmatprep.subr.bf16.mxu0 %v7591_v17 }
 0xd97   : > { %5924 = vmatmul.mubr.msk.bf16.vlgmr.msra.gmra.mrb[60].mxu1 %vm2242_vm3, %v3526_v15 }
 0xd98   : > { %5934 = vmatpush3.bf16.msra.mxu1 %v3616_v14  ;;  %5935 = vmatprep.mubr.msk.bf16.mxu1 %vm7592_vm2, %v7591_v17 }
 0xd99   : > { %5945 = vmatprep.subr.bf16.mxu1 %v7591_v17 }
 0xddd   : > { %v3675_v2 = vpop.f32.mrb[40].mxu0 }
 0xdde   : > { %v3676_v18 = vadd.f32 %v5585_v16, %v3675_v2  ;;  %v5883_v19 = vpop.f32.mrb[41].mxu0 }
 0xddf   : > { %v3678_v20 = vpop.f32.mrb[42].mxu0 }
 0xde0   : > { %v3721_v21 = vpop.f32.mrb[48].mxu1  ;;  %v5884_v22 = vpop.f32.mrb[43].mxu0  ;;  %v4003_v23 = vsel %vm3123_vm5, %v3676_v18, -inf }
 0xde1   : > { %v3722_v24 = vadd.f32 %v5586_v3, %v3721_v21  ;;  %v5889_v25 = vpop.f32.mrb[49].mxu1  ;;  %4004 = vmax.xlane.f32.xlu0 %v4003_v23  ;;  %v6340_v21 = vpack.i.bf16 %v8919_v9, %v8917_v7 }
 0xde2   : > { %v3724_v60 = vpop.f32.mrb[50].mxu1 }
 0xde3   : > { %v5890_v26 = vpop.f32.mrb[51].mxu1  ;;  %v4006_v27 = vsel %vm3123_vm5, %v3722_v24, -inf }
 0xde4   : > { %4007 = vmax.xlane.f32.xlu1 %v4006_v27 }
 0xe56   : > { %v3767_v28 = vpop.f32.mrb[44].mxu0  ;;  %v3813_v29 = vpop.f32.mrb[52].mxu1 }
 0xe57   : > { %v3768_v30 = vadd.f32 %v5585_v16, %v3767_v28  ;;  %v5895_v31 = vpop.f32.mrb[45].mxu0  ;;  %v5901_v32 = vpop.f32.mrb[53].mxu1  ;;  %v3814_v37 = vadd.f32 %v5586_v3, %v3813_v29 }
 0xe58   : > { %v3770_v33 = vpop.f32.mrb[46].mxu0  ;;  %v3816_v36 = vpop.f32.mrb[54].mxu1 }
 0xe59   : > { %v5896_v38 = vpop.f32.mrb[47].mxu0  ;;  %v5902_v40 = vpop.f32.mrb[55].mxu1  ;;  %v4009_v39 = vsel %vm3123_vm5, %v3768_v30, -inf  ;;  %v4012_v41 = vsel %vm3123_vm5, %v3814_v37, -inf }
 0xe5a   : > { %4010 = vmax.xlane.f32.xlu0 %v4009_v39 }
 0xe5e   : > { %v3859_v42 = vpop.f32.mrb[48].mxu0  ;;  %4013 = vmax.xlane.f32.xlu0 %v4012_v41 }
 0xe5f   : > { %v8938_v43 = vadd.f32 %v5585_v16, %v3859_v42  ;;  %v5907_v44 = vpop.f32.mrb[49].mxu0 }
 0xe60   : > { %v3862_v46 = vpop.f32.mrb[50].mxu0 }
 0xe61   : > { %v5908_v49 = vpop.f32.mrb[51].mxu0  ;;  %v4015_v50 = vsel %vm3123_vm5, %v8938_v43, -inf }
 0xe62   : > { %4016 = vmax.xlane.f32.xlu0 %v4015_v50  ;;  %v3905_v51 = vpop.f32.mrb[56].mxu1 }
 0xe63   : > { %v3906_v45 = vadd.f32 %v5586_v3, %v3905_v51  ;;  %v5913_v52 = vpop.f32.mrb[57].mxu1 }
 0xe64   : > { %v3908_v53 = vpop.f32.mrb[58].mxu1 }
 0xe65   : > { %v5914_v55 = vpop.f32.mrb[59].mxu1  ;;  %v4018_v34 = vsel %vm3123_vm5, %v3906_v45, -inf }
 0xe66   : > { %v3951_v35 = vpop.f32.mrb[52].mxu0  ;;  %4019 = vmax.xlane.f32.xlu1 %v4018_v34 }
 0xe67   : > { %v8943_v56 = vadd.f32 %v5585_v16, %v3951_v35  ;;  %v5919_v57 = vpop.f32.mrb[53].mxu0 }
 0xe68   : > { %v3954_v58 = vpop.f32.mrb[54].mxu0 }
 0xe69   : > { %v5920_v54 = vpop.f32.mrb[55].mxu0  ;;  %v4021_v61 = vsel %vm3123_vm5, %v8943_v56, -inf }
 0xe6a   : > { %4022 = vmax.xlane.f32.xlu0 %v4021_v61  ;;  %v3997_v62 = vpop.f32.mrb[60].mxu1 }
 0xe6b   : > { %v3998_v59 = vadd.f32 %v5586_v3, %v3997_v62  ;;  %v5925_v63 = vpop.f32.mrb[61].mxu1 }
 0xe6c   : > { %v4000_v4 = vpop.f32.mrb[62].mxu1 }
 0xe6d   : > { %v5926_v5 = vpop.f32.mrb[63].mxu1  ;;  %v4024_v6 = vsel %vm3123_vm5, %v3998_v59, -inf }
 0xe6e   : > { %v4005_v10 = vpop.xlane.xlu0 %4004  ;;  %4025 = vmax.xlane.f32.xlu1 %v4024_v6 }
 0xe6f   : > { %v4027_v12 = vsub.f32 %v3676_v18, %v4005_v10  ;;  %v8955_v18 = vpack.i.bf16 %v8910_v1, %v8908_v0 }
 0xe71   : > { %v4035_v13 = vmul.f32 1.442695, %v4027_v12  ;;  %v4008_v14 = vpop.xlane.xlu1 %4007 }
 0xe72   : > { %v4028_v15 = vsub.f32 %v3722_v24, %v4008_v14 }
 0xe73   : > { %6444 = vpow2.f32 %v4035_v13 }
 0xe74   : > { %v4037_v16 = vmul.f32 1.442695, %v4028_v15 }
 0xe76   : > { %6446 = vpow2.f32 %v4037_v16 }
 0xe7d   : > { %v6445_v2 = vpop.eup %6444 }
 0xe7e   : > { %v4051_v19 = vsel %vm3123_vm5, %v6445_v2, 0.0 }
 0xe7f   : > { %4052 = vadd.xlane.f32.xlu0 %v4051_v19 }
 0xe80   : > { %v6447_v20 = vpop.eup %6446 }
 0xe81   : > { %v4054_v3 = vsel %vm3123_vm5, %v6447_v20, 0.0 }
 0xe82   : > { %4055 = vadd.xlane.f32.xlu1 %v4054_v3 }
 0xe93   : > { %6341 = vrot.lane.b32.xlu1 %v6340_v21, %s7594_s4 }
 0xe97   : > { %6346 = vrot.lane.b32.xlu1 %v8955_v18, %s7593_s14 }
 0xe9b   : > { %6351 = vrot.lane.b32.xlu1 %v6340_v21, %s7593_s14 }
 0xee7   : > { %v4011_v22 = vpop.xlane.xlu0 %4010 }
 0xee8   : > { %v4029_v23 = vsub.f32 %v3768_v30, %v4011_v22 }
 0xeea   : > { %v4039_v24 = vmul.f32 1.442695, %v4029_v23 }
 0xeeb   : > { %v4014_v25 = vpop.xlane.xlu0 %4013 }
 0xeec   : > { %6448 = vpow2.f32 %v4039_v24  ;;  %v4030_v60 = vsub.f32 %v3814_v37, %v4014_v25 }
 0xeee   : > { %v4041_v26 = vmul.f32 1.442695, %v4030_v60 }
 0xeef   : > { %v4017_v37 = vpop.xlane.xlu0 %4016 }
 0xef0   : > { %6450 = vpow2.f32 %v4041_v26  ;;  %v4031_v46 = vsub.f32 %v8938_v43, %v4017_v37 }
 0xef2   : > { %v4043_v55 = vmul.f32 1.442695, %v4031_v46 }
 0xef3   : > { %v4020_v7 = vpop.xlane.xlu1 %4019 }
 0xef4   : > { %v4032_v9 = vsub.f32 %v3906_v45, %v4020_v7 }
 0xef6   : > { %v8960_v27 = vpop.eup %6448  ;;  %v4045_v28 = vmul.f32 1.442695, %v4032_v9 }
 0xef7   : > { %v4057_v0 = vsel %vm3123_vm5, %v8960_v27, 0.0  ;;  %v4023_v38 = vpop.xlane.xlu0 %4022 }
 0xef8   : > { %6452 = vpow2.f32 %v4045_v28  ;;  %4058 = vadd.xlane.f32.xlu0 %v4057_v0  ;;  %v4033_v34 = vsub.f32 %v8943_v56, %v4023_v38 }
 0xefa   : > { %v8964_v1 = vpop.eup %6450  ;;  %v4047_v43 = vmul.f32 1.442695, %v4033_v34 }
 0xefb   : > { %v4026_v29 = vpop.xlane.xlu1 %4025  ;;  %v4060_v30 = vsel %vm3123_vm5, %v8964_v1, 0.0 }
 0xefc   : > { %v4034_v31 = vsub.f32 %v3998_v59, %v4026_v29  ;;  %4061 = vadd.xlane.f32.xlu1 %v4060_v30 }
 0xefe   : > { %v4049_v32 = vmul.f32 1.442695, %v4034_v31 }
 0xf00   : > { %6454 = vpow2.f32 %v4049_v32 }
 0xf02   : > { %v8968_v33 = vpop.eup %6452 }
 0xf03   : > { %v4066_v36 = vsel %vm3123_vm5, %v8968_v33, 0.0 }
 0xf04   : > { %4067 = vadd.xlane.f32.xlu1 %v4066_v36 }
 0xf0a   : > { %v8972_v40 = vpop.eup %6454 }
 0xf0b   : > { %v4072_v39 = vsel %vm3123_vm5, %v8972_v40, 0.0 }
 0xf0c   : > { %v4053_v41 = vpop.xlane.xlu0 %4052  ;;  %4073 = vadd.xlane.f32.xlu1 %v4072_v39 }
 0xf0d   : > { %6456 = vrcp.f32 %v4053_v41 }
 0xf0e   : > { %6336 = vrot.lane.b32.xlu0 %v8955_v18, %s7594_s4 }
 0xf0f   : > { %v4056_v42 = vpop.xlane.xlu1 %4055 }
 0xf10   : > { %6458 = vrcp.f32 %v4056_v42 }
 0xf11   : > { %6460 = vpow2.f32 %v4043_v55 }
 0xf12   : > { %6462 = vpow2.f32 %v4047_v43 }
 0xf13   : > { %v6342_v49 = vpop.permute.xlu1 %6341 }
 0xf14   : > { %v6344_v45 = vunpack.i.h.bf16 %v6342_v49  ;;  %v6343_v52 = vunpack.i.l.bf16 %v6342_v49 }
 0xf16   : > { %v3618_v58 = vpack.c.bf16 %v6344_v45, %v6343_v52 }
 0xf17   : > { %v6457_v44 = vpop.eup %6456  ;;  %v6347_v59 = vpop.permute.xlu1 %6346 }
 0xf18   : > { %v4083_v50 = vmul.f32 %v6457_v44, %v6445_v2  ;;  %v6349_v15 = vunpack.i.h.bf16 %v6347_v59  ;;  %v6348_v16 = vunpack.i.l.bf16 %v6347_v59 }
 0xf1a   : > { %v6459_v51 = vpop.eup %6458  ;;  %v4091_v53 = vpack.c.bf16 %v4083_v50, %v4083_v50 }
 0xf1b   : > { %v4084_v35 = vmul.f32 %v6459_v51, %v6447_v20  ;;  %v8988_v56 = vpop.eup %6460  ;;  %v6352_v63 = vpop.permute.xlu1 %6351 }
 0xf1c   : > { %5930 = vmatmul.mubr.msk.bf16.vlgmr.msra.gmra.mrb[56].mxu0 %vm3123_vm5, %v4091_v53  ;;  %v4063_v54 = vsel %vm3123_vm5, %v8988_v56, 0.0  ;;  %v8992_v61 = vpop.eup %6462  ;;  %v6353_v22 = vunpack.i.l.bf16 %v6352_v63 }
 0xf1d   : > { %6361 = vrot.lane.b32.xlu1 %v6340_v21, %s7595_s15  ;;  %v4092_v57 = vpack.c.bf16 %v4084_v35, %v4084_v35  ;;  %5941 = vmatprep.mubr.msk.bf16.mxu0 %vm7592_vm2, %v7591_v17  ;;  %v4069_v62 = vsel %vm3123_vm5, %v8992_v61, 0.0  ;;  %v3619_v21 = vpack.c.bf16 %v6349_v15, %v6348_v16  ;;  %v6396_v16 = vld [vmem:[%s1680_s3] sm:$0xff]  }
 0xf1f   : > { %5936 = vmatmul.mubr.msk.bf16.vlgmr.msra.gmra.mrb[64].mxu1 %vm3123_vm5, %v4092_v57 }
 0xf20   : > { %5946 = vmatpush3.bf16.msra.mxu1 %v3618_v58  ;;  %5947 = vmatprep.mubr.msk.bf16.mxu1 %vm7592_vm2, %v7591_v17 }
 0xf21   : > { %5957 = vmatprep.subr.bf16.mxu1 %v7591_v17 }
 0xf2d   : > { %4064 = vadd.xlane.f32.xlu0 %v4063_v54 }
 0xf31   : > { %4070 = vadd.xlane.f32.xlu0 %v4069_v62 }
 0xf47   : > { %6356 = vrot.lane.b32.xlu0 %v8955_v18, %s7595_s15  ;;  %v6354_v18 = vunpack.i.h.bf16 %v6352_v63 }
 0xf49   : > { %v3620_v25 = vpack.c.bf16 %v6354_v18, %v6353_v22 }
 0xf85   : > { %v4059_v4 = vpop.xlane.xlu0 %4058 }
 0xf86   : > { %6464 = vrcp.f32 %v4059_v4 }
 0xf89   : > { %v4062_v5 = vpop.xlane.xlu1 %4061  ;;  %v6337_v6 = vpop.permute.xlu0 %6336 }
 0xf8a   : > { %6466 = vrcp.f32 %v4062_v5  ;;  %v6339_v10 = vunpack.i.h.bf16 %v6337_v6  ;;  %v6338_v12 = vunpack.i.l.bf16 %v6337_v6 }
 0xf8c   : > { %v3617_v13 = vpack.c.bf16 %v6339_v10, %v6338_v12 }
 0xf8e   : > { %5940 = vmatpush3.bf16.msra.mxu0 %v3617_v13 }
 0xf8f   : > { %5951 = vmatprep.subr.bf16.mxu0 %v7591_v17 }
 0xf90   : > { %v6465_v14 = vpop.eup %6464 }
 0xf91   : > { %v4085_v2 = vmul.f32 %v6465_v14, %v8960_v27  ;;  %v4068_v19 = vpop.xlane.xlu1 %4067 }
 0xf92   : > { %6468 = vrcp.f32 %v4068_v19  ;;  %v6397_v19 = vld [vmem:[%s1680_s3 + $0x8] sm:$0xff]  }
 0xf93   : > { %v4093_v20 = vpack.c.bf16 %v4085_v2, %v4085_v2 }
 0xf94   : > { %v6467_v3 = vpop.eup %6466 }
 0xf95   : > { %v4086_v23 = vmul.f32 %v6467_v3, %v8964_v1  ;;  %5942 = vmatmul.mubr.msk.bf16.vlgmr.msra.gmra.mrb[60].mxu0 %vm3123_vm5, %v4093_v20 }
 0xf96   : > { %5952 = vmatpush3.bf16.msra.mxu0 %v3619_v21  ;;  %5953 = vmatprep.mubr.msk.bf16.mxu0 %vm7592_vm2, %v7591_v17 }
 0xf97   : > { %v4094_v24 = vpack.c.bf16 %v4086_v23, %v4086_v23  ;;  %5963 = vmatprep.subr.bf16.mxu0 %v7591_v17 }
 0xf99   : > { %5948 = vmatmul.mubr.msk.bf16.vlgmr.msra.gmra.mrb[68].mxu1 %vm3123_vm5, %v4094_v24  ;;  %v4074_v60 = vpop.xlane.xlu1 %4073 }
 0xf9a   : > { %6470 = vrcp.f32 %v4074_v60  ;;  %5958 = vmatpush3.bf16.msra.mxu1 %v3620_v25  ;;  %5959 = vmatprep.mubr.msk.bf16.mxu1 %vm7592_vm2, %v7591_v17 }
 0xf9b   : > { %5969 = vmatprep.subr.bf16.mxu1 %v7591_v17 }
 0xf9c   : > { %v6469_v26 = vpop.eup %6468 }
 0xf9d   : > { %v4088_v7 = vmul.f32 %v6469_v26, %v8968_v33  ;;  %v6362_v9 = vpop.permute.xlu1 %6361 }
 0xf9e   : > { %v6364_v27 = vunpack.i.h.bf16 %v6362_v9  ;;  %v6363_v28 = vunpack.i.l.bf16 %v6362_v9 }
 0xf9f   : > { %v4096_v0 = vpack.c.bf16 %v4088_v7, %v4088_v7 }
 0xfa0   : > { %v3622_v1 = vpack.c.bf16 %v6364_v27, %v6363_v28 }
 0xfa1   : > { %5960 = vmatmul.mubr.msk.bf16.vlgmr.msra.gmra.mrb[72].mxu1 %vm3123_vm5, %v4096_v0 }
 0xfa2   : > { %5970 = vmatpush3.bf16.msra.mxu1 %v3622_v1  ;;  %5971 = vmatprep.mubr.msk.bf16.mxu1 %vm7592_vm2, %v7591_v17 }
 0xfa3   : > { %5983 = vmatprep.subr.bf16.mxu1 %v7591_v17 }
 0xfa4   : > { %v6471_v29 = vpop.eup %6470 }
 0xfa5   : > { %v4090_v30 = vmul.f32 %v6471_v29, %v8972_v40 }
 0xfa7   : > { %v4098_v31 = vpack.c.bf16 %v4090_v30, %v4090_v30 }
 0xfa9   : > { %5972 = vmatmul.mubr.msk.bf16.vlgmr.msra.gmra.mrb[76].mxu1 %vm3123_vm5, %v4098_v31 }
 0xfaa   : > { %5987 = vmatprep.mubr.msk.bf16.mxu1 %vm7592_vm2, %v7591_v17 }
 0xfba   : > { %v4065_v32 = vpop.xlane.xlu0 %4064 }
 0xfbb   : > { %6472 = vrcp.f32 %v4065_v32 }
 0xfbe   : > { %v4071_v33 = vpop.xlane.xlu0 %4070 }
 0xfbf   : > { %6474 = vrcp.f32 %v4071_v33 }
 0xfc2   : > { %v6357_v36 = vpop.permute.xlu0 %6356 }
 0xfc3   : > { %v6359_v38 = vunpack.i.h.bf16 %v6357_v36  ;;  %v6358_v39 = vunpack.i.l.bf16 %v6357_v36 }
 0xfc5   : > { %v6473_v37 = vpop.eup %6472  ;;  %v3621_v46 = vpack.c.bf16 %v6359_v38, %v6358_v39 }
 0xfc6   : > { %v4087_v41 = vmul.f32 %v6473_v37, %v8988_v56 }
 0xfc8   : > { %v4095_v42 = vpack.c.bf16 %v4087_v41, %v4087_v41  ;;  %v5603_v41 = vld [vmem:[%s9349_s6] ss:$0 sm:$0xff] }
 0xfc9   : > { %v6475_v44 = vpop.eup %6474 }
 0xfca   : > { %5954 = vmatmul.mubr.msk.bf16.vlgmr.msra.gmra.mrb[64].mxu0 %vm3123_vm5, %v4095_v42  ;;  %v4089_v40 = vmul.f32 %v6475_v44, %v8992_v61 }
 0xfcb   : > { %5964 = vmatpush3.bf16.msra.mxu0 %v3621_v46  ;;  %5965 = vmatprep.mubr.msk.bf16.mxu0 %vm7592_vm2, %v7591_v17 }
 0xfcc   : > { %5975 = vmatprep.subr.bf16.mxu0 %v7591_v17  ;;  %v4097_v49 = vpack.c.bf16 %v4089_v40, %v4089_v40 }
 0xfd2   : > { %5966 = vmatmul.mubr.msk.bf16.vlgmr.msra.gmra.mrb[68].mxu0 %vm3123_vm5, %v4097_v49 }
 0xfd3   : > { %5979 = vmatprep.mubr.msk.bf16.mxu0 %vm7592_vm2, %v7591_v17  ;;  %5976 = vmatpush3.bf16.msra.mxu0 %v6396_v16 }
 0xfd4   : > { %5977 = vmatprep.subr.bf16.mxu0 %v7591_v17 }
 0xfd7   : > { %5978 = vmatpush3.bf16.msra.mxu0 %v6397_v19 }
 0xfd8   : > { %5991 = vmatprep.subr.bf16.mxu0 %v7591_v17 }
 0xfef   : > { %v4136_v50 = vpop.f32.mrb[56].mxu0 }
 0xff0   : > { %v5931_v51 = vpop.f32.mrb[57].mxu0 }
 0xff1   : > { %v4139_v45 = vpop.f32.mrb[58].mxu0 }
 0xff2   : > { %v4179_v52 = vpop.f32.mrb[64].mxu1  ;;  %v5932_v53 = vpop.f32.mrb[59].mxu0 }
 0xff3   : > { %v5937_v55 = vpop.f32.mrb[65].mxu1 }
 0xff4   : > { %v4182_v34 = vpop.f32.mrb[66].mxu1 }
 0xff5   : > { %v5938_v35 = vpop.f32.mrb[67].mxu1 }
0x1068   : > { %v4222_v57 = vpop.f32.mrb[60].mxu0 }
0x1069   : > { %v5943_v58 = vpop.f32.mrb[61].mxu0 }
0x106a   : > { %v4225_v43 = vpop.f32.mrb[62].mxu0 }
0x106b   : > { %v5944_v56 = vpop.f32.mrb[63].mxu0 }
0x106c   : > { %v4265_v54 = vpop.f32.mrb[68].mxu1 }
0x106d   : > { %v6365_v61 = vpack.i.bf16 %v4265_v54, %v4222_v57  ;;  %v5949_v62 = vpop.f32.mrb[69].mxu1 }
0x106e   : > { %v4268_v59 = vpop.f32.mrb[70].mxu1 }
0x106f   : > { %v5950_v63 = vpop.f32.mrb[71].mxu1  ;;  %6366 = vrot.lane.b32.xlu0 %v6365_v61, %s7597_s17  ;;  %v6400_v59 = vld [vmem:[%s8579_s5] sm:$0xff]  }
0x1070   : > { %v6401_v63 = vld [vmem:[%s8579_s5 + $0x8] sm:$0xff]  }
0x1074   : > { %v4351_v4 = vpop.f32.mrb[72].mxu1 }
0x1075   : > { %v5961_v5 = vpop.f32.mrb[73].mxu1 }
0x1076   : > { %v4354_v6 = vpop.f32.mrb[74].mxu1 }
0x1077   : > { %v5962_v10 = vpop.f32.mrb[75].mxu1 }
0x107c   : > { %v4437_v12 = vpop.f32.mrb[76].mxu1 }
0x107d   : > { %v5973_v13 = vpop.f32.mrb[77].mxu1 }
0x107e   : > { %v4440_v14 = vpop.f32.mrb[78].mxu1 }
0x107f   : > { %v5974_v15 = vpop.f32.mrb[79].mxu1 }
0x109d   : > { %v4308_v2 = vpop.f32.mrb[64].mxu0 }
0x109e   : > { %v6370_v20 = vpack.i.bf16 %v4351_v4, %v4308_v2  ;;  %v5955_v3 = vpop.f32.mrb[65].mxu0 }
0x109f   : > { %v4311_v21 = vpop.f32.mrb[66].mxu0  ;;  %v5608_v3 = vld [vmem:[%s9354_s26] ss:$0 sm:$0xff] }
0x10a0   : > { %6371 = vrot.lane.b32.xlu1 %v6370_v20, %s7598_s22  ;;  %v5956_v18 = vpop.f32.mrb[67].mxu0  ;;  %s9351_s22 = scalar_lea.vmem [#allocation33], %s8550_s9  ;;  %s9353_s9 = scalar_lea.vmem [#allocation31], %s8547_s8 }
0x10a1   : > { %v6398_v61 = vld [vmem:[%s9351_s22] sm:$0xff]   ;;  %s9352_s7 = smov %s9351_s22  ;;  %v5607_v16 = vld [vmem:[%s9353_s9] ss:$0 sm:$0xff] }
0x10a2   : > { %5984 = vmatpush3.bf16.msra.mxu1 %v6398_v61  ;;  %v6399_v62 = vld [vmem:[%s9352_s7 + $0x8] sm:$0xff]  }
0x10a3   : > { %5985 = vmatprep.subr.bf16.mxu1 %v7591_v17 }
0x10a5   : > { %v4394_v22 = vpop.f32.mrb[68].mxu0 }
0x10a6   : > { %v6375_v23 = vpack.i.bf16 %v4437_v12, %v4394_v22  ;;  %v5967_v24 = vpop.f32.mrb[69].mxu0  ;;  %5986 = vmatpush3.bf16.msra.mxu1 %v6399_v62 }
0x10a7   : > { %v4397_v25 = vpop.f32.mrb[70].mxu0  ;;  %v6402_v24 = vld [vmem:[%s8579_s5 + $0x10] sm:$0xff]  }
0x10a8   : > { %6376 = vrot.lane.b32.xlu0 %v6375_v23, %s7599_s12  ;;  %v5968_v60 = vpop.f32.mrb[71].mxu0  ;;  %v6403_v25 = vld [vmem:[%s8579_s5 + $0x18] sm:$0xff]   ;;  %s9357_s5 = sld [smem:[#allocation81_spill]] }
0x10a9   : > { %v5609_v60 = vld [vmem:[%s9355_s28] ss:$0 sm:$0xff] }
0x10ae   : > { %p5619_p12 = scmp.ge.s32.totalorder %s9357_s5, 1 }
0x10e1   : > { %v6367_v26 = vpop.permute.xlu0 %6366 }
0x10e2   : > { %v6369_v9 = vunpack.i.h.bf16 %v6367_v26  ;;  %v6368_v27 = vunpack.i.l.bf16 %v6367_v26 }
0x10e4   : > { %v4468_v29 = vsel %vm2242_vm3, %v4179_v52, %v6369_v9  ;;  %v4467_v30 = vsel %vm2242_vm3, %v4136_v50, %v6368_v27 }
0x1112   : > { %v6372_v7 = vpop.permute.xlu1 %6371 }
0x1113   : > { %v6374_v28 = vunpack.i.h.bf16 %v6372_v7  ;;  %v6373_v0 = vunpack.i.l.bf16 %v6372_v7 }
0x1115   : > { %v4470_v33 = vsel %vm3123_vm5, %v4468_v29, %v6374_v28  ;;  %v4469_v36 = vsel %vm3123_vm5, %v4467_v30, %v6373_v0 }
0x111a   : > { %v6377_v1 = vpop.permute.xlu0 %6376 }
0x111b   : > { %v6379_v31 = vunpack.i.h.bf16 %v6377_v1  ;;  %v6378_v32 = vunpack.i.l.bf16 %v6377_v1 }
0x111d   : > { %v4472_v37 = vsel %vm3126_vm6, %v4470_v33, %v6379_v31  ;;  %v4471_v38 = vsel %vm3126_vm6, %v4469_v36, %v6378_v32  ;;  %v5613_v31 = vld [vmem:[%s9356_s1] ss:$0 sm:$0xff] }
0x111e   : > { %v4473_v39 = vpack.c.bf16 %v4472_v37, %v4471_v38 }
0x1120   : > { %5980 = vmatmul.mubr.msk.bf16.vlgmr.msra.gmra.mrb[72].mxu0 %vm1984_vm1, %v4473_v39 }
0x1121   : > { %5999 = vmatprep.mubr.msk.bf16.mxu0 %vm7592_vm2, %v7591_v17  ;;  %5992 = vmatpush3.bf16.msra.mxu0 %v6400_v59 }
0x1122   : > { %5993 = vmatprep.subr.bf16.mxu0 %v7591_v17 }
0x1125   : > { %5994 = vmatpush3.bf16.msra.mxu0 %v6401_v63 }
0x1126   : > { %5995 = vmatprep.subr.bf16.mxu0 %v7591_v17 }
0x1129   : > { %5996 = vmatpush3.bf16.msra.mxu0 %v6402_v24 }
0x112a   : > { %5997 = vmatprep.subr.bf16.mxu0 %v7591_v17 }
0x112d   : > { %5998 = vmatpush3.bf16.msra.mxu0 %v6403_v25 }
0x11f3   : > { %v4529_v42 = vpop.f32.mrb[72].mxu0 }
0x11f4   : > { %v4530_v44 = vadd.f32 %v5603_v41, %v4529_v42  ;;  %v5981_v46 = vpop.f32.mrb[73].mxu0 }
0x11f5   : > { %v4532_v40 = vpop.f32.mrb[74].mxu0 }
0x11f6   : > { %v9048_v49 = vadd.f32 %v4530_v44, %v8822_v8  ;;  %v4533_v50 = vadd.f32 %v5603_v41, %v4532_v40  ;;  %v5982_v51 = vpop.f32.mrb[75].mxu0 }
0x11f8   : > { %v9051_v45 = vadd.f32 %v4533_v50, %v8825_v11  ;;  %v4540_v52 = vsel %vm1984_vm1, %v9048_v49, 0.0 }
0x11f9   : > { %4541 = vadd.xlane.f32.xlu1 %v4540_v52 }
0x11fa   : > { %v4543_v53 = vsel %vm1984_vm1, %v9051_v45, 0.0 }
0x11fb   : > { %4544 = vadd.xlane.f32.xlu0 %v4543_v53 }
0x120a   : > { %2168 = vrot.lane.b32.xlu1 %v8641_v47, %s9350_s13 }
0x1286   : > { %v4542_v8 = vpop.xlane.xlu1 %4541 }
0x1287   : > { %v4546_v55 = vmul.f32 0.03125, %v4542_v8 }
0x1288   : > { %v4545_v34 = vpop.xlane.xlu0 %4544 }
0x1289   : > { %v4548_v35 = vsub.f32 %v9048_v49, %v4546_v55  ;;  %v4547_v11 = vmul.f32 0.03125, %v4545_v34 }
0x128a   : > { %v2169_v57 = vpop.permute.xlu1 %2168 }
0x128b   : > { %v4549_v58 = vsub.f32 %v9051_v45, %v4547_v11  ;;  %2174 = vst.msk [vmem:[%s8590_s10] sm:$0xff] %vm1984_vm1, %v2169_v57  ;;  %v4550_v43 = vmul.f32 %v4548_v35, %v4548_v35 }
0x128d   : > { %v4552_v56 = vsel %vm1984_vm1, %v4550_v43, 0.0  ;;  %v4551_v54 = vmul.f32 %v4549_v58, %v4549_v58 }
0x128e   : > { %4553 = vadd.xlane.f32.xlu0 %v4552_v56 }
0x128f   : > { %v4555_v47 = vsel %vm1984_vm1, %v4551_v54, 0.0 }
0x1292   : > { %4556 = vadd.xlane.f32.xlu0 %v4555_v47 }
0x12a8   : > { %2170 = vrot.lane.b32.xlu0 %v8643_v48, %s9350_s13 }
0x131b   : > { %v4554_v4 = vpop.xlane.xlu0 %4553 }
0x131c   : > { %v4558_v48 = vmul.f32 0.03125, %v4554_v4 }
0x131e   : > { %v4560_v5 = vadd.f32 1e-05, %v4558_v48 }
0x131f   : > { %v4557_v6 = vpop.xlane.xlu0 %4556 }
0x1320   : > { %6476 = vrsqrt.f32 %v4560_v5  ;;  %v4559_v10 = vmul.f32 0.03125, %v4557_v6 }
0x1322   : > { %v4561_v12 = vadd.f32 1e-05, %v4559_v10 }
0x1323   : > { %v2171_v13 = vpop.permute.xlu0 %2170 }
0x1324   : > { %6478 = vrsqrt.f32 %v4561_v12  ;;  %2175 = vst.msk [vmem:[%s8590_s10 + $0x8] sm:$0xff] %vm1984_vm1, %v2171_v13 }
0x132a   : > { %v6477_v14 = vpop.eup %6476 }
0x132b   : > { %v4564_v15 = vmul.f32 %v6477_v14, %v4548_v35 }
0x132d   : > { %v4572_v19 = vmul.f32 %v5607_v16, %v4564_v15 }
0x132e   : > { %v6479_v2 = vpop.eup %6478 }
0x132f   : > { %v4565_v20 = vmul.f32 %v6479_v2, %v4549_v58  ;;  %v4580_v18 = vadd.f32 %v5608_v3, %v4572_v19 }
0x1331   : > { %v4573_v21 = vmul.f32 %v5607_v16, %v4565_v20 }
0x1333   : > { %v4581_v22 = vadd.f32 %v5608_v3, %v4573_v21 }
0x1335   : > { %v4587_v23 = vpack.c.bf16 %v4581_v22, %v4580_v18 }
0x1337   : > { %5988 = vmatmul.mubr.msk.bf16.vlgmr.msra.gmra.mrb[80].mxu1 %vm1984_vm1, %v4587_v23 }
0x140a   : > { %v4643_v26 = vpop.f32.mrb[80].mxu1 }
0x140b   : > { %v4644_v7 = vadd.f32 %v5609_v60, %v4643_v26  ;;  %v5989_v9 = vpop.f32.mrb[81].mxu1 }
0x140c   : > { %v4646_v27 = vpop.f32.mrb[82].mxu1 }
0x140d   : > { %v4647_v28 = vadd.f32 %v5609_v60, %v4646_v27  ;;  %v5990_v0 = vpop.f32.mrb[83].mxu1  ;;  %v4650_v1 = vmax.f32 %v4644_v7, 0.0 }
0x140f   : > { %v4651_v29 = vmax.f32 %v4647_v28, 0.0 }
0x1411   : > { %v4661_v30 = vpack.c.bf16 %v4651_v29, %v4650_v1 }
0x1413   : > { %6000 = vmatmul.mubr.msk.bf16.vlgmr.msra.gmra.mrb[76].mxu0 %vm4692_vm7, %v4661_v30 }
0x14e5   : > { %4742 = sbr.rel (%p5619_p12) target bundleno = 5358 (0x14ee), region = 284 }
0x14e6   : > { %v4730_v32 = vpop.f32.mrb[76].mxu0 }
0x14e7   : > { %v4731_v33 = vadd.f32 %v5613_v31, %v4730_v32  ;;  %v6001_v17 = vpop.f32.mrb[77].mxu0 }
0x14e8   : > { %v4733_v36 = vpop.f32.mrb[78].mxu0 }
0x14e9   : > { %v4737_v37 = vadd.f32 %v4731_v33, %v9048_v49  ;;  %v4734_v38 = vadd.f32 %v5613_v31, %v4733_v36  ;;  %v6002_v39 = vpop.f32.mrb[79].mxu0 }
0x14eb   : > { %v4738_v41 = vadd.f32 %v4734_v38, %v9051_v45  ;;  %4743 = vst.msk [vmem:[#allocation39] sm:$0xff] (!%p5619_p12), %vm1984_vm1, %v4737_v37 }
0x14ed   : > { %4744 = vst.msk [vmem:[#allocation39 + $0x8] sm:$0xff] %vm1984_vm1, %v4738_v41 }
0x14ee PF: > { %s9358_s2 = sld [smem:[#allocation81_spill]] }
0x14f4   : > { %p5620_p1 = scmp.ne.s32.totalorder %s9358_s2, 1 }
0x14f5   : > { %v4751_v42 = vsel (!%p5620_p1), %vm1984_vm1, %v4737_v37, 0.0  ;;  %v4754_v44 = vsel (!%p5620_p1), %vm1984_vm1, %v4738_v41, 0.0  ;;  %v5621_v54 = vld [vmem:[#allocation37] ss:$0 sm:$0xff] (!%p5620_p1)  ;;  %v5622_v61 = vld [vmem:[#allocation38] ss:$0 sm:$0xff] (!%p5620_p1) }
0x14f6   : > { %4748 = sbr.rel (%p5620_p1) target bundleno = 5683 (0x1633), region = 288  ;;  %4752 = vadd.xlane.f32.xlu0 (!%p5620_p1), %v4751_v42 }
0x14fa   : > { %4755 = vadd.xlane.f32.xlu0 (!%p5620_p1), %v4754_v44 }
0x1583   : > { %v4753_v46 = vpop.xlane.xlu0 %4752 }
0x1584   : > { %v4757_v40 = vmul.f32 0.03125, %v4753_v46 }
0x1586   : > { %v4759_v49 = vsub.f32 %v4737_v37, %v4757_v40 }
0x1587   : > { %v4756_v50 = vpop.xlane.xlu0 %4755 }
0x1588   : > { %v4758_v51 = vmul.f32 0.03125, %v4756_v50  ;;  %v4761_v45 = vmul.f32 %v4759_v49, %v4759_v49 }
0x158a   : > { %v4760_v52 = vsub.f32 %v4738_v41, %v4758_v51  ;;  %v4763_v53 = vsel %vm1984_vm1, %v4761_v45, 0.0 }
0x158b   : > { %4764 = vadd.xlane.f32.xlu1 %v4763_v53 }
0x158c   : > { %v4762_v8 = vmul.f32 %v4760_v52, %v4760_v52 }
0x158e   : > { %v4766_v55 = vsel %vm1984_vm1, %v4762_v8, 0.0 }
0x158f   : > { %4767 = vadd.xlane.f32.xlu1 %v4766_v55 }
0x1618   : > { %v4765_v34 = vpop.xlane.xlu1 %4764 }
0x1619   : > { %v4769_v35 = vmul.f32 0.03125, %v4765_v34 }
0x161b   : > { %v4771_v11 = vadd.f32 1e-05, %v4769_v35 }
0x161c   : > { %v4768_v57 = vpop.xlane.xlu1 %4767 }
0x161d   : > { %6480 = vrsqrt.f32 %v4771_v11  ;;  %v4770_v58 = vmul.f32 0.03125, %v4768_v57 }
0x161f   : > { %v4772_v43 = vadd.f32 1e-05, %v4770_v58 }
0x1621   : > { %6482 = vrsqrt.f32 %v4772_v43 }
0x1627   : > { %v6481_v56 = vpop.eup %6480 }
0x1628   : > { %v4775_v47 = vmul.f32 %v6481_v56, %v4759_v49 }
0x162a   : > { %v4783_v62 = vmul.f32 %v5621_v54, %v4775_v47 }
0x162b   : > { %v6483_v59 = vpop.eup %6482 }
0x162c   : > { %v4791_v63 = vadd.f32 %v5622_v61, %v4783_v62  ;;  %v4776_v4 = vmul.f32 %v6483_v59, %v4760_v52 }
0x162e   : > { %4793 = vst.msk [vmem:[#allocation39] sm:$0xff] %vm1984_vm1, %v4791_v63  ;;  %v4784_v48 = vmul.f32 %v5621_v54, %v4776_v4 }
0x1630   : > { %v4792_v5 = vadd.f32 %v5622_v61, %v4784_v48 }
0x1632   : > { %4794 = vst.msk [vmem:[#allocation39 + $0x8] sm:$0xff] %vm1984_vm1, %v4792_v5 }
0x1633 PF: > { %s7600_s3 = smov [#allocation39]   ;;  %p9359_p10 = scmp.eq.s32.totalorder %s7809_s0, 1 }
0x1634   : > { %s4809_s14 = sshll.u32 %s7600_s3, 4  ;;  %s4810_s14 = int_to_ptr.vmem [resolvable:$true] %s4809_s14 }
0x1635   : > { %s7380_s4 = scalar_lea.vmem %s4810_s14, 256  ;;  %p7387_p3 = scmp.lt.s32.totalorder %s4810_s14, %s4810_s14 }
0x1636   : > { %p7381_p2 = scmp.ne.s32.totalorder %s4810_s14, %s7380_s4  ;;  %p7388_p9 = scmp.lt.s32.totalorder %s7380_s4, %s7380_s4 }
0x1638   : > { %p7382_p13 = pnand %p7381_p2, %p9359_p10  ;;  %p7389_p6 = por %p7388_p9, %p7387_p3 }
0x163a   : > { %p7383_p7 = pneg %p7382_p13 }
0x163c   : > { %p7390_p5 = pnand %p7389_p6, %p7383_p7 }
0x163e   : > { %7393 = shalt.err (!%p7390_p5)
}
0x163f   : > { %s9360_s15 = sld [smem:[#allocation77_spill]]  ;;  %p9362_p8 = pmov %p9359_p10 }
0x1645   : > { %s9361_s19 = smov %s9360_s15  ;;  %s7394_s12 = scalar_lea.hbm %s9360_s15, 256 }
0x1646   : > { %p7395_p4 = scmp.ne.s32.totalorder %s9361_s19, %s7394_s12  ;;  %p7400_p12 = scmp.lt.u32.totalorder %s7394_s12, %s9361_s19 }
0x1648   : > { %p7396_p0 = pnand %p7395_p4, %p9362_p8 }
0x164a   : > { %p7397_p11 = pneg %p7396_p0 }
0x164c   : > { %p7402_p1 = pnand %p7400_p12, %p7397_p11 }
0x164e   : > { %7405 = shalt.err (!%p7402_p1)
}
0x164f   : > { %s7601_s23 = smov 128   ;;  %p9363_p2 = pmov %p9362_p8 }
0x1650   : > { %s9364_s6 = sld [smem:[#allocation81_spill]]  ;;  %s9365_s13 = sld [smem:[#allocation78_spill]] }
0x1651   : > { %s9366_s22 = sld [smem:[#allocation84_spill]]  ;;  %s4827_s9 = sshll.u32 %s8590_s10, 4  ;;  %s9120_s9 = int_to_ptr.vmem [resolvable:$true] %s4827_s9 }
0x1652   : > { %6084 = dma.vmem_to_hbm [thread:$0]  (%p9363_p2), %s4810_s14, 256, %s9361_s19, [#allocation4], %s7601_s23, %s7601_s23, %s7597_s17  }
0x1653   : > { %s4796_s28 = scalar_lea.sflag [#allocation41], %s8547_s8  ;;  %s7406_s1 = scalar_lea.vmem %s9120_s9, 512 }
0x1654   : > { %p7407_p10 = scmp.ne.s32.totalorder %s9120_s9, %s7406_s1  ;;  %s7602_s5 = smov [#allocation40]  }
0x1655   : > { %s7410_s2 = sshll.u32 %s7602_s5, 4  ;;  %s7411_s2 = int_to_ptr.vmem [resolvable:$false] %s7410_s2 }
0x1656   : > { %s5639_s7 = sshll.u32 %s9364_s6, 9  ;;  %s7412_s3 = scalar_lea.vmem %s7411_s2, 1024 }
0x1657   : > { %s9118_s26 = scalar_lea.hbm %s9365_s13, %s5639_s7  ;;  %p9367_p13 = scmp.ne.s32.totalorder %s9366_s22, 0 }
0x1658   : > { %p7413_p9 = scmp.lt.s32.totalorder %s9120_s9, %s7411_s2  ;;  %p7414_p6 = scmp.lt.s32.totalorder %s7412_s3, %s7406_s1 }
0x1659   : > { %p7408_p7 = pnand %p7407_p10, %p9367_p13 }
0x165a   : > { %p7415_p5 = por %p7414_p6, %p7413_p9 }
0x165b   : > { %p7409_p3 = pneg %p7408_p7 }
0x165d   : > { %p7416_p4 = pnand %p7415_p5, %p7409_p3 }
0x165f   : > { %7419 = shalt.err (!%p7416_p4)
}
0x1660   : > { %s7420_s10 = scalar_lea.hbm %s9118_s26, 512  ;;  %s7424_s14 = scalar_lea.hbm %s9365_s13, 1024 }
0x1661   : > { %p7421_p8 = scmp.ne.s32.totalorder %s9118_s26, %s7420_s10  ;;  %p7425_p12 = scmp.lt.u32.totalorder %s9118_s26, %s9365_s13 }
0x1662   : > { %p7426_p1 = scmp.lt.u32.totalorder %s7424_s14, %s7420_s10  ;;  %p7428_p10 = scmp.lt.u32.totalorder %s7420_s10, %s9118_s26 }
0x1663   : > { %p7422_p0 = pnand %p7421_p8, %p9367_p13 }
0x1664   : > { %p7427_p2 = por %p7426_p1, %p7425_p12 }
0x1665   : > { %p7423_p11 = pneg %p7422_p0 }
0x1666   : > { %p7429_p7 = por %p7428_p10, %p7427_p2 }
0x1668   : > { %p7430_p3 = pnand %p7429_p7, %p7423_p11 }
0x166a   : > { %7433 = shalt.err (!%p7430_p3)
}
0x166b   : > { %6085 = dma.vmem_to_hbm [thread:$0]  (%p9367_p13), %s9120_s9, 512, %s9118_s26, %s4796_s28, %s7601_s23, %s7601_s23, %s7597_s17  }
0x166c   : > { %p9368_p9 = scmp.eq.s32.totalorder %s7809_s0, 1 }
0x166e   : > { %7487 = dma.done.wait (%p9368_p9), [#allocation4], 256   ;;  %p9369_p6 = pmov %p9368_p9 }
0x1670   : > { %7489 = vsyncadd (%p9369_p6), [#allocation4], 4294967040 }
0x1671 PF: > { %s9370_s4 = sld [smem:[#allocation79_spill]]  ;;  %s9371_s15 = sld [smem:[#allocation86_spill]] }
0x1672   : > { %p9373_p4 = scmp.ge.s32.totalorder %s7516_s18, 2 }
0x1677   : > { %s4846_s12 = sand.u32 1, %s9370_s4   ;;  %p9372_p5 = scmp.ne.s32.totalorder %s9371_s15, 0 }
0x1678   : > { %s4847_s6 = scalar_lea.sflag [#allocation41], %s4846_s12 }
0x1679   : > { %p6115_p8 = pnand %p9373_p4, %p9372_p5 }
0x167b   : > { %7491 = dma.done.wait (!%p6115_p8), %s4847_s6, 512  }
0x167c   : > { %7493 = vsyncadd (!%p6115_p8), %s4847_s6, 4294966784  ;;  %s86_s18 = sadd.s32 1, %s7516_s18   ;;  %s9374_s7 = sld [smem:[#allocation80_spill]] }
0x167d   : > { %p83_p0 = scmp.ge.s32.totalorder %s86_s18, 4   ;;  %s9375_s17 = sld [smem:[#allocation85_spill]] }
0x167e   : > { %s9376_s0 = sld [smem:[#allocation82_spill]]  ;;  %s9377_s10 = smov %s7504_s11 }
0x167f   : > { %s9379_s15 = smov %s7512_s16  ;;  %85 = sbr.rel (!%p83_p0) target bundleno = 82 (0x52), region = 538 }
0x1683   : > { %s9378_s11 = smov %s9375_s17 }
0x1684   : > { %s9380_s16 = smov %s9376_s0 }
0x1686   :  { %4852 = vsyncpa [#allocation3], 1 }
0x1687   :  { %4854 = vsyncpa [#allocation3 + $0x1], 1 }
0x1688   :  { %4855 = vsyncpa [#allocation6], 1 }
0x1689   :  { %4856 = vsyncpa [#allocation9], 1 }
0x168a   :  { %4857 = vsyncpa [#allocation12], 1 }
0x168b   :  { %4858 = vsyncpa [#allocation4], 1 }
0x168c   :  { %4860 = vsyncpa [#allocation4 + $0x1], 1 }
0x168d   :  { %4861 = vsyncpa [#allocation41], 1 }
0x168e   :  { %4863 = vsyncpa [#allocation41 + $0x1], 1 }

</bundles_post_ra>
